<compile_context>
chip_gen: v7x
topology: tpu7x:2x2x1
jax: 0.10.0
libtpu: 0.0.40
codegen_flags: <defaults>
</compile_context>

<pallas_src>
import functools

import jax
import jax.numpy as jnp
from jax import lax
from jax.experimental import pallas as pl
from jax.experimental.pallas import tpu as pltpu


def _round_up(x, m):
    return ((x + m - 1) // m) * m


def _phase_offsets(k, s, pad):
    """Sub-pixel decomposition geometry.

    For output phase p (output index mod s), conv-after-nearest-upsample reads
    original pixels at offsets floor((p + kt - pad)/s), kt in [0, k).
    Returns the per-phase smallest offset `los[p]` and the common tap count D
    (phases with fewer distinct offsets get zero-padded weight taps)."""
    los = [(p - pad) // s for p in range(s)]
    his = [(p - pad + k - 1) // s for p in range(s)]
    d = max(h - l for l, h in zip(los, his)) + 1
    return los, d


# ----------------------------------------------------------------------------
# Parameter prep (hoisted): fold nearest-upsample into per-phase weights.
# ----------------------------------------------------------------------------

def prepare_resize_conv_params(conv_w, conv_b, scale_factor, *, pad=1):
    """torch-layout weight (Cout, Cin, k, k) -> per-phase effective weights
    (s*s*D*D, Cout_p8, Cin_p8) bf16 plus bias (Cout_p8, 1) f32.  Taps of the
    original kernel that land on the same original pixel (because of nearest
    replication) are summed, so the upsampled image never has to exist."""
    cout, cin, k, k2 = conv_w.shape
    assert k == k2, "square kernels only"
    s = int(scale_factor)
    assert s == scale_factor and s >= 1, "integer scale factors only"
    los, d = _phase_offsets(k, s, pad)

    cinp = _round_up(cin, 8)
    coutp = _round_up(cout, 8)

    w_eff = jnp.zeros((s, s, d, d, coutp, cinp), jnp.float32)
    for ph in range(s):
        for pw in range(s):
            for kh in range(k):
                dh = (ph + kh - pad) // s - los[ph]
                for kw in range(k):
                    dw = (pw + kw - pad) // s - los[pw]
                    w_eff = w_eff.at[ph, pw, dh, dw, :cout, :cin].add(
                        conv_w[:, :, kh, kw])
    w_eff = w_eff.reshape(s * s * d * d, coutp, cinp)      # tap-major packing
    bias = jnp.zeros((coutp, 1), jnp.float32).at[:cout, 0].set(conv_b)

    return {
        "w": w_eff.astype(jnp.bfloat16),
        "b": bias,
        "s": s, "k": int(k), "pad": int(pad),
        "los": tuple(int(l) for l in los), "D": int(d),
        "cin": int(cin), "cout": int(cout),
        "cinp": int(cinp), "coutp": int(coutp),
    }


# ----------------------------------------------------------------------------
# Pallas kernel: sub-pixel conv over a block of `tr` original rows.
# ----------------------------------------------------------------------------

def _resize_conv_kernel(x_ref, w_ref, b_ref, o_ref, *, s, tr, wc, d,
                        base_h, base_w, cout, coutp):
    """x_ref: (Hp, Cin_p, Wp)         bf16 -- padded original-size image of one
                                              batch element (resident in VMEM
                                              across row blocks).
       w_ref: (s*s*D*D, Cout_p, Cin_p) bf16 -- per-phase per-tap weight mats.
       b_ref: (Cout_p, 1)              f32  -- bias.
       o_ref: (s*tr*s, Cout, Wc)       f32  -- output rows for this block,
                                              dim0 index = (s*t + ph)*s + pw.
    """
    r0 = pl.program_id(1) * tr

    # Hoisted: one bias broadcast and one load of each tiny weight matrix per
    # grid step (JAX does not CSE broadcast_in_dim inside the unrolled loops).
    bias = jnp.broadcast_to(b_ref[...], (coutp, wc))
    wmats = {
        (ph, pw, dh, dw): w_ref[((ph * s + pw) * d + dh) * d + dw]
        for ph in range(s) for pw in range(s)
        for dh in range(d) for dw in range(d)
    }

    for t in range(tr):                                   # static unroll
        for ph in range(s):                               # row phase
            rs = r0 + t + base_h[ph]
            # Lane-dense row planes (Cin_p sublanes x Wp lanes), loaded once and
            # reused across all column phases / column taps of this output row.
            planes = [x_ref[rs + dh] for dh in range(d)]  # (Cin_p, Wp) bf16
            for pw in range(s):                           # column phase
                acc = bias                                # init acc with bias
                for dh in range(d):
                    for dw in range(d):
                        c0 = base_w[pw] + dw              # static lane offset
                        rhs = planes[dh][:, c0:c0 + wc]   # (Cin_p, Wc) bf16
                        acc = acc + jnp.dot(
                            wmats[(ph, pw, dh, dw)], rhs,
                            preferred_element_type=jnp.float32)
                # Unpadded (Cout, Wc) f32 store: lane dim is the image width.
                o_ref[(s * t + ph) * s + pw] = acc[:cout, :]


# ----------------------------------------------------------------------------
# Forward: ResizeConv2d.forward(x) = conv(interpolate(x, scale_factor, 'nearest'))
# ----------------------------------------------------------------------------

def resize_conv2d(prep, x_nchw, *, mode="nearest", tr_max=8):
    """NCHW in / NCHW out, matching the PyTorch module interface."""
    assert mode == "nearest", "only nearest interpolation is implemented"
    # TODO(synk): non-integer scale factors and non-nearest modes (e.g. bilinear)
    # are not implemented.

    s, k, pad = prep["s"], prep["k"], prep["pad"]
    cin, cout = prep["cin"], prep["cout"]
    cinp, coutp = prep["cinp"], prep["coutp"]
    los, d = prep["los"], prep["D"]

    B, C, H, W = x_nchw.shape
    assert C == cin
    ho = s * H + 2 * pad - k + 1                           # conv output size
    wo = s * W + 2 * pad - k + 1
    assert ho % s == 0 and wo % s == 0, \
        "TODO(synk): ragged per-phase row/col counts unsupported"
    R, wc = ho // s, wo // s                               # rows/cols per phase

    min_lo, max_lo = min(los), max(los)
    base = tuple(l - min_lo for l in los)                  # per-phase row/col shift
    pi_t = pj_l = -min_lo                                  # top/left zero padding
    pi_b = R - H + max_lo + d - 1                          # bottom zero padding
    pj_r = wc - W + max_lo + d - 1                         # right zero padding
    assert pi_b >= 0 and pj_r >= 0
    hp, wp = H + pi_t + pi_b, W + pj_l + pj_r

    # Largest row-block size dividing R (R = Ho/s, so odd Ho no longer hurts).
    # TODO(synk): masked tail block instead of divisor fallback.
    tr = max(t for t in range(1, min(R, tr_max) + 1) if R % t == 0)

    # Glue: NCHW -> (B, Hp, Cin_p, Wp) planar rows, conv zero padding, channel
    # zero padding, bf16 matmul operand.  The upsampled image is NEVER built.
    xk = jnp.transpose(x_nchw, (0, 2, 1, 3))
    xk = jnp.pad(xk, ((0, 0), (pi_t, pi_b), (0, cinp - cin), (pj_l, pj_r)))
    xk = xk.astype(jnp.bfloat16)

    kernel = functools.partial(_resize_conv_kernel, s=s, tr=tr, wc=wc, d=d,
                               base_h=base, base_w=base, cout=cout, coutp=coutp)

    lane = 128
    vmem_est = 2 * (hp * cinp * _round_up(wp, lane) * 2           # image (x2 buf)
                    + s * s * d * d * coutp * _round_up(cinp, lane) * 2
                    + coutp * lane * 4
                    + s * tr * s * cout * _round_up(wc, lane) * 4)  # out block
    vmem_limit = int(min(100 * 2**20, max(4 * 2**20, 2 * vmem_est)))

    out4 = pl.pallas_call(
        kernel,
        out_shape=jax.ShapeDtypeStruct((B, ho * s, cout, wc), jnp.float32),
        grid=(B, R // tr),
        in_specs=[
            # Whole padded ORIGINAL-size image of one batch element; the index
            # map ignores the row axis so it stays resident across row blocks.
            # TODO(synk): halo row-tiling for very large H*W (v7x 64 MiB VMEM).
            pl.BlockSpec((None, hp, cinp, wp), lambda b, r: (b, 0, 0, 0)),
            pl.BlockSpec((s * s * d * d, coutp, cinp), lambda b, r: (0, 0, 0)),
            pl.BlockSpec((coutp, 1), lambda b, r: (0, 0)),
        ],
        out_specs=pl.BlockSpec((None, s * tr * s, cout, wc),
                               lambda b, r: (b, r, 0, 0)),
        compiler_params=pltpu.CompilerParams(
            dimension_semantics=("parallel", "parallel"),
            vmem_limit_bytes=vmem_limit),
    )(xk, prep["w"], prep["b"])

    # De-interleave column phases + emit NCHW: one small XLA pass over the
    # true-size (channel-unpadded) output.
    out = out4.reshape(B, ho, s, cout, wc)
    out = jnp.transpose(out, (0, 3, 1, 4, 2)).reshape(B, cout, ho, wc * s)
    return out


# ----------------------------------------------------------------------------
# Pure-f32 reference: actual nearest upsample + Conv2d(padding=1) + bias.
# ----------------------------------------------------------------------------

def _reference_forward(conv_w, conv_b, x_nchw, *, scale_factor):
    s = int(scale_factor)
    up = jnp.repeat(jnp.repeat(x_nchw, s, axis=2), s, axis=3)
    out = lax.conv_general_dilated(
        up, conv_w, window_strides=(1, 1), padding=((1, 1), (1, 1)),
        dimension_numbers=("NCHW", "OIHW", "NCHW"))
    return out + conv_b.reshape(1, -1, 1, 1)


# ----------------------------------------------------------------------------

if __name__ == "__main__":
    key = jax.random.PRNGKey(0)
    kx, kw, kb = jax.random.split(key, 3)

    # Small shapes consistent with the module: NCHW input, 3x3 conv, nearest x2.
    B, Cin, H, W = 2, 4, 16, 16
    Cout, K, scale = 8, 3, 2

    x = jax.random.normal(kx, (B, Cin, H, W), jnp.float32)
    conv_w = 0.1 * jax.random.normal(kw, (Cout, Cin, K, K), jnp.float32)
    conv_b = 0.1 * jax.random.normal(kb, (Cout,), jnp.float32)

    prep = prepare_resize_conv_params(conv_w, conv_b, scale)   # hoisted prep

    out = jax.block_until_ready(resize_conv2d(prep, x))

    assert out.shape == (B, Cout, H * scale, W * scale), out.shape
    assert out.dtype == jnp.float32
    assert bool(jnp.all(jnp.isfinite(out)))

    ref = jax.block_until_ready(
        _reference_forward(conv_w, conv_b, x, scale_factor=scale))
    max_err = float(jnp.max(jnp.abs(out - ref)))
    # bf16 matmul operands vs f32 reference -> loose-ish tolerance.
    assert bool(jnp.allclose(out, ref, atol=2e-2, rtol=2e-2)), max_err

    print("KERNEL_OK")
</pallas_src>

<mosaic_0001>
module attributes {stable_mosaic.version = 11 : i64} {
  func.func @_resize_conv_kernel(%arg0: i32, %arg1: i32, %arg2: memref<1x18x8x18xbf16, #tpu.memory_space<vmem>>, %arg3: memref<16x8x8xbf16, #tpu.memory_space<vmem>>, %arg4: memref<8x1xf32, #tpu.memory_space<vmem>>, %arg5: memref<1x32x8x16xf32, #tpu.memory_space<vmem>>) attributes {dimension_semantics = [#tpu.dimension_semantics<parallel>, #tpu.dimension_semantics<parallel>], iteration_bounds = array<i64: 2, 2>, scalar_prefetch = 0 : i64, scratch_operands = 0 : i64, tpu.core_type = #tpu.core_type<tc>, window_params = [{transform_indices = @transform_0, window_bounds = array<i64: 1, 18, 8, 18>}, {pipeline_mode = #tpu.pipeline_mode<synchronous>, transform_indices = @transform_1, window_bounds = array<i64: 16, 8, 8>}, {pipeline_mode = #tpu.pipeline_mode<synchronous>, transform_indices = @transform_2, window_bounds = array<i64: 8, 1>}, {transform_indices = @transform_3, window_bounds = array<i64: 1, 32, 8, 16>}]} {
    %c8_i32 = arith.constant 8 : i32
    %0 = arith.muli %arg1, %c8_i32 : i32
    %c0 = arith.constant 0 : index
    %c0_0 = arith.constant 0 : index
    %1 = vector.load %arg4[%c0, %c0_0] : memref<8x1xf32, #tpu.memory_space<vmem>>, vector<8x1xf32>
    %2 = vector.shape_cast %1 : vector<8x1xf32> to vector<8x1xf32>
    %3 = vector.broadcast %2 : vector<8x1xf32> to vector<8x16xf32>
    %c0_1 = arith.constant 0 : index
    %c0_2 = arith.constant 0 : index
    %c0_3 = arith.constant 0 : index
    %4 = vector.load %arg3[%c0_1, %c0_2, %c0_3] : memref<16x8x8xbf16, #tpu.memory_space<vmem>>, vector<1x8x8xbf16>
    %5 = vector.shape_cast %4 : vector<1x8x8xbf16> to vector<8x8xbf16>
    %c1 = arith.constant 1 : index
    %c0_4 = arith.constant 0 : index
    %c0_5 = arith.constant 0 : index
    %6 = vector.load %arg3[%c1, %c0_4, %c0_5] : memref<16x8x8xbf16, #tpu.memory_space<vmem>>, vector<1x8x8xbf16>
    %7 = vector.shape_cast %6 : vector<1x8x8xbf16> to vector<8x8xbf16>
    %c2 = arith.constant 2 : index
    %c0_6 = arith.constant 0 : index
    %c0_7 = arith.constant 0 : index
    %8 = vector.load %arg3[%c2, %c0_6, %c0_7] : memref<16x8x8xbf16, #tpu.memory_space<vmem>>, vector<1x8x8xbf16>
    %9 = vector.shape_cast %8 : vector<1x8x8xbf16> to vector<8x8xbf16>
    %c3 = arith.constant 3 : index
    %c0_8 = arith.constant 0 : index
    %c0_9 = arith.constant 0 : index
    %10 = vector.load %arg3[%c3, %c0_8, %c0_9] : memref<16x8x8xbf16, #tpu.memory_space<vmem>>, vector<1x8x8xbf16>
    %11 = vector.shape_cast %10 : vector<1x8x8xbf16> to vector<8x8xbf16>
    %c4 = arith.constant 4 : index
    %c0_10 = arith.constant 0 : index
    %c0_11 = arith.constant 0 : index
    %12 = vector.load %arg3[%c4, %c0_10, %c0_11] : memref<16x8x8xbf16, #tpu.memory_space<vmem>>, vector<1x8x8xbf16>
    %13 = vector.shape_cast %12 : vector<1x8x8xbf16> to vector<8x8xbf16>
    %c5 = arith.constant 5 : index
    %c0_12 = arith.constant 0 : index
    %c0_13 = arith.constant 0 : index
    %14 = vector.load %arg3[%c5, %c0_12, %c0_13] : memref<16x8x8xbf16, #tpu.memory_space<vmem>>, vector<1x8x8xbf16>
    %15 = vector.shape_cast %14 : vector<1x8x8xbf16> to vector<8x8xbf16>
    %c6 = arith.constant 6 : index
    %c0_14 = arith.constant 0 : index
    %c0_15 = arith.constant 0 : index
    %16 = vector.load %arg3[%c6, %c0_14, %c0_15] : memref<16x8x8xbf16, #tpu.memory_space<vmem>>, vector<1x8x8xbf16>
    %17 = vector.shape_cast %16 : vector<1x8x8xbf16> to vector<8x8xbf16>
    %c7 = arith.constant 7 : index
    %c0_16 = arith.constant 0 : index
    %c0_17 = arith.constant 0 : index
    %18 = vector.load %arg3[%c7, %c0_16, %c0_17] : memref<16x8x8xbf16, #tpu.memory_space<vmem>>, vector<1x8x8xbf16>
    %19 = vector.shape_cast %18 : vector<1x8x8xbf16> to vector<8x8xbf16>
    %c8 = arith.constant 8 : index
    %c0_18 = arith.constant 0 : index
    %c0_19 = arith.constant 0 : index
    %20 = vector.load %arg3[%c8, %c0_18, %c0_19] : memref<16x8x8xbf16, #tpu.memory_space<vmem>>, vector<1x8x8xbf16>
    %21 = vector.shape_cast %20 : vector<1x8x8xbf16> to vector<8x8xbf16>
    %c9 = arith.constant 9 : index
    %c0_20 = arith.constant 0 : index
    %c0_21 = arith.constant 0 : index
    %22 = vector.load %arg3[%c9, %c0_20, %c0_21] : memref<16x8x8xbf16, #tpu.memory_space<vmem>>, vector<1x8x8xbf16>
    %23 = vector.shape_cast %22 : vector<1x8x8xbf16> to vector<8x8xbf16>
    %c10 = arith.constant 10 : index
    %c0_22 = arith.constant 0 : index
    %c0_23 = arith.constant 0 : index
    %24 = vector.load %arg3[%c10, %c0_22, %c0_23] : memref<16x8x8xbf16, #tpu.memory_space<vmem>>, vector<1x8x8xbf16>
    %25 = vector.shape_cast %24 : vector<1x8x8xbf16> to vector<8x8xbf16>
    %c11 = arith.constant 11 : index
    %c0_24 = arith.constant 0 : index
    %c0_25 = arith.constant 0 : index
    %26 = vector.load %arg3[%c11, %c0_24, %c0_25] : memref<16x8x8xbf16, #tpu.memory_space<vmem>>, vector<1x8x8xbf16>
    %27 = vector.shape_cast %26 : vector<1x8x8xbf16> to vector<8x8xbf16>
    %c12 = arith.constant 12 : index
    %c0_26 = arith.constant 0 : index
    %c0_27 = arith.constant 0 : index
    %28 = vector.load %arg3[%c12, %c0_26, %c0_27] : memref<16x8x8xbf16, #tpu.memory_space<vmem>>, vector<1x8x8xbf16>
    %29 = vector.shape_cast %28 : vector<1x8x8xbf16> to vector<8x8xbf16>
    %c13 = arith.constant 13 : index
    %c0_28 = arith.constant 0 : index
    %c0_29 = arith.constant 0 : index
    %30 = vector.load %arg3[%c13, %c0_28, %c0_29] : memref<16x8x8xbf16, #tpu.memory_space<vmem>>, vector<1x8x8xbf16>
    %31 = vector.shape_cast %30 : vector<1x8x8xbf16> to vector<8x8xbf16>
    %c14 = arith.constant 14 : index
    %c0_30 = arith.constant 0 : index
    %c0_31 = arith.constant 0 : index
    %32 = vector.load %arg3[%c14, %c0_30, %c0_31] : memref<16x8x8xbf16, #tpu.memory_space<vmem>>, vector<1x8x8xbf16>
    %33 = vector.shape_cast %32 : vector<1x8x8xbf16> to vector<8x8xbf16>
    %c15 = arith.constant 15 : index
    %c0_32 = arith.constant 0 : index
    %c0_33 = arith.constant 0 : index
    %34 = vector.load %arg3[%c15, %c0_32, %c0_33] : memref<16x8x8xbf16, #tpu.memory_space<vmem>>, vector<1x8x8xbf16>
    %35 = vector.shape_cast %34 : vector<1x8x8xbf16> to vector<8x8xbf16>
    %c0_i32 = arith.constant 0 : i32
    %36 = arith.addi %0, %c0_i32 : i32
    %c0_i32_34 = arith.constant 0 : i32
    %37 = arith.addi %36, %c0_i32_34 : i32
    %c0_i32_35 = arith.constant 0 : i32
    %38 = arith.addi %37, %c0_i32_35 : i32
    %c0_36 = arith.constant 0 : index
    %39 = arith.index_cast %38 : i32 to index
    %c0_37 = arith.constant 0 : index
    %c0_38 = arith.constant 0 : index
    %40 = vector.load %arg2[%c0_36, %39, %c0_37, %c0_38] : memref<1x18x8x18xbf16, #tpu.memory_space<vmem>>, vector<1x1x8x18xbf16>
    %41 = vector.shape_cast %40 : vector<1x1x8x18xbf16> to vector<8x18xbf16>
    %c1_i32 = arith.constant 1 : i32
    %42 = arith.addi %37, %c1_i32 : i32
    %c0_39 = arith.constant 0 : index
    %43 = arith.index_cast %42 : i32 to index
    %c0_40 = arith.constant 0 : index
    %c0_41 = arith.constant 0 : index
    %44 = vector.load %arg2[%c0_39, %43, %c0_40, %c0_41] : memref<1x18x8x18xbf16, #tpu.memory_space<vmem>>, vector<1x1x8x18xbf16>
    %45 = vector.shape_cast %44 : vector<1x1x8x18xbf16> to vector<8x18xbf16>
    %46 = vector.extract_strided_slice %41 {offsets = [0, 0], sizes = [8, 16], strides = [1, 1]} : vector<8x18xbf16> to vector<8x16xbf16>
    %cst = arith.constant dense<0.000000e+00> : vector<8x16xf32>
    %47 = tpu.matmul %5, %46, %cst {dimension_numbers = #tpu.dot_dimension_numbers<[1], [0], [0], [1], [0, 0, 1, 1], [], []>} : vector<8x8xbf16>, vector<8x16xbf16>, vector<8x16xf32> -> vector<8x16xf32>
    %48 = arith.addf %3, %47 : vector<8x16xf32>
    %49 = vector.extract_strided_slice %41 {offsets = [0, 1], sizes = [8, 16], strides = [1, 1]} : vector<8x18xbf16> to vector<8x16xbf16>
    %cst_42 = arith.constant dense<0.000000e+00> : vector<8x16xf32>
    %50 = tpu.matmul %7, %49, %cst_42 {dimension_numbers = #tpu.dot_dimension_numbers<[1], [0], [0], [1], [0, 0, 1, 1], [], []>} : vector<8x8xbf16>, vector<8x16xbf16>, vector<8x16xf32> -> vector<8x16xf32>
    %51 = arith.addf %48, %50 : vector<8x16xf32>
    %52 = vector.extract_strided_slice %45 {offsets = [0, 0], sizes = [8, 16], strides = [1, 1]} : vector<8x18xbf16> to vector<8x16xbf16>
    %cst_43 = arith.constant dense<0.000000e+00> : vector<8x16xf32>
    %53 = tpu.matmul %9, %52, %cst_43 {dimension_numbers = #tpu.dot_dimension_numbers<[1], [0], [0], [1], [0, 0, 1, 1], [], []>} : vector<8x8xbf16>, vector<8x16xbf16>, vector<8x16xf32> -> vector<8x16xf32>
    %54 = arith.addf %51, %53 : vector<8x16xf32>
    %55 = vector.extract_strided_slice %45 {offsets = [0, 1], sizes = [8, 16], strides = [1, 1]} : vector<8x18xbf16> to vector<8x16xbf16>
    %cst_44 = arith.constant dense<0.000000e+00> : vector<8x16xf32>
    %56 = tpu.matmul %11, %55, %cst_44 {dimension_numbers = #tpu.dot_dimension_numbers<[1], [0], [0], [1], [0, 0, 1, 1], [], []>} : vector<8x8xbf16>, vector<8x16xbf16>, vector<8x16xf32> -> vector<8x16xf32>
    %57 = arith.addf %54, %56 : vector<8x16xf32>
    %c0_45 = arith.constant 0 : index
    %c0_46 = arith.constant 0 : index
    %c0_47 = arith.constant 0 : index
    %c0_48 = arith.constant 0 : index
    %58 = vector.load %arg5[%c0_45, %c0_46, %c0_47, %c0_48] : memref<1x32x8x16xf32, #tpu.memory_space<vmem>>, vector<1x1x8x16xf32>
    %59 = vector.shape_cast %58 : vector<1x1x8x16xf32> to vector<8x16xf32>
    %60 = vector.shape_cast %57 : vector<8x16xf32> to vector<1x1x8x16xf32>
    tpu.vector_store %arg5[%c0_45, %c0_46, %c0_47, %c0_48], %60 {strides = array<i32>} : memref<1x32x8x16xf32, #tpu.memory_space<vmem>>, vector<1x1x8x16xf32>,
    %61 = vector.extract_strided_slice %41 {offsets = [0, 1], sizes = [8, 16], strides = [1, 1]} : vector<8x18xbf16> to vector<8x16xbf16>
    %cst_49 = arith.constant dense<0.000000e+00> : vector<8x16xf32>
    %62 = tpu.matmul %13, %61, %cst_49 {dimension_numbers = #tpu.dot_dimension_numbers<[1], [0], [0], [1], [0, 0, 1, 1], [], []>} : vector<8x8xbf16>, vector<8x16xbf16>, vector<8x16xf32> -> vector<8x16xf32>
    %63 = arith.addf %3, %62 : vector<8x16xf32>
    %64 = vector.extract_strided_slice %41 {offsets = [0, 2], sizes = [8, 16], strides = [1, 1]} : vector<8x18xbf16> to vector<8x16xbf16>
    %cst_50 = arith.constant dense<0.000000e+00> : vector<8x16xf32>
    %65 = tpu.matmul %15, %64, %cst_50 {dimension_numbers = #tpu.dot_dimension_numbers<[1], [0], [0], [1], [0, 0, 1, 1], [], []>} : vector<8x8xbf16>, vector<8x16xbf16>, vector<8x16xf32> -> vector<8x16xf32>
    %66 = arith.addf %63, %65 : vector<8x16xf32>
    %67 = vector.extract_strided_slice %45 {offsets = [0, 1], sizes = [8, 16], strides = [1, 1]} : vector<8x18xbf16> to vector<8x16xbf16>
    %cst_51 = arith.constant dense<0.000000e+00> : vector<8x16xf32>
    %68 = tpu.matmul %17, %67, %cst_51 {dimension_numbers = #tpu.dot_dimension_numbers<[1], [0], [0], [1], [0, 0, 1, 1], [], []>} : vector<8x8xbf16>, vector<8x16xbf16>, vector<8x16xf32> -> vector<8x16xf32>
    %69 = arith.addf %66, %68 : vector<8x16xf32>
    %70 = vector.extract_strided_slice %45 {offsets = [0, 2], sizes = [8, 16], strides = [1, 1]} : vector<8x18xbf16> to vector<8x16xbf16>
    %cst_52 = arith.constant dense<0.000000e+00> : vector<8x16xf32>
    %71 = tpu.matmul %19, %70, %cst_52 {dimension_numbers = #tpu.dot_dimension_numbers<[1], [0], [0], [1], [0, 0, 1, 1], [], []>} : vector<8x8xbf16>, vector<8x16xbf16>, vector<8x16xf32> -> vector<8x16xf32>
    %72 = arith.addf %69, %71 : vector<8x16xf32>
    %c0_53 = arith.constant 0 : index
    %c1_54 = arith.constant 1 : index
    %c0_55 = arith.constant 0 : index
    %c0_56 = arith.constant 0 : index
    %73 = vector.load %arg5[%c0_53, %c1_54, %c0_55, %c0_56] : memref<1x32x8x16xf32, #tpu.memory_space<vmem>>, vector<1x1x8x16xf32>
    %74 = vector.shape_cast %73 : vector<1x1x8x16xf32> to vector<8x16xf32>
    %75 = vector.shape_cast %72 : vector<8x16xf32> to vector<1x1x8x16xf32>
    tpu.vector_store %arg5[%c0_53, %c1_54, %c0_55, %c0_56], %75 {strides = array<i32>} : memref<1x32x8x16xf32, #tpu.memory_space<vmem>>, vector<1x1x8x16xf32>,
    %c0_i32_57 = arith.constant 0 : i32
    %76 = arith.addi %0, %c0_i32_57 : i32
    %c1_i32_58 = arith.constant 1 : i32
    %77 = arith.addi %76, %c1_i32_58 : i32
    %c0_i32_59 = arith.constant 0 : i32
    %78 = arith.addi %77, %c0_i32_59 : i32
    %c0_60 = arith.constant 0 : index
    %79 = arith.index_cast %78 : i32 to index
    %c0_61 = arith.constant 0 : index
    %c0_62 = arith.constant 0 : index
    %80 = vector.load %arg2[%c0_60, %79, %c0_61, %c0_62] : memref<1x18x8x18xbf16, #tpu.memory_space<vmem>>, vector<1x1x8x18xbf16>
    %81 = vector.shape_cast %80 : vector<1x1x8x18xbf16> to vector<8x18xbf16>
    %c1_i32_63 = arith.constant 1 : i32
    %82 = arith.addi %77, %c1_i32_63 : i32
    %c0_64 = arith.constant 0 : index
    %83 = arith.index_cast %82 : i32 to index
    %c0_65 = arith.constant 0 : index
    %c0_66 = arith.constant 0 : index
    %84 = vector.load %arg2[%c0_64, %83, %c0_65, %c0_66] : memref<1x18x8x18xbf16, #tpu.memory_space<vmem>>, vector<1x1x8x18xbf16>
    %85 = vector.shape_cast %84 : vector<1x1x8x18xbf16> to vector<8x18xbf16>
    %86 = vector.extract_strided_slice %81 {offsets = [0, 0], sizes = [8, 16], strides = [1, 1]} : vector<8x18xbf16> to vector<8x16xbf16>
    %cst_67 = arith.constant dense<0.000000e+00> : vector<8x16xf32>
    %87 = tpu.matmul %21, %86, %cst_67 {dimension_numbers = #tpu.dot_dimension_numbers<[1], [0], [0], [1], [0, 0, 1, 1], [], []>} : vector<8x8xbf16>, vector<8x16xbf16>, vector<8x16xf32> -> vector<8x16xf32>
    %88 = arith.addf %3, %87 : vector<8x16xf32>
    %89 = vector.extract_strided_slice %81 {offsets = [0, 1], sizes = [8, 16], strides = [1, 1]} : vector<8x18xbf16> to vector<8x16xbf16>
    %cst_68 = arith.constant dense<0.000000e+00> : vector<8x16xf32>
    %90 = tpu.matmul %23, %89, %cst_68 {dimension_numbers = #tpu.dot_dimension_numbers<[1], [0], [0], [1], [0, 0, 1, 1], [], []>} : vector<8x8xbf16>, vector<8x16xbf16>, vector<8x16xf32> -> vector<8x16xf32>
    %91 = arith.addf %88, %90 : vector<8x16xf32>
    %92 = vector.extract_strided_slice %85 {offsets = [0, 0], sizes = [8, 16], strides = [1, 1]} : vector<8x18xbf16> to vector<8x16xbf16>
    %cst_69 = arith.constant dense<0.000000e+00> : vector<8x16xf32>
    %93 = tpu.matmul %25, %92, %cst_69 {dimension_numbers = #tpu.dot_dimension_numbers<[1], [0], [0], [1], [0, 0, 1, 1], [], []>} : vector<8x8xbf16>, vector<8x16xbf16>, vector<8x16xf32> -> vector<8x16xf32>
    %94 = arith.addf %91, %93 : vector<8x16xf32>
    %95 = vector.extract_strided_slice %85 {offsets = [0, 1], sizes = [8, 16], strides = [1, 1]} : vector<8x18xbf16> to vector<8x16xbf16>
    %cst_70 = arith.constant dense<0.000000e+00> : vector<8x16xf32>
    %96 = tpu.matmul %27, %95, %cst_70 {dimension_numbers = #tpu.dot_dimension_numbers<[1], [0], [0], [1], [0, 0, 1, 1], [], []>} : vector<8x8xbf16>, vector<8x16xbf16>, vector<8x16xf32> -> vector<8x16xf32>
    %97 = arith.addf %94, %96 : vector<8x16xf32>
    %c0_71 = arith.constant 0 : index
    %c2_72 = arith.constant 2 : index
    %c0_73 = arith.constant 0 : index
    %c0_74 = arith.constant 0 : index
    %98 = vector.load %arg5[%c0_71, %c2_72, %c0_73, %c0_74] : memref<1x32x8x16xf32, #tpu.memory_space<vmem>>, vector<1x1x8x16xf32>
    %99 = vector.shape_cast %98 : vector<1x1x8x16xf32> to vector<8x16xf32>
    %100 = vector.shape_cast %97 : vector<8x16xf32> to vector<1x1x8x16xf32>
    tpu.vector_store %arg5[%c0_71, %c2_72, %c0_73, %c0_74], %100 {strides = array<i32>} : memref<1x32x8x16xf32, #tpu.memory_space<vmem>>, vector<1x1x8x16xf32>,
    %101 = vector.extract_strided_slice %81 {offsets = [0, 1], sizes = [8, 16], strides = [1, 1]} : vector<8x18xbf16> to vector<8x16xbf16>
    %cst_75 = arith.constant dense<0.000000e+00> : vector<8x16xf32>
    %102 = tpu.matmul %29, %101, %cst_75 {dimension_numbers = #tpu.dot_dimension_numbers<[1], [0], [0], [1], [0, 0, 1, 1], [], []>} : vector<8x8xbf16>, vector<8x16xbf16>, vector<8x16xf32> -> vector<8x16xf32>
    %103 = arith.addf %3, %102 : vector<8x16xf32>
    %104 = vector.extract_strided_slice %81 {offsets = [0, 2], sizes = [8, 16], strides = [1, 1]} : vector<8x18xbf16> to vector<8x16xbf16>
    %cst_76 = arith.constant dense<0.000000e+00> : vector<8x16xf32>
    %105 = tpu.matmul %31, %104, %cst_76 {dimension_numbers = #tpu.dot_dimension_numbers<[1], [0], [0], [1], [0, 0, 1, 1], [], []>} : vector<8x8xbf16>, vector<8x16xbf16>, vector<8x16xf32> -> vector<8x16xf32>
    %106 = arith.addf %103, %105 : vector<8x16xf32>
    %107 = vector.extract_strided_slice %85 {offsets = [0, 1], sizes = [8, 16], strides = [1, 1]} : vector<8x18xbf16> to vector<8x16xbf16>
    %cst_77 = arith.constant dense<0.000000e+00> : vector<8x16xf32>
    %108 = tpu.matmul %33, %107, %cst_77 {dimension_numbers = #tpu.dot_dimension_numbers<[1], [0], [0], [1], [0, 0, 1, 1], [], []>} : vector<8x8xbf16>, vector<8x16xbf16>, vector<8x16xf32> -> vector<8x16xf32>
    %109 = arith.addf %106, %108 : vector<8x16xf32>
    %110 = vector.extract_strided_slice %85 {offsets = [0, 2], sizes = [8, 16], strides = [1, 1]} : vector<8x18xbf16> to vector<8x16xbf16>
    %cst_78 = arith.constant dense<0.000000e+00> : vector<8x16xf32>
    %111 = tpu.matmul %35, %110, %cst_78 {dimension_numbers = #tpu.dot_dimension_numbers<[1], [0], [0], [1], [0, 0, 1, 1], [], []>} : vector<8x8xbf16>, vector<8x16xbf16>, vector<8x16xf32> -> vector<8x16xf32>
    %112 = arith.addf %109, %111 : vector<8x16xf32>
    %c0_79 = arith.constant 0 : index
    %c3_80 = arith.constant 3 : index
    %c0_81 = arith.constant 0 : index
    %c0_82 = arith.constant 0 : index
    %113 = vector.load %arg5[%c0_79, %c3_80, %c0_81, %c0_82] : memref<1x32x8x16xf32, #tpu.memory_space<vmem>>, vector<1x1x8x16xf32>
    %114 = vector.shape_cast %113 : vector<1x1x8x16xf32> to vector<8x16xf32>
    %115 = vector.shape_cast %112 : vector<8x16xf32> to vector<1x1x8x16xf32>
    tpu.vector_store %arg5[%c0_79, %c3_80, %c0_81, %c0_82], %115 {strides = array<i32>} : memref<1x32x8x16xf32, #tpu.memory_space<vmem>>, vector<1x1x8x16xf32>,
    %c1_i32_83 = arith.constant 1 : i32
    %116 = arith.addi %0, %c1_i32_83 : i32
    %c0_i32_84 = arith.constant 0 : i32
    %117 = arith.addi %116, %c0_i32_84 : i32
    %c0_i32_85 = arith.constant 0 : i32
    %118 = arith.addi %117, %c0_i32_85 : i32
    %c0_86 = arith.constant 0 : index
    %119 = arith.index_cast %118 : i32 to index
    %c0_87 = arith.constant 0 : index
    %c0_88 = arith.constant 0 : index
    %120 = vector.load %arg2[%c0_86, %119, %c0_87, %c0_88] : memref<1x18x8x18xbf16, #tpu.memory_space<vmem>>, vector<1x1x8x18xbf16>
    %121 = vector.shape_cast %120 : vector<1x1x8x18xbf16> to vector<8x18xbf16>
    %c1_i32_89 = arith.constant 1 : i32
    %122 = arith.addi %117, %c1_i32_89 : i32
    %c0_90 = arith.constant 0 : index
    %123 = arith.index_cast %122 : i32 to index
    %c0_91 = arith.constant 0 : index
    %c0_92 = arith.constant 0 : index
    %124 = vector.load %arg2[%c0_90, %123, %c0_91, %c0_92] : memref<1x18x8x18xbf16, #tpu.memory_space<vmem>>, vector<1x1x8x18xbf16>
    %125 = vector.shape_cast %124 : vector<1x1x8x18xbf16> to vector<8x18xbf16>
    %126 = vector.extract_strided_slice %121 {offsets = [0, 0], sizes = [8, 16], strides = [1, 1]} : vector<8x18xbf16> to vector<8x16xbf16>
    %cst_93 = arith.constant dense<0.000000e+00> : vector<8x16xf32>
    %127 = tpu.matmul %5, %126, %cst_93 {dimension_numbers = #tpu.dot_dimension_numbers<[1], [0], [0], [1], [0, 0, 1, 1], [], []>} : vector<8x8xbf16>, vector<8x16xbf16>, vector<8x16xf32> -> vector<8x16xf32>
    %128 = arith.addf %3, %127 : vector<8x16xf32>
    %129 = vector.extract_strided_slice %121 {offsets = [0, 1], sizes = [8, 16], strides = [1, 1]} : vector<8x18xbf16> to vector<8x16xbf16>
    %cst_94 = arith.constant dense<0.000000e+00> : vector<8x16xf32>
    %130 = tpu.matmul %7, %129, %cst_94 {dimension_numbers = #tpu.dot_dimension_numbers<[1], [0], [0], [1], [0, 0, 1, 1], [], []>} : vector<8x8xbf16>, vector<8x16xbf16>, vector<8x16xf32> -> vector<8x16xf32>
    %131 = arith.addf %128, %130 : vector<8x16xf32>
    %132 = vector.extract_strided_slice %125 {offsets = [0, 0], sizes = [8, 16], strides = [1, 1]} : vector<8x18xbf16> to vector<8x16xbf16>
    %cst_95 = arith.constant dense<0.000000e+00> : vector<8x16xf32>
    %133 = tpu.matmul %9, %132, %cst_95 {dimension_numbers = #tpu.dot_dimension_numbers<[1], [0], [0], [1], [0, 0, 1, 1], [], []>} : vector<8x8xbf16>, vector<8x16xbf16>, vector<8x16xf32> -> vector<8x16xf32>
    %134 = arith.addf %131, %133 : vector<8x16xf32>
    %135 = vector.extract_strided_slice %125 {offsets = [0, 1], sizes = [8, 16], strides = [1, 1]} : vector<8x18xbf16> to vector<8x16xbf16>
    %cst_96 = arith.constant dense<0.000000e+00> : vector<8x16xf32>
    %136 = tpu.matmul %11, %135, %cst_96 {dimension_numbers = #tpu.dot_dimension_numbers<[1], [0], [0], [1], [0, 0, 1, 1], [], []>} : vector<8x8xbf16>, vector<8x16xbf16>, vector<8x16xf32> -> vector<8x16xf32>
    %137 = arith.addf %134, %136 : vector<8x16xf32>
    %c0_97 = arith.constant 0 : index
    %c4_98 = arith.constant 4 : index
    %c0_99 = arith.constant 0 : index
    %c0_100 = arith.constant 0 : index
    %138 = vector.load %arg5[%c0_97, %c4_98, %c0_99, %c0_100] : memref<1x32x8x16xf32, #tpu.memory_space<vmem>>, vector<1x1x8x16xf32>
    %139 = vector.shape_cast %138 : vector<1x1x8x16xf32> to vector<8x16xf32>
    %140 = vector.shape_cast %137 : vector<8x16xf32> to vector<1x1x8x16xf32>
    tpu.vector_store %arg5[%c0_97, %c4_98, %c0_99, %c0_100], %140 {strides = array<i32>} : memref<1x32x8x16xf32, #tpu.memory_space<vmem>>, vector<1x1x8x16xf32>,
    %141 = vector.extract_strided_slice %121 {offsets = [0, 1], sizes = [8, 16], strides = [1, 1]} : vector<8x18xbf16> to vector<8x16xbf16>
    %cst_101 = arith.constant dense<0.000000e+00> : vector<8x16xf32>
    %142 = tpu.matmul %13, %141, %cst_101 {dimension_numbers = #tpu.dot_dimension_numbers<[1], [0], [0], [1], [0, 0, 1, 1], [], []>} : vector<8x8xbf16>, vector<8x16xbf16>, vector<8x16xf32> -> vector<8x16xf32>
    %143 = arith.addf %3, %142 : vector<8x16xf32>
    %144 = vector.extract_strided_slice %121 {offsets = [0, 2], sizes = [8, 16], strides = [1, 1]} : vector<8x18xbf16> to vector<8x16xbf16>
    %cst_102 = arith.constant dense<0.000000e+00> : vector<8x16xf32>
    %145 = tpu.matmul %15, %144, %cst_102 {dimension_numbers = #tpu.dot_dimension_numbers<[1], [0], [0], [1], [0, 0, 1, 1], [], []>} : vector<8x8xbf16>, vector<8x16xbf16>, vector<8x16xf32> -> vector<8x16xf32>
    %146 = arith.addf %143, %145 : vector<8x16xf32>
    %147 = vector.extract_strided_slice %125 {offsets = [0, 1], sizes = [8, 16], strides = [1, 1]} : vector<8x18xbf16> to vector<8x16xbf16>
    %cst_103 = arith.constant dense<0.000000e+00> : vector<8x16xf32>
    %148 = tpu.matmul %17, %147, %cst_103 {dimension_numbers = #tpu.dot_dimension_numbers<[1], [0], [0], [1], [0, 0, 1, 1], [], []>} : vector<8x8xbf16>, vector<8x16xbf16>, vector<8x16xf32> -> vector<8x16xf32>
    %149 = arith.addf %146, %148 : vector<8x16xf32>
    %150 = vector.extract_strided_slice %125 {offsets = [0, 2], sizes = [8, 16], strides = [1, 1]} : vector<8x18xbf16> to vector<8x16xbf16>
    %cst_104 = arith.constant dense<0.000000e+00> : vector<8x16xf32>
    %151 = tpu.matmul %19, %150, %cst_104 {dimension_numbers = #tpu.dot_dimension_numbers<[1], [0], [0], [1], [0, 0, 1, 1], [], []>} : vector<8x8xbf16>, vector<8x16xbf16>, vector<8x16xf32> -> vector<8x16xf32>
    %152 = arith.addf %149, %151 : vector<8x16xf32>
    %c0_105 = arith.constant 0 : index
    %c5_106 = arith.constant 5 : index
    %c0_107 = arith.constant 0 : index
    %c0_108 = arith.constant 0 : index
    %153 = vector.load %arg5[%c0_105, %c5_106, %c0_107, %c0_108] : memref<1x32x8x16xf32, #tpu.memory_space<vmem>>, vector<1x1x8x16xf32>
    %154 = vector.shape_cast %153 : vector<1x1x8x16xf32> to vector<8x16xf32>
    %155 = vector.shape_cast %152 : vector<8x16xf32> to vector<1x1x8x16xf32>
    tpu.vector_store %arg5[%c0_105, %c5_106, %c0_107, %c0_108], %155 {strides = array<i32>} : memref<1x32x8x16xf32, #tpu.memory_space<vmem>>, vector<1x1x8x16xf32>,
    %c1_i32_109 = arith.constant 1 : i32
    %156 = arith.addi %0, %c1_i32_109 : i32
    %c1_i32_110 = arith.constant 1 : i32
    %157 = arith.addi %156, %c1_i32_110 : i32
    %c0_i32_111 = arith.constant 0 : i32
    %158 = arith.addi %157, %c0_i32_111 : i32
    %c0_112 = arith.constant 0 : index
    %159 = arith.index_cast %158 : i32 to index
    %c0_113 = arith.constant 0 : index
    %c0_114 = arith.constant 0 : index
    %160 = vector.load %arg2[%c0_112, %159, %c0_113, %c0_114] : memref<1x18x8x18xbf16, #tpu.memory_space<vmem>>, vector<1x1x8x18xbf16>
    %161 = vector.shape_cast %160 : vector<1x1x8x18xbf16> to vector<8x18xbf16>
    %c1_i32_115 = arith.constant 1 : i32
    %162 = arith.addi %157, %c1_i32_115 : i32
    %c0_116 = arith.constant 0 : index
    %163 = arith.index_cast %162 : i32 to index
    %c0_117 = arith.constant 0 : index
    %c0_118 = arith.constant 0 : index
    %164 = vector.load %arg2[%c0_116, %163, %c0_117, %c0_118] : memref<1x18x8x18xbf16, #tpu.memory_space<vmem>>, vector<1x1x8x18xbf16>
    %165 = vector.shape_cast %164 : vector<1x1x8x18xbf16> to vector<8x18xbf16>
    %166 = vector.extract_strided_slice %161 {offsets = [0, 0], sizes = [8, 16], strides = [1, 1]} : vector<8x18xbf16> to vector<8x16xbf16>
    %cst_119 = arith.constant dense<0.000000e+00> : vector<8x16xf32>
    %167 = tpu.matmul %21, %166, %cst_119 {dimension_numbers = #tpu.dot_dimension_numbers<[1], [0], [0], [1], [0, 0, 1, 1], [], []>} : vector<8x8xbf16>, vector<8x16xbf16>, vector<8x16xf32> -> vector<8x16xf32>
    %168 = arith.addf %3, %167 : vector<8x16xf32>
    %169 = vector.extract_strided_slice %161 {offsets = [0, 1], sizes = [8, 16], strides = [1, 1]} : vector<8x18xbf16> to vector<8x16xbf16>
    %cst_120 = arith.constant dense<0.000000e+00> : vector<8x16xf32>
    %170 = tpu.matmul %23, %169, %cst_120 {dimension_numbers = #tpu.dot_dimension_numbers<[1], [0], [0], [1], [0, 0, 1, 1], [], []>} : vector<8x8xbf16>, vector<8x16xbf16>, vector<8x16xf32> -> vector<8x16xf32>
    %171 = arith.addf %168, %170 : vector<8x16xf32>
    %172 = vector.extract_strided_slice %165 {offsets = [0, 0], sizes = [8, 16], strides = [1, 1]} : vector<8x18xbf16> to vector<8x16xbf16>
    %cst_121 = arith.constant dense<0.000000e+00> : vector<8x16xf32>
    %173 = tpu.matmul %25, %172, %cst_121 {dimension_numbers = #tpu.dot_dimension_numbers<[1], [0], [0], [1], [0, 0, 1, 1], [], []>} : vector<8x8xbf16>, vector<8x16xbf16>, vector<8x16xf32> -> vector<8x16xf32>
    %174 = arith.addf %171, %173 : vector<8x16xf32>
    %175 = vector.extract_strided_slice %165 {offsets = [0, 1], sizes = [8, 16], strides = [1, 1]} : vector<8x18xbf16> to vector<8x16xbf16>
    %cst_122 = arith.constant dense<0.000000e+00> : vector<8x16xf32>
    %176 = tpu.matmul %27, %175, %cst_122 {dimension_numbers = #tpu.dot_dimension_numbers<[1], [0], [0], [1], [0, 0, 1, 1], [], []>} : vector<8x8xbf16>, vector<8x16xbf16>, vector<8x16xf32> -> vector<8x16xf32>
    %177 = arith.addf %174, %176 : vector<8x16xf32>
    %c0_123 = arith.constant 0 : index
    %c6_124 = arith.constant 6 : index
    %c0_125 = arith.constant 0 : index
    %c0_126 = arith.constant 0 : index
    %178 = vector.load %arg5[%c0_123, %c6_124, %c0_125, %c0_126] : memref<1x32x8x16xf32, #tpu.memory_space<vmem>>, vector<1x1x8x16xf32>
    %179 = vector.shape_cast %178 : vector<1x1x8x16xf32> to vector<8x16xf32>
    %180 = vector.shape_cast %177 : vector<8x16xf32> to vector<1x1x8x16xf32>
    tpu.vector_store %arg5[%c0_123, %c6_124, %c0_125, %c0_126], %180 {strides = array<i32>} : memref<1x32x8x16xf32, #tpu.memory_space<vmem>>, vector<1x1x8x16xf32>,
    %181 = vector.extract_strided_slice %161 {offsets = [0, 1], sizes = [8, 16], strides = [1, 1]} : vector<8x18xbf16> to vector<8x16xbf16>
    %cst_127 = arith.constant dense<0.000000e+00> : vector<8x16xf32>
    %182 = tpu.matmul %29, %181, %cst_127 {dimension_numbers = #tpu.dot_dimension_numbers<[1], [0], [0], [1], [0, 0, 1, 1], [], []>} : vector<8x8xbf16>, vector<8x16xbf16>, vector<8x16xf32> -> vector<8x16xf32>
    %183 = arith.addf %3, %182 : vector<8x16xf32>
    %184 = vector.extract_strided_slice %161 {offsets = [0, 2], sizes = [8, 16], strides = [1, 1]} : vector<8x18xbf16> to vector<8x16xbf16>
    %cst_128 = arith.constant dense<0.000000e+00> : vector<8x16xf32>
    %185 = tpu.matmul %31, %184, %cst_128 {dimension_numbers = #tpu.dot_dimension_numbers<[1], [0], [0], [1], [0, 0, 1, 1], [], []>} : vector<8x8xbf16>, vector<8x16xbf16>, vector<8x16xf32> -> vector<8x16xf32>
    %186 = arith.addf %183, %185 : vector<8x16xf32>
    %187 = vector.extract_strided_slice %165 {offsets = [0, 1], sizes = [8, 16], strides = [1, 1]} : vector<8x18xbf16> to vector<8x16xbf16>
    %cst_129 = arith.constant dense<0.000000e+00> : vector<8x16xf32>
    %188 = tpu.matmul %33, %187, %cst_129 {dimension_numbers = #tpu.dot_dimension_numbers<[1], [0], [0], [1], [0, 0, 1, 1], [], []>} : vector<8x8xbf16>, vector<8x16xbf16>, vector<8x16xf32> -> vector<8x16xf32>
    %189 = arith.addf %186, %188 : vector<8x16xf32>
    %190 = vector.extract_strided_slice %165 {offsets = [0, 2], sizes = [8, 16], strides = [1, 1]} : vector<8x18xbf16> to vector<8x16xbf16>
    %cst_130 = arith.constant dense<0.000000e+00> : vector<8x16xf32>
    %191 = tpu.matmul %35, %190, %cst_130 {dimension_numbers = #tpu.dot_dimension_numbers<[1], [0], [0], [1], [0, 0, 1, 1], [], []>} : vector<8x8xbf16>, vector<8x16xbf16>, vector<8x16xf32> -> vector<8x16xf32>
    %192 = arith.addf %189, %191 : vector<8x16xf32>
    %c0_131 = arith.constant 0 : index
    %c7_132 = arith.constant 7 : index
    %c0_133 = arith.constant 0 : index
    %c0_134 = arith.constant 0 : index
    %193 = vector.load %arg5[%c0_131, %c7_132, %c0_133, %c0_134] : memref<1x32x8x16xf32, #tpu.memory_space<vmem>>, vector<1x1x8x16xf32>
    %194 = vector.shape_cast %193 : vector<1x1x8x16xf32> to vector<8x16xf32>
    %195 = vector.shape_cast %192 : vector<8x16xf32> to vector<1x1x8x16xf32>
    tpu.vector_store %arg5[%c0_131, %c7_132, %c0_133, %c0_134], %195 {strides = array<i32>} : memref<1x32x8x16xf32, #tpu.memory_space<vmem>>, vector<1x1x8x16xf32>,
    %c2_i32 = arith.constant 2 : i32
    %196 = arith.addi %0, %c2_i32 : i32
    %c0_i32_135 = arith.constant 0 : i32
    %197 = arith.addi %196, %c0_i32_135 : i32
    %c0_i32_136 = arith.constant 0 : i32
    %198 = arith.addi %197, %c0_i32_136 : i32
    %c0_137 = arith.constant 0 : index
    %199 = arith.index_cast %198 : i32 to index
    %c0_138 = arith.constant 0 : index
    %c0_139 = arith.constant 0 : index
    %200 = vector.load %arg2[%c0_137, %199, %c0_138, %c0_139] : memref<1x18x8x18xbf16, #tpu.memory_space<vmem>>, vector<1x1x8x18xbf16>
    %201 = vector.shape_cast %200 : vector<1x1x8x18xbf16> to vector<8x18xbf16>
    %c1_i32_140 = arith.constant 1 : i32
    %202 = arith.addi %197, %c1_i32_140 : i32
    %c0_141 = arith.constant 0 : index
    %203 = arith.index_cast %202 : i32 to index
    %c0_142 = arith.constant 0 : index
    %c0_143 = arith.constant 0 : index
    %204 = vector.load %arg2[%c0_141, %203, %c0_142, %c0_143] : memref<1x18x8x18xbf16, #tpu.memory_space<vmem>>, vector<1x1x8x18xbf16>
    %205 = vector.shape_cast %204 : vector<1x1x8x18xbf16> to vector<8x18xbf16>
    %206 = vector.extract_strided_slice %201 {offsets = [0, 0], sizes = [8, 16], strides = [1, 1]} : vector<8x18xbf16> to vector<8x16xbf16>
    %cst_144 = arith.constant dense<0.000000e+00> : vector<8x16xf32>
    %207 = tpu.matmul %5, %206, %cst_144 {dimension_numbers = #tpu.dot_dimension_numbers<[1], [0], [0], [1], [0, 0, 1, 1], [], []>} : vector<8x8xbf16>, vector<8x16xbf16>, vector<8x16xf32> -> vector<8x16xf32>
    %208 = arith.addf %3, %207 : vector<8x16xf32>
    %209 = vector.extract_strided_slice %201 {offsets = [0, 1], sizes = [8, 16], strides = [1, 1]} : vector<8x18xbf16> to vector<8x16xbf16>
    %cst_145 = arith.constant dense<0.000000e+00> : vector<8x16xf32>
    %210 = tpu.matmul %7, %209, %cst_145 {dimension_numbers = #tpu.dot_dimension_numbers<[1], [0], [0], [1], [0, 0, 1, 1], [], []>} : vector<8x8xbf16>, vector<8x16xbf16>, vector<8x16xf32> -> vector<8x16xf32>
    %211 = arith.addf %208, %210 : vector<8x16xf32>
    %212 = vector.extract_strided_slice %205 {offsets = [0, 0], sizes = [8, 16], strides = [1, 1]} : vector<8x18xbf16> to vector<8x16xbf16>
    %cst_146 = arith.constant dense<0.000000e+00> : vector<8x16xf32>
    %213 = tpu.matmul %9, %212, %cst_146 {dimension_numbers = #tpu.dot_dimension_numbers<[1], [0], [0], [1], [0, 0, 1, 1], [], []>} : vector<8x8xbf16>, vector<8x16xbf16>, vector<8x16xf32> -> vector<8x16xf32>
    %214 = arith.addf %211, %213 : vector<8x16xf32>
    %215 = vector.extract_strided_slice %205 {offsets = [0, 1], sizes = [8, 16], strides = [1, 1]} : vector<8x18xbf16> to vector<8x16xbf16>
    %cst_147 = arith.constant dense<0.000000e+00> : vector<8x16xf32>
    %216 = tpu.matmul %11, %215, %cst_147 {dimension_numbers = #tpu.dot_dimension_numbers<[1], [0], [0], [1], [0, 0, 1, 1], [], []>} : vector<8x8xbf16>, vector<8x16xbf16>, vector<8x16xf32> -> vector<8x16xf32>
    %217 = arith.addf %214, %216 : vector<8x16xf32>
    %c0_148 = arith.constant 0 : index
    %c8_149 = arith.constant 8 : index
    %c0_150 = arith.constant 0 : index
    %c0_151 = arith.constant 0 : index
    %218 = vector.load %arg5[%c0_148, %c8_149, %c0_150, %c0_151] : memref<1x32x8x16xf32, #tpu.memory_space<vmem>>, vector<1x1x8x16xf32>
    %219 = vector.shape_cast %218 : vector<1x1x8x16xf32> to vector<8x16xf32>
    %220 = vector.shape_cast %217 : vector<8x16xf32> to vector<1x1x8x16xf32>
    tpu.vector_store %arg5[%c0_148, %c8_149, %c0_150, %c0_151], %220 {strides = array<i32>} : memref<1x32x8x16xf32, #tpu.memory_space<vmem>>, vector<1x1x8x16xf32>,
    %221 = vector.extract_strided_slice %201 {offsets = [0, 1], sizes = [8, 16], strides = [1, 1]} : vector<8x18xbf16> to vector<8x16xbf16>
    %cst_152 = arith.constant dense<0.000000e+00> : vector<8x16xf32>
    %222 = tpu.matmul %13, %221, %cst_152 {dimension_numbers = #tpu.dot_dimension_numbers<[1], [0], [0], [1], [0, 0, 1, 1], [], []>} : vector<8x8xbf16>, vector<8x16xbf16>, vector<8x16xf32> -> vector<8x16xf32>
    %223 = arith.addf %3, %222 : vector<8x16xf32>
    %224 = vector.extract_strided_slice %201 {offsets = [0, 2], sizes = [8, 16], strides = [1, 1]} : vector<8x18xbf16> to vector<8x16xbf16>
    %cst_153 = arith.constant dense<0.000000e+00> : vector<8x16xf32>
    %225 = tpu.matmul %15, %224, %cst_153 {dimension_numbers = #tpu.dot_dimension_numbers<[1], [0], [0], [1], [0, 0, 1, 1], [], []>} : vector<8x8xbf16>, vector<8x16xbf16>, vector<8x16xf32> -> vector<8x16xf32>
    %226 = arith.addf %223, %225 : vector<8x16xf32>
    %227 = vector.extract_strided_slice %205 {offsets = [0, 1], sizes = [8, 16], strides = [1, 1]} : vector<8x18xbf16> to vector<8x16xbf16>
    %cst_154 = arith.constant dense<0.000000e+00> : vector<8x16xf32>
    %228 = tpu.matmul %17, %227, %cst_154 {dimension_numbers = #tpu.dot_dimension_numbers<[1], [0], [0], [1], [0, 0, 1, 1], [], []>} : vector<8x8xbf16>, vector<8x16xbf16>, vector<8x16xf32> -> vector<8x16xf32>
    %229 = arith.addf %226, %228 : vector<8x16xf32>
    %230 = vector.extract_strided_slice %205 {offsets = [0, 2], sizes = [8, 16], strides = [1, 1]} : vector<8x18xbf16> to vector<8x16xbf16>
    %cst_155 = arith.constant dense<0.000000e+00> : vector<8x16xf32>
    %231 = tpu.matmul %19, %230, %cst_155 {dimension_numbers = #tpu.dot_dimension_numbers<[1], [0], [0], [1], [0, 0, 1, 1], [], []>} : vector<8x8xbf16>, vector<8x16xbf16>, vector<8x16xf32> -> vector<8x16xf32>
    %232 = arith.addf %229, %231 : vector<8x16xf32>
    %c0_156 = arith.constant 0 : index
    %c9_157 = arith.constant 9 : index
    %c0_158 = arith.constant 0 : index
    %c0_159 = arith.constant 0 : index
    %233 = vector.load %arg5[%c0_156, %c9_157, %c0_158, %c0_159] : memref<1x32x8x16xf32, #tpu.memory_space<vmem>>, vector<1x1x8x16xf32>
    %234 = vector.shape_cast %233 : vector<1x1x8x16xf32> to vector<8x16xf32>
    %235 = vector.shape_cast %232 : vector<8x16xf32> to vector<1x1x8x16xf32>
    tpu.vector_store %arg5[%c0_156, %c9_157, %c0_158, %c0_159], %235 {strides = array<i32>} : memref<1x32x8x16xf32, #tpu.memory_space<vmem>>, vector<1x1x8x16xf32>,
    %c2_i32_160 = arith.constant 2 : i32
    %236 = arith.addi %0, %c2_i32_160 : i32
    %c1_i32_161 = arith.constant 1 : i32
    %237 = arith.addi %236, %c1_i32_161 : i32
    %c0_i32_162 = arith.constant 0 : i32
    %238 = arith.addi %237, %c0_i32_162 : i32
    %c0_163 = arith.constant 0 : index
    %239 = arith.index_cast %238 : i32 to index
    %c0_164 = arith.constant 0 : index
    %c0_165 = arith.constant 0 : index
    %240 = vector.load %arg2[%c0_163, %239, %c0_164, %c0_165] : memref<1x18x8x18xbf16, #tpu.memory_space<vmem>>, vector<1x1x8x18xbf16>
    %241 = vector.shape_cast %240 : vector<1x1x8x18xbf16> to vector<8x18xbf16>
    %c1_i32_166 = arith.constant 1 : i32
    %242 = arith.addi %237, %c1_i32_166 : i32
    %c0_167 = arith.constant 0 : index
    %243 = arith.index_cast %242 : i32 to index
    %c0_168 = arith.constant 0 : index
    %c0_169 = arith.constant 0 : index
    %244 = vector.load %arg2[%c0_167, %243, %c0_168, %c0_169] : memref<1x18x8x18xbf16, #tpu.memory_space<vmem>>, vector<1x1x8x18xbf16>
    %245 = vector.shape_cast %244 : vector<1x1x8x18xbf16> to vector<8x18xbf16>
    %246 = vector.extract_strided_slice %241 {offsets = [0, 0], sizes = [8, 16], strides = [1, 1]} : vector<8x18xbf16> to vector<8x16xbf16>
    %cst_170 = arith.constant dense<0.000000e+00> : vector<8x16xf32>
    %247 = tpu.matmul %21, %246, %cst_170 {dimension_numbers = #tpu.dot_dimension_numbers<[1], [0], [0], [1], [0, 0, 1, 1], [], []>} : vector<8x8xbf16>, vector<8x16xbf16>, vector<8x16xf32> -> vector<8x16xf32>
    %248 = arith.addf %3, %247 : vector<8x16xf32>
    %249 = vector.extract_strided_slice %241 {offsets = [0, 1], sizes = [8, 16], strides = [1, 1]} : vector<8x18xbf16> to vector<8x16xbf16>
    %cst_171 = arith.constant dense<0.000000e+00> : vector<8x16xf32>
    %250 = tpu.matmul %23, %249, %cst_171 {dimension_numbers = #tpu.dot_dimension_numbers<[1], [0], [0], [1], [0, 0, 1, 1], [], []>} : vector<8x8xbf16>, vector<8x16xbf16>, vector<8x16xf32> -> vector<8x16xf32>
    %251 = arith.addf %248, %250 : vector<8x16xf32>
    %252 = vector.extract_strided_slice %245 {offsets = [0, 0], sizes = [8, 16], strides = [1, 1]} : vector<8x18xbf16> to vector<8x16xbf16>
    %cst_172 = arith.constant dense<0.000000e+00> : vector<8x16xf32>
    %253 = tpu.matmul %25, %252, %cst_172 {dimension_numbers = #tpu.dot_dimension_numbers<[1], [0], [0], [1], [0, 0, 1, 1], [], []>} : vector<8x8xbf16>, vector<8x16xbf16>, vector<8x16xf32> -> vector<8x16xf32>
    %254 = arith.addf %251, %253 : vector<8x16xf32>
    %255 = vector.extract_strided_slice %245 {offsets = [0, 1], sizes = [8, 16], strides = [1, 1]} : vector<8x18xbf16> to vector<8x16xbf16>
    %cst_173 = arith.constant dense<0.000000e+00> : vector<8x16xf32>
    %256 = tpu.matmul %27, %255, %cst_173 {dimension_numbers = #tpu.dot_dimension_numbers<[1], [0], [0], [1], [0, 0, 1, 1], [], []>} : vector<8x8xbf16>, vector<8x16xbf16>, vector<8x16xf32> -> vector<8x16xf32>
    %257 = arith.addf %254, %256 : vector<8x16xf32>
    %c0_174 = arith.constant 0 : index
    %c10_175 = arith.constant 10 : index
    %c0_176 = arith.constant 0 : index
    %c0_177 = arith.constant 0 : index
    %258 = vector.load %arg5[%c0_174, %c10_175, %c0_176, %c0_177] : memref<1x32x8x16xf32, #tpu.memory_space<vmem>>, vector<1x1x8x16xf32>
    %259 = vector.shape_cast %258 : vector<1x1x8x16xf32> to vector<8x16xf32>
    %260 = vector.shape_cast %257 : vector<8x16xf32> to vector<1x1x8x16xf32>
    tpu.vector_store %arg5[%c0_174, %c10_175, %c0_176, %c0_177], %260 {strides = array<i32>} : memref<1x32x8x16xf32, #tpu.memory_space<vmem>>, vector<1x1x8x16xf32>,
    %261 = vector.extract_strided_slice %241 {offsets = [0, 1], sizes = [8, 16], strides = [1, 1]} : vector<8x18xbf16> to vector<8x16xbf16>
    %cst_178 = arith.constant dense<0.000000e+00> : vector<8x16xf32>
    %262 = tpu.matmul %29, %261, %cst_178 {dimension_numbers = #tpu.dot_dimension_numbers<[1], [0], [0], [1], [0, 0, 1, 1], [], []>} : vector<8x8xbf16>, vector<8x16xbf16>, vector<8x16xf32> -> vector<8x16xf32>
    %263 = arith.addf %3, %262 : vector<8x16xf32>
    %264 = vector.extract_strided_slice %241 {offsets = [0, 2], sizes = [8, 16], strides = [1, 1]} : vector<8x18xbf16> to vector<8x16xbf16>
    %cst_179 = arith.constant dense<0.000000e+00> : vector<8x16xf32>
    %265 = tpu.matmul %31, %264, %cst_179 {dimension_numbers = #tpu.dot_dimension_numbers<[1], [0], [0], [1], [0, 0, 1, 1], [], []>} : vector<8x8xbf16>, vector<8x16xbf16>, vector<8x16xf32> -> vector<8x16xf32>
    %266 = arith.addf %263, %265 : vector<8x16xf32>
    %267 = vector.extract_strided_slice %245 {offsets = [0, 1], sizes = [8, 16], strides = [1, 1]} : vector<8x18xbf16> to vector<8x16xbf16>
    %cst_180 = arith.constant dense<0.000000e+00> : vector<8x16xf32>
    %268 = tpu.matmul %33, %267, %cst_180 {dimension_numbers = #tpu.dot_dimension_numbers<[1], [0], [0], [1], [0, 0, 1, 1], [], []>} : vector<8x8xbf16>, vector<8x16xbf16>, vector<8x16xf32> -> vector<8x16xf32>
    %269 = arith.addf %266, %268 : vector<8x16xf32>
    %270 = vector.extract_strided_slice %245 {offsets = [0, 2], sizes = [8, 16], strides = [1, 1]} : vector<8x18xbf16> to vector<8x16xbf16>
    %cst_181 = arith.constant dense<0.000000e+00> : vector<8x16xf32>
    %271 = tpu.matmul %35, %270, %cst_181 {dimension_numbers = #tpu.dot_dimension_numbers<[1], [0], [0], [1], [0, 0, 1, 1], [], []>} : vector<8x8xbf16>, vector<8x16xbf16>, vector<8x16xf32> -> vector<8x16xf32>
    %272 = arith.addf %269, %271 : vector<8x16xf32>
    %c0_182 = arith.constant 0 : index
    %c11_183 = arith.constant 11 : index
    %c0_184 = arith.constant 0 : index
    %c0_185 = arith.constant 0 : index
    %273 = vector.load %arg5[%c0_182, %c11_183, %c0_184, %c0_185] : memref<1x32x8x16xf32, #tpu.memory_space<vmem>>, vector<1x1x8x16xf32>
    %274 = vector.shape_cast %273 : vector<1x1x8x16xf32> to vector<8x16xf32>
    %275 = vector.shape_cast %272 : vector<8x16xf32> to vector<1x1x8x16xf32>
    tpu.vector_store %arg5[%c0_182, %c11_183, %c0_184, %c0_185], %275 {strides = array<i32>} : memref<1x32x8x16xf32, #tpu.memory_space<vmem>>, vector<1x1x8x16xf32>,
    %c3_i32 = arith.constant 3 : i32
    %276 = arith.addi %0, %c3_i32 : i32
    %c0_i32_186 = arith.constant 0 : i32
    %277 = arith.addi %276, %c0_i32_186 : i32
    %c0_i32_187 = arith.constant 0 : i32
    %278 = arith.addi %277, %c0_i32_187 : i32
    %c0_188 = arith.constant 0 : index
    %279 = arith.index_cast %278 : i32 to index
    %c0_189 = arith.constant 0 : index
    %c0_190 = arith.constant 0 : index
    %280 = vector.load %arg2[%c0_188, %279, %c0_189, %c0_190] : memref<1x18x8x18xbf16, #tpu.memory_space<vmem>>, vector<1x1x8x18xbf16>
    %281 = vector.shape_cast %280 : vector<1x1x8x18xbf16> to vector<8x18xbf16>
    %c1_i32_191 = arith.constant 1 : i32
    %282 = arith.addi %277, %c1_i32_191 : i32
    %c0_192 = arith.constant 0 : index
    %283 = arith.index_cast %282 : i32 to index
    %c0_193 = arith.constant 0 : index
    %c0_194 = arith.constant 0 : index
    %284 = vector.load %arg2[%c0_192, %283, %c0_193, %c0_194] : memref<1x18x8x18xbf16, #tpu.memory_space<vmem>>, vector<1x1x8x18xbf16>
    %285 = vector.shape_cast %284 : vector<1x1x8x18xbf16> to vector<8x18xbf16>
    %286 = vector.extract_strided_slice %281 {offsets = [0, 0], sizes = [8, 16], strides = [1, 1]} : vector<8x18xbf16> to vector<8x16xbf16>
    %cst_195 = arith.constant dense<0.000000e+00> : vector<8x16xf32>
    %287 = tpu.matmul %5, %286, %cst_195 {dimension_numbers = #tpu.dot_dimension_numbers<[1], [0], [0], [1], [0, 0, 1, 1], [], []>} : vector<8x8xbf16>, vector<8x16xbf16>, vector<8x16xf32> -> vector<8x16xf32>
    %288 = arith.addf %3, %287 : vector<8x16xf32>
    %289 = vector.extract_strided_slice %281 {offsets = [0, 1], sizes = [8, 16], strides = [1, 1]} : vector<8x18xbf16> to vector<8x16xbf16>
    %cst_196 = arith.constant dense<0.000000e+00> : vector<8x16xf32>
    %290 = tpu.matmul %7, %289, %cst_196 {dimension_numbers = #tpu.dot_dimension_numbers<[1], [0], [0], [1], [0, 0, 1, 1], [], []>} : vector<8x8xbf16>, vector<8x16xbf16>, vector<8x16xf32> -> vector<8x16xf32>
    %291 = arith.addf %288, %290 : vector<8x16xf32>
    %292 = vector.extract_strided_slice %285 {offsets = [0, 0], sizes = [8, 16], strides = [1, 1]} : vector<8x18xbf16> to vector<8x16xbf16>
    %cst_197 = arith.constant dense<0.000000e+00> : vector<8x16xf32>
    %293 = tpu.matmul %9, %292, %cst_197 {dimension_numbers = #tpu.dot_dimension_numbers<[1], [0], [0], [1], [0, 0, 1, 1], [], []>} : vector<8x8xbf16>, vector<8x16xbf16>, vector<8x16xf32> -> vector<8x16xf32>
    %294 = arith.addf %291, %293 : vector<8x16xf32>
    %295 = vector.extract_strided_slice %285 {offsets = [0, 1], sizes = [8, 16], strides = [1, 1]} : vector<8x18xbf16> to vector<8x16xbf16>
    %cst_198 = arith.constant dense<0.000000e+00> : vector<8x16xf32>
    %296 = tpu.matmul %11, %295, %cst_198 {dimension_numbers = #tpu.dot_dimension_numbers<[1], [0], [0], [1], [0, 0, 1, 1], [], []>} : vector<8x8xbf16>, vector<8x16xbf16>, vector<8x16xf32> -> vector<8x16xf32>
    %297 = arith.addf %294, %296 : vector<8x16xf32>
    %c0_199 = arith.constant 0 : index
    %c12_200 = arith.constant 12 : index
    %c0_201 = arith.constant 0 : index
    %c0_202 = arith.constant 0 : index
    %298 = vector.load %arg5[%c0_199, %c12_200, %c0_201, %c0_202] : memref<1x32x8x16xf32, #tpu.memory_space<vmem>>, vector<1x1x8x16xf32>
    %299 = vector.shape_cast %298 : vector<1x1x8x16xf32> to vector<8x16xf32>
    %300 = vector.shape_cast %297 : vector<8x16xf32> to vector<1x1x8x16xf32>
    tpu.vector_store %arg5[%c0_199, %c12_200, %c0_201, %c0_202], %300 {strides = array<i32>} : memref<1x32x8x16xf32, #tpu.memory_space<vmem>>, vector<1x1x8x16xf32>,
    %301 = vector.extract_strided_slice %281 {offsets = [0, 1], sizes = [8, 16], strides = [1, 1]} : vector<8x18xbf16> to vector<8x16xbf16>
    %cst_203 = arith.constant dense<0.000000e+00> : vector<8x16xf32>
    %302 = tpu.matmul %13, %301, %cst_203 {dimension_numbers = #tpu.dot_dimension_numbers<[1], [0], [0], [1], [0, 0, 1, 1], [], []>} : vector<8x8xbf16>, vector<8x16xbf16>, vector<8x16xf32> -> vector<8x16xf32>
    %303 = arith.addf %3, %302 : vector<8x16xf32>
    %304 = vector.extract_strided_slice %281 {offsets = [0, 2], sizes = [8, 16], strides = [1, 1]} : vector<8x18xbf16> to vector<8x16xbf16>
    %cst_204 = arith.constant dense<0.000000e+00> : vector<8x16xf32>
    %305 = tpu.matmul %15, %304, %cst_204 {dimension_numbers = #tpu.dot_dimension_numbers<[1], [0], [0], [1], [0, 0, 1, 1], [], []>} : vector<8x8xbf16>, vector<8x16xbf16>, vector<8x16xf32> -> vector<8x16xf32>
    %306 = arith.addf %303, %305 : vector<8x16xf32>
    %307 = vector.extract_strided_slice %285 {offsets = [0, 1], sizes = [8, 16], strides = [1, 1]} : vector<8x18xbf16> to vector<8x16xbf16>
    %cst_205 = arith.constant dense<0.000000e+00> : vector<8x16xf32>
    %308 = tpu.matmul %17, %307, %cst_205 {dimension_numbers = #tpu.dot_dimension_numbers<[1], [0], [0], [1], [0, 0, 1, 1], [], []>} : vector<8x8xbf16>, vector<8x16xbf16>, vector<8x16xf32> -> vector<8x16xf32>
    %309 = arith.addf %306, %308 : vector<8x16xf32>
    %310 = vector.extract_strided_slice %285 {offsets = [0, 2], sizes = [8, 16], strides = [1, 1]} : vector<8x18xbf16> to vector<8x16xbf16>
    %cst_206 = arith.constant dense<0.000000e+00> : vector<8x16xf32>
    %311 = tpu.matmul %19, %310, %cst_206 {dimension_numbers = #tpu.dot_dimension_numbers<[1], [0], [0], [1], [0, 0, 1, 1], [], []>} : vector<8x8xbf16>, vector<8x16xbf16>, vector<8x16xf32> -> vector<8x16xf32>
    %312 = arith.addf %309, %311 : vector<8x16xf32>
    %c0_207 = arith.constant 0 : index
    %c13_208 = arith.constant 13 : index
    %c0_209 = arith.constant 0 : index
    %c0_210 = arith.constant 0 : index
    %313 = vector.load %arg5[%c0_207, %c13_208, %c0_209, %c0_210] : memref<1x32x8x16xf32, #tpu.memory_space<vmem>>, vector<1x1x8x16xf32>
    %314 = vector.shape_cast %313 : vector<1x1x8x16xf32> to vector<8x16xf32>
    %315 = vector.shape_cast %312 : vector<8x16xf32> to vector<1x1x8x16xf32>
    tpu.vector_store %arg5[%c0_207, %c13_208, %c0_209, %c0_210], %315 {strides = array<i32>} : memref<1x32x8x16xf32, #tpu.memory_space<vmem>>, vector<1x1x8x16xf32>,
    %c3_i32_211 = arith.constant 3 : i32
    %316 = arith.addi %0, %c3_i32_211 : i32
    %c1_i32_212 = arith.constant 1 : i32
    %317 = arith.addi %316, %c1_i32_212 : i32
    %c0_i32_213 = arith.constant 0 : i32
    %318 = arith.addi %317, %c0_i32_213 : i32
    %c0_214 = arith.constant 0 : index
    %319 = arith.index_cast %318 : i32 to index
    %c0_215 = arith.constant 0 : index
    %c0_216 = arith.constant 0 : index
    %320 = vector.load %arg2[%c0_214, %319, %c0_215, %c0_216] : memref<1x18x8x18xbf16, #tpu.memory_space<vmem>>, vector<1x1x8x18xbf16>
    %321 = vector.shape_cast %320 : vector<1x1x8x18xbf16> to vector<8x18xbf16>
    %c1_i32_217 = arith.constant 1 : i32
    %322 = arith.addi %317, %c1_i32_217 : i32
    %c0_218 = arith.constant 0 : index
    %323 = arith.index_cast %322 : i32 to index
    %c0_219 = arith.constant 0 : index
    %c0_220 = arith.constant 0 : index
    %324 = vector.load %arg2[%c0_218, %323, %c0_219, %c0_220] : memref<1x18x8x18xbf16, #tpu.memory_space<vmem>>, vector<1x1x8x18xbf16>
    %325 = vector.shape_cast %324 : vector<1x1x8x18xbf16> to vector<8x18xbf16>
    %326 = vector.extract_strided_slice %321 {offsets = [0, 0], sizes = [8, 16], strides = [1, 1]} : vector<8x18xbf16> to vector<8x16xbf16>
    %cst_221 = arith.constant dense<0.000000e+00> : vector<8x16xf32>
    %327 = tpu.matmul %21, %326, %cst_221 {dimension_numbers = #tpu.dot_dimension_numbers<[1], [0], [0], [1], [0, 0, 1, 1], [], []>} : vector<8x8xbf16>, vector<8x16xbf16>, vector<8x16xf32> -> vector<8x16xf32>
    %328 = arith.addf %3, %327 : vector<8x16xf32>
    %329 = vector.extract_strided_slice %321 {offsets = [0, 1], sizes = [8, 16], strides = [1, 1]} : vector<8x18xbf16> to vector<8x16xbf16>
    %cst_222 = arith.constant dense<0.000000e+00> : vector<8x16xf32>
    %330 = tpu.matmul %23, %329, %cst_222 {dimension_numbers = #tpu.dot_dimension_numbers<[1], [0], [0], [1], [0, 0, 1, 1], [], []>} : vector<8x8xbf16>, vector<8x16xbf16>, vector<8x16xf32> -> vector<8x16xf32>
    %331 = arith.addf %328, %330 : vector<8x16xf32>
    %332 = vector.extract_strided_slice %325 {offsets = [0, 0], sizes = [8, 16], strides = [1, 1]} : vector<8x18xbf16> to vector<8x16xbf16>
    %cst_223 = arith.constant dense<0.000000e+00> : vector<8x16xf32>
    %333 = tpu.matmul %25, %332, %cst_223 {dimension_numbers = #tpu.dot_dimension_numbers<[1], [0], [0], [1], [0, 0, 1, 1], [], []>} : vector<8x8xbf16>, vector<8x16xbf16>, vector<8x16xf32> -> vector<8x16xf32>
    %334 = arith.addf %331, %333 : vector<8x16xf32>
    %335 = vector.extract_strided_slice %325 {offsets = [0, 1], sizes = [8, 16], strides = [1, 1]} : vector<8x18xbf16> to vector<8x16xbf16>
    %cst_224 = arith.constant dense<0.000000e+00> : vector<8x16xf32>
    %336 = tpu.matmul %27, %335, %cst_224 {dimension_numbers = #tpu.dot_dimension_numbers<[1], [0], [0], [1], [0, 0, 1, 1], [], []>} : vector<8x8xbf16>, vector<8x16xbf16>, vector<8x16xf32> -> vector<8x16xf32>
    %337 = arith.addf %334, %336 : vector<8x16xf32>
    %c0_225 = arith.constant 0 : index
    %c14_226 = arith.constant 14 : index
    %c0_227 = arith.constant 0 : index
    %c0_228 = arith.constant 0 : index
    %338 = vector.load %arg5[%c0_225, %c14_226, %c0_227, %c0_228] : memref<1x32x8x16xf32, #tpu.memory_space<vmem>>, vector<1x1x8x16xf32>
    %339 = vector.shape_cast %338 : vector<1x1x8x16xf32> to vector<8x16xf32>
    %340 = vector.shape_cast %337 : vector<8x16xf32> to vector<1x1x8x16xf32>
    tpu.vector_store %arg5[%c0_225, %c14_226, %c0_227, %c0_228], %340 {strides = array<i32>} : memref<1x32x8x16xf32, #tpu.memory_space<vmem>>, vector<1x1x8x16xf32>,
    %341 = vector.extract_strided_slice %321 {offsets = [0, 1], sizes = [8, 16], strides = [1, 1]} : vector<8x18xbf16> to vector<8x16xbf16>
    %cst_229 = arith.constant dense<0.000000e+00> : vector<8x16xf32>
    %342 = tpu.matmul %29, %341, %cst_229 {dimension_numbers = #tpu.dot_dimension_numbers<[1], [0], [0], [1], [0, 0, 1, 1], [], []>} : vector<8x8xbf16>, vector<8x16xbf16>, vector<8x16xf32> -> vector<8x16xf32>
    %343 = arith.addf %3, %342 : vector<8x16xf32>
    %344 = vector.extract_strided_slice %321 {offsets = [0, 2], sizes = [8, 16], strides = [1, 1]} : vector<8x18xbf16> to vector<8x16xbf16>
    %cst_230 = arith.constant dense<0.000000e+00> : vector<8x16xf32>
    %345 = tpu.matmul %31, %344, %cst_230 {dimension_numbers = #tpu.dot_dimension_numbers<[1], [0], [0], [1], [0, 0, 1, 1], [], []>} : vector<8x8xbf16>, vector<8x16xbf16>, vector<8x16xf32> -> vector<8x16xf32>
    %346 = arith.addf %343, %345 : vector<8x16xf32>
    %347 = vector.extract_strided_slice %325 {offsets = [0, 1], sizes = [8, 16], strides = [1, 1]} : vector<8x18xbf16> to vector<8x16xbf16>
    %cst_231 = arith.constant dense<0.000000e+00> : vector<8x16xf32>
    %348 = tpu.matmul %33, %347, %cst_231 {dimension_numbers = #tpu.dot_dimension_numbers<[1], [0], [0], [1], [0, 0, 1, 1], [], []>} : vector<8x8xbf16>, vector<8x16xbf16>, vector<8x16xf32> -> vector<8x16xf32>
    %349 = arith.addf %346, %348 : vector<8x16xf32>
    %350 = vector.extract_strided_slice %325 {offsets = [0, 2], sizes = [8, 16], strides = [1, 1]} : vector<8x18xbf16> to vector<8x16xbf16>
    %cst_232 = arith.constant dense<0.000000e+00> : vector<8x16xf32>
    %351 = tpu.matmul %35, %350, %cst_232 {dimension_numbers = #tpu.dot_dimension_numbers<[1], [0], [0], [1], [0, 0, 1, 1], [], []>} : vector<8x8xbf16>, vector<8x16xbf16>, vector<8x16xf32> -> vector<8x16xf32>
    %352 = arith.addf %349, %351 : vector<8x16xf32>
    %c0_233 = arith.constant 0 : index
    %c15_234 = arith.constant 15 : index
    %c0_235 = arith.constant 0 : index
    %c0_236 = arith.constant 0 : index
    %353 = vector.load %arg5[%c0_233, %c15_234, %c0_235, %c0_236] : memref<1x32x8x16xf32, #tpu.memory_space<vmem>>, vector<1x1x8x16xf32>
    %354 = vector.shape_cast %353 : vector<1x1x8x16xf32> to vector<8x16xf32>
    %355 = vector.shape_cast %352 : vector<8x16xf32> to vector<1x1x8x16xf32>
    tpu.vector_store %arg5[%c0_233, %c15_234, %c0_235, %c0_236], %355 {strides = array<i32>} : memref<1x32x8x16xf32, #tpu.memory_space<vmem>>, vector<1x1x8x16xf32>,
    %c4_i32 = arith.constant 4 : i32
    %356 = arith.addi %0, %c4_i32 : i32
    %c0_i32_237 = arith.constant 0 : i32
    %357 = arith.addi %356, %c0_i32_237 : i32
    %c0_i32_238 = arith.constant 0 : i32
    %358 = arith.addi %357, %c0_i32_238 : i32
    %c0_239 = arith.constant 0 : index
    %359 = arith.index_cast %358 : i32 to index
    %c0_240 = arith.constant 0 : index
    %c0_241 = arith.constant 0 : index
    %360 = vector.load %arg2[%c0_239, %359, %c0_240, %c0_241] : memref<1x18x8x18xbf16, #tpu.memory_space<vmem>>, vector<1x1x8x18xbf16>
    %361 = vector.shape_cast %360 : vector<1x1x8x18xbf16> to vector<8x18xbf16>
    %c1_i32_242 = arith.constant 1 : i32
    %362 = arith.addi %357, %c1_i32_242 : i32
    %c0_243 = arith.constant 0 : index
    %363 = arith.index_cast %362 : i32 to index
    %c0_244 = arith.constant 0 : index
    %c0_245 = arith.constant 0 : index
    %364 = vector.load %arg2[%c0_243, %363, %c0_244, %c0_245] : memref<1x18x8x18xbf16, #tpu.memory_space<vmem>>, vector<1x1x8x18xbf16>
    %365 = vector.shape_cast %364 : vector<1x1x8x18xbf16> to vector<8x18xbf16>
    %366 = vector.extract_strided_slice %361 {offsets = [0, 0], sizes = [8, 16], strides = [1, 1]} : vector<8x18xbf16> to vector<8x16xbf16>
    %cst_246 = arith.constant dense<0.000000e+00> : vector<8x16xf32>
    %367 = tpu.matmul %5, %366, %cst_246 {dimension_numbers = #tpu.dot_dimension_numbers<[1], [0], [0], [1], [0, 0, 1, 1], [], []>} : vector<8x8xbf16>, vector<8x16xbf16>, vector<8x16xf32> -> vector<8x16xf32>
    %368 = arith.addf %3, %367 : vector<8x16xf32>
    %369 = vector.extract_strided_slice %361 {offsets = [0, 1], sizes = [8, 16], strides = [1, 1]} : vector<8x18xbf16> to vector<8x16xbf16>
    %cst_247 = arith.constant dense<0.000000e+00> : vector<8x16xf32>
    %370 = tpu.matmul %7, %369, %cst_247 {dimension_numbers = #tpu.dot_dimension_numbers<[1], [0], [0], [1], [0, 0, 1, 1], [], []>} : vector<8x8xbf16>, vector<8x16xbf16>, vector<8x16xf32> -> vector<8x16xf32>
    %371 = arith.addf %368, %370 : vector<8x16xf32>
    %372 = vector.extract_strided_slice %365 {offsets = [0, 0], sizes = [8, 16], strides = [1, 1]} : vector<8x18xbf16> to vector<8x16xbf16>
    %cst_248 = arith.constant dense<0.000000e+00> : vector<8x16xf32>
    %373 = tpu.matmul %9, %372, %cst_248 {dimension_numbers = #tpu.dot_dimension_numbers<[1], [0], [0], [1], [0, 0, 1, 1], [], []>} : vector<8x8xbf16>, vector<8x16xbf16>, vector<8x16xf32> -> vector<8x16xf32>
    %374 = arith.addf %371, %373 : vector<8x16xf32>
    %375 = vector.extract_strided_slice %365 {offsets = [0, 1], sizes = [8, 16], strides = [1, 1]} : vector<8x18xbf16> to vector<8x16xbf16>
    %cst_249 = arith.constant dense<0.000000e+00> : vector<8x16xf32>
    %376 = tpu.matmul %11, %375, %cst_249 {dimension_numbers = #tpu.dot_dimension_numbers<[1], [0], [0], [1], [0, 0, 1, 1], [], []>} : vector<8x8xbf16>, vector<8x16xbf16>, vector<8x16xf32> -> vector<8x16xf32>
    %377 = arith.addf %374, %376 : vector<8x16xf32>
    %c0_250 = arith.constant 0 : index
    %c16 = arith.constant 16 : index
    %c0_251 = arith.constant 0 : index
    %c0_252 = arith.constant 0 : index
    %378 = vector.load %arg5[%c0_250, %c16, %c0_251, %c0_252] : memref<1x32x8x16xf32, #tpu.memory_space<vmem>>, vector<1x1x8x16xf32>
    %379 = vector.shape_cast %378 : vector<1x1x8x16xf32> to vector<8x16xf32>
    %380 = vector.shape_cast %377 : vector<8x16xf32> to vector<1x1x8x16xf32>
    tpu.vector_store %arg5[%c0_250, %c16, %c0_251, %c0_252], %380 {strides = array<i32>} : memref<1x32x8x16xf32, #tpu.memory_space<vmem>>, vector<1x1x8x16xf32>,
    %381 = vector.extract_strided_slice %361 {offsets = [0, 1], sizes = [8, 16], strides = [1, 1]} : vector<8x18xbf16> to vector<8x16xbf16>
    %cst_253 = arith.constant dense<0.000000e+00> : vector<8x16xf32>
    %382 = tpu.matmul %13, %381, %cst_253 {dimension_numbers = #tpu.dot_dimension_numbers<[1], [0], [0], [1], [0, 0, 1, 1], [], []>} : vector<8x8xbf16>, vector<8x16xbf16>, vector<8x16xf32> -> vector<8x16xf32>
    %383 = arith.addf %3, %382 : vector<8x16xf32>
    %384 = vector.extract_strided_slice %361 {offsets = [0, 2], sizes = [8, 16], strides = [1, 1]} : vector<8x18xbf16> to vector<8x16xbf16>
    %cst_254 = arith.constant dense<0.000000e+00> : vector<8x16xf32>
    %385 = tpu.matmul %15, %384, %cst_254 {dimension_numbers = #tpu.dot_dimension_numbers<[1], [0], [0], [1], [0, 0, 1, 1], [], []>} : vector<8x8xbf16>, vector<8x16xbf16>, vector<8x16xf32> -> vector<8x16xf32>
    %386 = arith.addf %383, %385 : vector<8x16xf32>
    %387 = vector.extract_strided_slice %365 {offsets = [0, 1], sizes = [8, 16], strides = [1, 1]} : vector<8x18xbf16> to vector<8x16xbf16>
    %cst_255 = arith.constant dense<0.000000e+00> : vector<8x16xf32>
    %388 = tpu.matmul %17, %387, %cst_255 {dimension_numbers = #tpu.dot_dimension_numbers<[1], [0], [0], [1], [0, 0, 1, 1], [], []>} : vector<8x8xbf16>, vector<8x16xbf16>, vector<8x16xf32> -> vector<8x16xf32>
    %389 = arith.addf %386, %388 : vector<8x16xf32>
    %390 = vector.extract_strided_slice %365 {offsets = [0, 2], sizes = [8, 16], strides = [1, 1]} : vector<8x18xbf16> to vector<8x16xbf16>
    %cst_256 = arith.constant dense<0.000000e+00> : vector<8x16xf32>
    %391 = tpu.matmul %19, %390, %cst_256 {dimension_numbers = #tpu.dot_dimension_numbers<[1], [0], [0], [1], [0, 0, 1, 1], [], []>} : vector<8x8xbf16>, vector<8x16xbf16>, vector<8x16xf32> -> vector<8x16xf32>
    %392 = arith.addf %389, %391 : vector<8x16xf32>
    %c0_257 = arith.constant 0 : index
    %c17 = arith.constant 17 : index
    %c0_258 = arith.constant 0 : index
    %c0_259 = arith.constant 0 : index
    %393 = vector.load %arg5[%c0_257, %c17, %c0_258, %c0_259] : memref<1x32x8x16xf32, #tpu.memory_space<vmem>>, vector<1x1x8x16xf32>
    %394 = vector.shape_cast %393 : vector<1x1x8x16xf32> to vector<8x16xf32>
    %395 = vector.shape_cast %392 : vector<8x16xf32> to vector<1x1x8x16xf32>
    tpu.vector_store %arg5[%c0_257, %c17, %c0_258, %c0_259], %395 {strides = array<i32>} : memref<1x32x8x16xf32, #tpu.memory_space<vmem>>, vector<1x1x8x16xf32>,
    %c4_i32_260 = arith.constant 4 : i32
    %396 = arith.addi %0, %c4_i32_260 : i32
    %c1_i32_261 = arith.constant 1 : i32
    %397 = arith.addi %396, %c1_i32_261 : i32
    %c0_i32_262 = arith.constant 0 : i32
    %398 = arith.addi %397, %c0_i32_262 : i32
    %c0_263 = arith.constant 0 : index
    %399 = arith.index_cast %398 : i32 to index
    %c0_264 = arith.constant 0 : index
    %c0_265 = arith.constant 0 : index
    %400 = vector.load %arg2[%c0_263, %399, %c0_264, %c0_265] : memref<1x18x8x18xbf16, #tpu.memory_space<vmem>>, vector<1x1x8x18xbf16>
    %401 = vector.shape_cast %400 : vector<1x1x8x18xbf16> to vector<8x18xbf16>
    %c1_i32_266 = arith.constant 1 : i32
    %402 = arith.addi %397, %c1_i32_266 : i32
    %c0_267 = arith.constant 0 : index
    %403 = arith.index_cast %402 : i32 to index
    %c0_268 = arith.constant 0 : index
    %c0_269 = arith.constant 0 : index
    %404 = vector.load %arg2[%c0_267, %403, %c0_268, %c0_269] : memref<1x18x8x18xbf16, #tpu.memory_space<vmem>>, vector<1x1x8x18xbf16>
    %405 = vector.shape_cast %404 : vector<1x1x8x18xbf16> to vector<8x18xbf16>
    %406 = vector.extract_strided_slice %401 {offsets = [0, 0], sizes = [8, 16], strides = [1, 1]} : vector<8x18xbf16> to vector<8x16xbf16>
    %cst_270 = arith.constant dense<0.000000e+00> : vector<8x16xf32>
    %407 = tpu.matmul %21, %406, %cst_270 {dimension_numbers = #tpu.dot_dimension_numbers<[1], [0], [0], [1], [0, 0, 1, 1], [], []>} : vector<8x8xbf16>, vector<8x16xbf16>, vector<8x16xf32> -> vector<8x16xf32>
    %408 = arith.addf %3, %407 : vector<8x16xf32>
    %409 = vector.extract_strided_slice %401 {offsets = [0, 1], sizes = [8, 16], strides = [1, 1]} : vector<8x18xbf16> to vector<8x16xbf16>
    %cst_271 = arith.constant dense<0.000000e+00> : vector<8x16xf32>
    %410 = tpu.matmul %23, %409, %cst_271 {dimension_numbers = #tpu.dot_dimension_numbers<[1], [0], [0], [1], [0, 0, 1, 1], [], []>} : vector<8x8xbf16>, vector<8x16xbf16>, vector<8x16xf32> -> vector<8x16xf32>
    %411 = arith.addf %408, %410 : vector<8x16xf32>
    %412 = vector.extract_strided_slice %405 {offsets = [0, 0], sizes = [8, 16], strides = [1, 1]} : vector<8x18xbf16> to vector<8x16xbf16>
    %cst_272 = arith.constant dense<0.000000e+00> : vector<8x16xf32>
    %413 = tpu.matmul %25, %412, %cst_272 {dimension_numbers = #tpu.dot_dimension_numbers<[1], [0], [0], [1], [0, 0, 1, 1], [], []>} : vector<8x8xbf16>, vector<8x16xbf16>, vector<8x16xf32> -> vector<8x16xf32>
    %414 = arith.addf %411, %413 : vector<8x16xf32>
    %415 = vector.extract_strided_slice %405 {offsets = [0, 1], sizes = [8, 16], strides = [1, 1]} : vector<8x18xbf16> to vector<8x16xbf16>
    %cst_273 = arith.constant dense<0.000000e+00> : vector<8x16xf32>
    %416 = tpu.matmul %27, %415, %cst_273 {dimension_numbers = #tpu.dot_dimension_numbers<[1], [0], [0], [1], [0, 0, 1, 1], [], []>} : vector<8x8xbf16>, vector<8x16xbf16>, vector<8x16xf32> -> vector<8x16xf32>
    %417 = arith.addf %414, %416 : vector<8x16xf32>
    %c0_274 = arith.constant 0 : index
    %c18 = arith.constant 18 : index
    %c0_275 = arith.constant 0 : index
    %c0_276 = arith.constant 0 : index
    %418 = vector.load %arg5[%c0_274, %c18, %c0_275, %c0_276] : memref<1x32x8x16xf32, #tpu.memory_space<vmem>>, vector<1x1x8x16xf32>
    %419 = vector.shape_cast %418 : vector<1x1x8x16xf32> to vector<8x16xf32>
    %420 = vector.shape_cast %417 : vector<8x16xf32> to vector<1x1x8x16xf32>
    tpu.vector_store %arg5[%c0_274, %c18, %c0_275, %c0_276], %420 {strides = array<i32>} : memref<1x32x8x16xf32, #tpu.memory_space<vmem>>, vector<1x1x8x16xf32>,
    %421 = vector.extract_strided_slice %401 {offsets = [0, 1], sizes = [8, 16], strides = [1, 1]} : vector<8x18xbf16> to vector<8x16xbf16>
    %cst_277 = arith.constant dense<0.000000e+00> : vector<8x16xf32>
    %422 = tpu.matmul %29, %421, %cst_277 {dimension_numbers = #tpu.dot_dimension_numbers<[1], [0], [0], [1], [0, 0, 1, 1], [], []>} : vector<8x8xbf16>, vector<8x16xbf16>, vector<8x16xf32> -> vector<8x16xf32>
    %423 = arith.addf %3, %422 : vector<8x16xf32>
    %424 = vector.extract_strided_slice %401 {offsets = [0, 2], sizes = [8, 16], strides = [1, 1]} : vector<8x18xbf16> to vector<8x16xbf16>
    %cst_278 = arith.constant dense<0.000000e+00> : vector<8x16xf32>
    %425 = tpu.matmul %31, %424, %cst_278 {dimension_numbers = #tpu.dot_dimension_numbers<[1], [0], [0], [1], [0, 0, 1, 1], [], []>} : vector<8x8xbf16>, vector<8x16xbf16>, vector<8x16xf32> -> vector<8x16xf32>
    %426 = arith.addf %423, %425 : vector<8x16xf32>
    %427 = vector.extract_strided_slice %405 {offsets = [0, 1], sizes = [8, 16], strides = [1, 1]} : vector<8x18xbf16> to vector<8x16xbf16>
    %cst_279 = arith.constant dense<0.000000e+00> : vector<8x16xf32>
    %428 = tpu.matmul %33, %427, %cst_279 {dimension_numbers = #tpu.dot_dimension_numbers<[1], [0], [0], [1], [0, 0, 1, 1], [], []>} : vector<8x8xbf16>, vector<8x16xbf16>, vector<8x16xf32> -> vector<8x16xf32>
    %429 = arith.addf %426, %428 : vector<8x16xf32>
    %430 = vector.extract_strided_slice %405 {offsets = [0, 2], sizes = [8, 16], strides = [1, 1]} : vector<8x18xbf16> to vector<8x16xbf16>
    %cst_280 = arith.constant dense<0.000000e+00> : vector<8x16xf32>
    %431 = tpu.matmul %35, %430, %cst_280 {dimension_numbers = #tpu.dot_dimension_numbers<[1], [0], [0], [1], [0, 0, 1, 1], [], []>} : vector<8x8xbf16>, vector<8x16xbf16>, vector<8x16xf32> -> vector<8x16xf32>
    %432 = arith.addf %429, %431 : vector<8x16xf32>
    %c0_281 = arith.constant 0 : index
    %c19 = arith.constant 19 : index
    %c0_282 = arith.constant 0 : index
    %c0_283 = arith.constant 0 : index
    %433 = vector.load %arg5[%c0_281, %c19, %c0_282, %c0_283] : memref<1x32x8x16xf32, #tpu.memory_space<vmem>>, vector<1x1x8x16xf32>
    %434 = vector.shape_cast %433 : vector<1x1x8x16xf32> to vector<8x16xf32>
    %435 = vector.shape_cast %432 : vector<8x16xf32> to vector<1x1x8x16xf32>
    tpu.vector_store %arg5[%c0_281, %c19, %c0_282, %c0_283], %435 {strides = array<i32>} : memref<1x32x8x16xf32, #tpu.memory_space<vmem>>, vector<1x1x8x16xf32>,
    %c5_i32 = arith.constant 5 : i32
    %436 = arith.addi %0, %c5_i32 : i32
    %c0_i32_284 = arith.constant 0 : i32
    %437 = arith.addi %436, %c0_i32_284 : i32
    %c0_i32_285 = arith.constant 0 : i32
    %438 = arith.addi %437, %c0_i32_285 : i32
    %c0_286 = arith.constant 0 : index
    %439 = arith.index_cast %438 : i32 to index
    %c0_287 = arith.constant 0 : index
    %c0_288 = arith.constant 0 : index
    %440 = vector.load %arg2[%c0_286, %439, %c0_287, %c0_288] : memref<1x18x8x18xbf16, #tpu.memory_space<vmem>>, vector<1x1x8x18xbf16>
    %441 = vector.shape_cast %440 : vector<1x1x8x18xbf16> to vector<8x18xbf16>
    %c1_i32_289 = arith.constant 1 : i32
    %442 = arith.addi %437, %c1_i32_289 : i32
    %c0_290 = arith.constant 0 : index
    %443 = arith.index_cast %442 : i32 to index
    %c0_291 = arith.constant 0 : index
    %c0_292 = arith.constant 0 : index
    %444 = vector.load %arg2[%c0_290, %443, %c0_291, %c0_292] : memref<1x18x8x18xbf16, #tpu.memory_space<vmem>>, vector<1x1x8x18xbf16>
    %445 = vector.shape_cast %444 : vector<1x1x8x18xbf16> to vector<8x18xbf16>
    %446 = vector.extract_strided_slice %441 {offsets = [0, 0], sizes = [8, 16], strides = [1, 1]} : vector<8x18xbf16> to vector<8x16xbf16>
    %cst_293 = arith.constant dense<0.000000e+00> : vector<8x16xf32>
    %447 = tpu.matmul %5, %446, %cst_293 {dimension_numbers = #tpu.dot_dimension_numbers<[1], [0], [0], [1], [0, 0, 1, 1], [], []>} : vector<8x8xbf16>, vector<8x16xbf16>, vector<8x16xf32> -> vector<8x16xf32>
    %448 = arith.addf %3, %447 : vector<8x16xf32>
    %449 = vector.extract_strided_slice %441 {offsets = [0, 1], sizes = [8, 16], strides = [1, 1]} : vector<8x18xbf16> to vector<8x16xbf16>
    %cst_294 = arith.constant dense<0.000000e+00> : vector<8x16xf32>
    %450 = tpu.matmul %7, %449, %cst_294 {dimension_numbers = #tpu.dot_dimension_numbers<[1], [0], [0], [1], [0, 0, 1, 1], [], []>} : vector<8x8xbf16>, vector<8x16xbf16>, vector<8x16xf32> -> vector<8x16xf32>
    %451 = arith.addf %448, %450 : vector<8x16xf32>
    %452 = vector.extract_strided_slice %445 {offsets = [0, 0], sizes = [8, 16], strides = [1, 1]} : vector<8x18xbf16> to vector<8x16xbf16>
    %cst_295 = arith.constant dense<0.000000e+00> : vector<8x16xf32>
    %453 = tpu.matmul %9, %452, %cst_295 {dimension_numbers = #tpu.dot_dimension_numbers<[1], [0], [0], [1], [0, 0, 1, 1], [], []>} : vector<8x8xbf16>, vector<8x16xbf16>, vector<8x16xf32> -> vector<8x16xf32>
    %454 = arith.addf %451, %453 : vector<8x16xf32>
    %455 = vector.extract_strided_slice %445 {offsets = [0, 1], sizes = [8, 16], strides = [1, 1]} : vector<8x18xbf16> to vector<8x16xbf16>
    %cst_296 = arith.constant dense<0.000000e+00> : vector<8x16xf32>
    %456 = tpu.matmul %11, %455, %cst_296 {dimension_numbers = #tpu.dot_dimension_numbers<[1], [0], [0], [1], [0, 0, 1, 1], [], []>} : vector<8x8xbf16>, vector<8x16xbf16>, vector<8x16xf32> -> vector<8x16xf32>
    %457 = arith.addf %454, %456 : vector<8x16xf32>
    %c0_297 = arith.constant 0 : index
    %c20 = arith.constant 20 : index
    %c0_298 = arith.constant 0 : index
    %c0_299 = arith.constant 0 : index
    %458 = vector.load %arg5[%c0_297, %c20, %c0_298, %c0_299] : memref<1x32x8x16xf32, #tpu.memory_space<vmem>>, vector<1x1x8x16xf32>
    %459 = vector.shape_cast %458 : vector<1x1x8x16xf32> to vector<8x16xf32>
    %460 = vector.shape_cast %457 : vector<8x16xf32> to vector<1x1x8x16xf32>
    tpu.vector_store %arg5[%c0_297, %c20, %c0_298, %c0_299], %460 {strides = array<i32>} : memref<1x32x8x16xf32, #tpu.memory_space<vmem>>, vector<1x1x8x16xf32>,
    %461 = vector.extract_strided_slice %441 {offsets = [0, 1], sizes = [8, 16], strides = [1, 1]} : vector<8x18xbf16> to vector<8x16xbf16>
    %cst_300 = arith.constant dense<0.000000e+00> : vector<8x16xf32>
    %462 = tpu.matmul %13, %461, %cst_300 {dimension_numbers = #tpu.dot_dimension_numbers<[1], [0], [0], [1], [0, 0, 1, 1], [], []>} : vector<8x8xbf16>, vector<8x16xbf16>, vector<8x16xf32> -> vector<8x16xf32>
    %463 = arith.addf %3, %462 : vector<8x16xf32>
    %464 = vector.extract_strided_slice %441 {offsets = [0, 2], sizes = [8, 16], strides = [1, 1]} : vector<8x18xbf16> to vector<8x16xbf16>
    %cst_301 = arith.constant dense<0.000000e+00> : vector<8x16xf32>
    %465 = tpu.matmul %15, %464, %cst_301 {dimension_numbers = #tpu.dot_dimension_numbers<[1], [0], [0], [1], [0, 0, 1, 1], [], []>} : vector<8x8xbf16>, vector<8x16xbf16>, vector<8x16xf32> -> vector<8x16xf32>
    %466 = arith.addf %463, %465 : vector<8x16xf32>
    %467 = vector.extract_strided_slice %445 {offsets = [0, 1], sizes = [8, 16], strides = [1, 1]} : vector<8x18xbf16> to vector<8x16xbf16>
    %cst_302 = arith.constant dense<0.000000e+00> : vector<8x16xf32>
    %468 = tpu.matmul %17, %467, %cst_302 {dimension_numbers = #tpu.dot_dimension_numbers<[1], [0], [0], [1], [0, 0, 1, 1], [], []>} : vector<8x8xbf16>, vector<8x16xbf16>, vector<8x16xf32> -> vector<8x16xf32>
    %469 = arith.addf %466, %468 : vector<8x16xf32>
    %470 = vector.extract_strided_slice %445 {offsets = [0, 2], sizes = [8, 16], strides = [1, 1]} : vector<8x18xbf16> to vector<8x16xbf16>
    %cst_303 = arith.constant dense<0.000000e+00> : vector<8x16xf32>
    %471 = tpu.matmul %19, %470, %cst_303 {dimension_numbers = #tpu.dot_dimension_numbers<[1], [0], [0], [1], [0, 0, 1, 1], [], []>} : vector<8x8xbf16>, vector<8x16xbf16>, vector<8x16xf32> -> vector<8x16xf32>
    %472 = arith.addf %469, %471 : vector<8x16xf32>
    %c0_304 = arith.constant 0 : index
    %c21 = arith.constant 21 : index
    %c0_305 = arith.constant 0 : index
    %c0_306 = arith.constant 0 : index
    %473 = vector.load %arg5[%c0_304, %c21, %c0_305, %c0_306] : memref<1x32x8x16xf32, #tpu.memory_space<vmem>>, vector<1x1x8x16xf32>
    %474 = vector.shape_cast %473 : vector<1x1x8x16xf32> to vector<8x16xf32>
    %475 = vector.shape_cast %472 : vector<8x16xf32> to vector<1x1x8x16xf32>
    tpu.vector_store %arg5[%c0_304, %c21, %c0_305, %c0_306], %475 {strides = array<i32>} : memref<1x32x8x16xf32, #tpu.memory_space<vmem>>, vector<1x1x8x16xf32>,
    %c5_i32_307 = arith.constant 5 : i32
    %476 = arith.addi %0, %c5_i32_307 : i32
    %c1_i32_308 = arith.constant 1 : i32
    %477 = arith.addi %476, %c1_i32_308 : i32
    %c0_i32_309 = arith.constant 0 : i32
    %478 = arith.addi %477, %c0_i32_309 : i32
    %c0_310 = arith.constant 0 : index
    %479 = arith.index_cast %478 : i32 to index
    %c0_311 = arith.constant 0 : index
    %c0_312 = arith.constant 0 : index
    %480 = vector.load %arg2[%c0_310, %479, %c0_311, %c0_312] : memref<1x18x8x18xbf16, #tpu.memory_space<vmem>>, vector<1x1x8x18xbf16>
    %481 = vector.shape_cast %480 : vector<1x1x8x18xbf16> to vector<8x18xbf16>
    %c1_i32_313 = arith.constant 1 : i32
    %482 = arith.addi %477, %c1_i32_313 : i32
    %c0_314 = arith.constant 0 : index
    %483 = arith.index_cast %482 : i32 to index
    %c0_315 = arith.constant 0 : index
    %c0_316 = arith.constant 0 : index
    %484 = vector.load %arg2[%c0_314, %483, %c0_315, %c0_316] : memref<1x18x8x18xbf16, #tpu.memory_space<vmem>>, vector<1x1x8x18xbf16>
    %485 = vector.shape_cast %484 : vector<1x1x8x18xbf16> to vector<8x18xbf16>
    %486 = vector.extract_strided_slice %481 {offsets = [0, 0], sizes = [8, 16], strides = [1, 1]} : vector<8x18xbf16> to vector<8x16xbf16>
    %cst_317 = arith.constant dense<0.000000e+00> : vector<8x16xf32>
    %487 = tpu.matmul %21, %486, %cst_317 {dimension_numbers = #tpu.dot_dimension_numbers<[1], [0], [0], [1], [0, 0, 1, 1], [], []>} : vector<8x8xbf16>, vector<8x16xbf16>, vector<8x16xf32> -> vector<8x16xf32>
    %488 = arith.addf %3, %487 : vector<8x16xf32>
    %489 = vector.extract_strided_slice %481 {offsets = [0, 1], sizes = [8, 16], strides = [1, 1]} : vector<8x18xbf16> to vector<8x16xbf16>
    %cst_318 = arith.constant dense<0.000000e+00> : vector<8x16xf32>
    %490 = tpu.matmul %23, %489, %cst_318 {dimension_numbers = #tpu.dot_dimension_numbers<[1], [0], [0], [1], [0, 0, 1, 1], [], []>} : vector<8x8xbf16>, vector<8x16xbf16>, vector<8x16xf32> -> vector<8x16xf32>
    %491 = arith.addf %488, %490 : vector<8x16xf32>
    %492 = vector.extract_strided_slice %485 {offsets = [0, 0], sizes = [8, 16], strides = [1, 1]} : vector<8x18xbf16> to vector<8x16xbf16>
    %cst_319 = arith.constant dense<0.000000e+00> : vector<8x16xf32>
    %493 = tpu.matmul %25, %492, %cst_319 {dimension_numbers = #tpu.dot_dimension_numbers<[1], [0], [0], [1], [0, 0, 1, 1], [], []>} : vector<8x8xbf16>, vector<8x16xbf16>, vector<8x16xf32> -> vector<8x16xf32>
    %494 = arith.addf %491, %493 : vector<8x16xf32>
    %495 = vector.extract_strided_slice %485 {offsets = [0, 1], sizes = [8, 16], strides = [1, 1]} : vector<8x18xbf16> to vector<8x16xbf16>
    %cst_320 = arith.constant dense<0.000000e+00> : vector<8x16xf32>
    %496 = tpu.matmul %27, %495, %cst_320 {dimension_numbers = #tpu.dot_dimension_numbers<[1], [0], [0], [1], [0, 0, 1, 1], [], []>} : vector<8x8xbf16>, vector<8x16xbf16>, vector<8x16xf32> -> vector<8x16xf32>
    %497 = arith.addf %494, %496 : vector<8x16xf32>
    %c0_321 = arith.constant 0 : index
    %c22 = arith.constant 22 : index
    %c0_322 = arith.constant 0 : index
    %c0_323 = arith.constant 0 : index
    %498 = vector.load %arg5[%c0_321, %c22, %c0_322, %c0_323] : memref<1x32x8x16xf32, #tpu.memory_space<vmem>>, vector<1x1x8x16xf32>
    %499 = vector.shape_cast %498 : vector<1x1x8x16xf32> to vector<8x16xf32>
    %500 = vector.shape_cast %497 : vector<8x16xf32> to vector<1x1x8x16xf32>
    tpu.vector_store %arg5[%c0_321, %c22, %c0_322, %c0_323], %500 {strides = array<i32>} : memref<1x32x8x16xf32, #tpu.memory_space<vmem>>, vector<1x1x8x16xf32>,
    %501 = vector.extract_strided_slice %481 {offsets = [0, 1], sizes = [8, 16], strides = [1, 1]} : vector<8x18xbf16> to vector<8x16xbf16>
    %cst_324 = arith.constant dense<0.000000e+00> : vector<8x16xf32>
    %502 = tpu.matmul %29, %501, %cst_324 {dimension_numbers = #tpu.dot_dimension_numbers<[1], [0], [0], [1], [0, 0, 1, 1], [], []>} : vector<8x8xbf16>, vector<8x16xbf16>, vector<8x16xf32> -> vector<8x16xf32>
    %503 = arith.addf %3, %502 : vector<8x16xf32>
    %504 = vector.extract_strided_slice %481 {offsets = [0, 2], sizes = [8, 16], strides = [1, 1]} : vector<8x18xbf16> to vector<8x16xbf16>
    %cst_325 = arith.constant dense<0.000000e+00> : vector<8x16xf32>
    %505 = tpu.matmul %31, %504, %cst_325 {dimension_numbers = #tpu.dot_dimension_numbers<[1], [0], [0], [1], [0, 0, 1, 1], [], []>} : vector<8x8xbf16>, vector<8x16xbf16>, vector<8x16xf32> -> vector<8x16xf32>
    %506 = arith.addf %503, %505 : vector<8x16xf32>
    %507 = vector.extract_strided_slice %485 {offsets = [0, 1], sizes = [8, 16], strides = [1, 1]} : vector<8x18xbf16> to vector<8x16xbf16>
    %cst_326 = arith.constant dense<0.000000e+00> : vector<8x16xf32>
    %508 = tpu.matmul %33, %507, %cst_326 {dimension_numbers = #tpu.dot_dimension_numbers<[1], [0], [0], [1], [0, 0, 1, 1], [], []>} : vector<8x8xbf16>, vector<8x16xbf16>, vector<8x16xf32> -> vector<8x16xf32>
    %509 = arith.addf %506, %508 : vector<8x16xf32>
    %510 = vector.extract_strided_slice %485 {offsets = [0, 2], sizes = [8, 16], strides = [1, 1]} : vector<8x18xbf16> to vector<8x16xbf16>
    %cst_327 = arith.constant dense<0.000000e+00> : vector<8x16xf32>
    %511 = tpu.matmul %35, %510, %cst_327 {dimension_numbers = #tpu.dot_dimension_numbers<[1], [0], [0], [1], [0, 0, 1, 1], [], []>} : vector<8x8xbf16>, vector<8x16xbf16>, vector<8x16xf32> -> vector<8x16xf32>
    %512 = arith.addf %509, %511 : vector<8x16xf32>
    %c0_328 = arith.constant 0 : index
    %c23 = arith.constant 23 : index
    %c0_329 = arith.constant 0 : index
    %c0_330 = arith.constant 0 : index
    %513 = vector.load %arg5[%c0_328, %c23, %c0_329, %c0_330] : memref<1x32x8x16xf32, #tpu.memory_space<vmem>>, vector<1x1x8x16xf32>
    %514 = vector.shape_cast %513 : vector<1x1x8x16xf32> to vector<8x16xf32>
    %515 = vector.shape_cast %512 : vector<8x16xf32> to vector<1x1x8x16xf32>
    tpu.vector_store %arg5[%c0_328, %c23, %c0_329, %c0_330], %515 {strides = array<i32>} : memref<1x32x8x16xf32, #tpu.memory_space<vmem>>, vector<1x1x8x16xf32>,
    %c6_i32 = arith.constant 6 : i32
    %516 = arith.addi %0, %c6_i32 : i32
    %c0_i32_331 = arith.constant 0 : i32
    %517 = arith.addi %516, %c0_i32_331 : i32
    %c0_i32_332 = arith.constant 0 : i32
    %518 = arith.addi %517, %c0_i32_332 : i32
    %c0_333 = arith.constant 0 : index
    %519 = arith.index_cast %518 : i32 to index
    %c0_334 = arith.constant 0 : index
    %c0_335 = arith.constant 0 : index
    %520 = vector.load %arg2[%c0_333, %519, %c0_334, %c0_335] : memref<1x18x8x18xbf16, #tpu.memory_space<vmem>>, vector<1x1x8x18xbf16>
    %521 = vector.shape_cast %520 : vector<1x1x8x18xbf16> to vector<8x18xbf16>
    %c1_i32_336 = arith.constant 1 : i32
    %522 = arith.addi %517, %c1_i32_336 : i32
    %c0_337 = arith.constant 0 : index
    %523 = arith.index_cast %522 : i32 to index
    %c0_338 = arith.constant 0 : index
    %c0_339 = arith.constant 0 : index
    %524 = vector.load %arg2[%c0_337, %523, %c0_338, %c0_339] : memref<1x18x8x18xbf16, #tpu.memory_space<vmem>>, vector<1x1x8x18xbf16>
    %525 = vector.shape_cast %524 : vector<1x1x8x18xbf16> to vector<8x18xbf16>
    %526 = vector.extract_strided_slice %521 {offsets = [0, 0], sizes = [8, 16], strides = [1, 1]} : vector<8x18xbf16> to vector<8x16xbf16>
    %cst_340 = arith.constant dense<0.000000e+00> : vector<8x16xf32>
    %527 = tpu.matmul %5, %526, %cst_340 {dimension_numbers = #tpu.dot_dimension_numbers<[1], [0], [0], [1], [0, 0, 1, 1], [], []>} : vector<8x8xbf16>, vector<8x16xbf16>, vector<8x16xf32> -> vector<8x16xf32>
    %528 = arith.addf %3, %527 : vector<8x16xf32>
    %529 = vector.extract_strided_slice %521 {offsets = [0, 1], sizes = [8, 16], strides = [1, 1]} : vector<8x18xbf16> to vector<8x16xbf16>
    %cst_341 = arith.constant dense<0.000000e+00> : vector<8x16xf32>
    %530 = tpu.matmul %7, %529, %cst_341 {dimension_numbers = #tpu.dot_dimension_numbers<[1], [0], [0], [1], [0, 0, 1, 1], [], []>} : vector<8x8xbf16>, vector<8x16xbf16>, vector<8x16xf32> -> vector<8x16xf32>
    %531 = arith.addf %528, %530 : vector<8x16xf32>
    %532 = vector.extract_strided_slice %525 {offsets = [0, 0], sizes = [8, 16], strides = [1, 1]} : vector<8x18xbf16> to vector<8x16xbf16>
    %cst_342 = arith.constant dense<0.000000e+00> : vector<8x16xf32>
    %533 = tpu.matmul %9, %532, %cst_342 {dimension_numbers = #tpu.dot_dimension_numbers<[1], [0], [0], [1], [0, 0, 1, 1], [], []>} : vector<8x8xbf16>, vector<8x16xbf16>, vector<8x16xf32> -> vector<8x16xf32>
    %534 = arith.addf %531, %533 : vector<8x16xf32>
    %535 = vector.extract_strided_slice %525 {offsets = [0, 1], sizes = [8, 16], strides = [1, 1]} : vector<8x18xbf16> to vector<8x16xbf16>
    %cst_343 = arith.constant dense<0.000000e+00> : vector<8x16xf32>
    %536 = tpu.matmul %11, %535, %cst_343 {dimension_numbers = #tpu.dot_dimension_numbers<[1], [0], [0], [1], [0, 0, 1, 1], [], []>} : vector<8x8xbf16>, vector<8x16xbf16>, vector<8x16xf32> -> vector<8x16xf32>
    %537 = arith.addf %534, %536 : vector<8x16xf32>
    %c0_344 = arith.constant 0 : index
    %c24 = arith.constant 24 : index
    %c0_345 = arith.constant 0 : index
    %c0_346 = arith.constant 0 : index
    %538 = vector.load %arg5[%c0_344, %c24, %c0_345, %c0_346] : memref<1x32x8x16xf32, #tpu.memory_space<vmem>>, vector<1x1x8x16xf32>
    %539 = vector.shape_cast %538 : vector<1x1x8x16xf32> to vector<8x16xf32>
    %540 = vector.shape_cast %537 : vector<8x16xf32> to vector<1x1x8x16xf32>
    tpu.vector_store %arg5[%c0_344, %c24, %c0_345, %c0_346], %540 {strides = array<i32>} : memref<1x32x8x16xf32, #tpu.memory_space<vmem>>, vector<1x1x8x16xf32>,
    %541 = vector.extract_strided_slice %521 {offsets = [0, 1], sizes = [8, 16], strides = [1, 1]} : vector<8x18xbf16> to vector<8x16xbf16>
    %cst_347 = arith.constant dense<0.000000e+00> : vector<8x16xf32>
    %542 = tpu.matmul %13, %541, %cst_347 {dimension_numbers = #tpu.dot_dimension_numbers<[1], [0], [0], [1], [0, 0, 1, 1], [], []>} : vector<8x8xbf16>, vector<8x16xbf16>, vector<8x16xf32> -> vector<8x16xf32>
    %543 = arith.addf %3, %542 : vector<8x16xf32>
    %544 = vector.extract_strided_slice %521 {offsets = [0, 2], sizes = [8, 16], strides = [1, 1]} : vector<8x18xbf16> to vector<8x16xbf16>
    %cst_348 = arith.constant dense<0.000000e+00> : vector<8x16xf32>
    %545 = tpu.matmul %15, %544, %cst_348 {dimension_numbers = #tpu.dot_dimension_numbers<[1], [0], [0], [1], [0, 0, 1, 1], [], []>} : vector<8x8xbf16>, vector<8x16xbf16>, vector<8x16xf32> -> vector<8x16xf32>
    %546 = arith.addf %543, %545 : vector<8x16xf32>
    %547 = vector.extract_strided_slice %525 {offsets = [0, 1], sizes = [8, 16], strides = [1, 1]} : vector<8x18xbf16> to vector<8x16xbf16>
    %cst_349 = arith.constant dense<0.000000e+00> : vector<8x16xf32>
    %548 = tpu.matmul %17, %547, %cst_349 {dimension_numbers = #tpu.dot_dimension_numbers<[1], [0], [0], [1], [0, 0, 1, 1], [], []>} : vector<8x8xbf16>, vector<8x16xbf16>, vector<8x16xf32> -> vector<8x16xf32>
    %549 = arith.addf %546, %548 : vector<8x16xf32>
    %550 = vector.extract_strided_slice %525 {offsets = [0, 2], sizes = [8, 16], strides = [1, 1]} : vector<8x18xbf16> to vector<8x16xbf16>
    %cst_350 = arith.constant dense<0.000000e+00> : vector<8x16xf32>
    %551 = tpu.matmul %19, %550, %cst_350 {dimension_numbers = #tpu.dot_dimension_numbers<[1], [0], [0], [1], [0, 0, 1, 1], [], []>} : vector<8x8xbf16>, vector<8x16xbf16>, vector<8x16xf32> -> vector<8x16xf32>
    %552 = arith.addf %549, %551 : vector<8x16xf32>
    %c0_351 = arith.constant 0 : index
    %c25 = arith.constant 25 : index
    %c0_352 = arith.constant 0 : index
    %c0_353 = arith.constant 0 : index
    %553 = vector.load %arg5[%c0_351, %c25, %c0_352, %c0_353] : memref<1x32x8x16xf32, #tpu.memory_space<vmem>>, vector<1x1x8x16xf32>
    %554 = vector.shape_cast %553 : vector<1x1x8x16xf32> to vector<8x16xf32>
    %555 = vector.shape_cast %552 : vector<8x16xf32> to vector<1x1x8x16xf32>
    tpu.vector_store %arg5[%c0_351, %c25, %c0_352, %c0_353], %555 {strides = array<i32>} : memref<1x32x8x16xf32, #tpu.memory_space<vmem>>, vector<1x1x8x16xf32>,
    %c6_i32_354 = arith.constant 6 : i32
    %556 = arith.addi %0, %c6_i32_354 : i32
    %c1_i32_355 = arith.constant 1 : i32
    %557 = arith.addi %556, %c1_i32_355 : i32
    %c0_i32_356 = arith.constant 0 : i32
    %558 = arith.addi %557, %c0_i32_356 : i32
    %c0_357 = arith.constant 0 : index
    %559 = arith.index_cast %558 : i32 to index
    %c0_358 = arith.constant 0 : index
    %c0_359 = arith.constant 0 : index
    %560 = vector.load %arg2[%c0_357, %559, %c0_358, %c0_359] : memref<1x18x8x18xbf16, #tpu.memory_space<vmem>>, vector<1x1x8x18xbf16>
    %561 = vector.shape_cast %560 : vector<1x1x8x18xbf16> to vector<8x18xbf16>
    %c1_i32_360 = arith.constant 1 : i32
    %562 = arith.addi %557, %c1_i32_360 : i32
    %c0_361 = arith.constant 0 : index
    %563 = arith.index_cast %562 : i32 to index
    %c0_362 = arith.constant 0 : index
    %c0_363 = arith.constant 0 : index
    %564 = vector.load %arg2[%c0_361, %563, %c0_362, %c0_363] : memref<1x18x8x18xbf16, #tpu.memory_space<vmem>>, vector<1x1x8x18xbf16>
    %565 = vector.shape_cast %564 : vector<1x1x8x18xbf16> to vector<8x18xbf16>
    %566 = vector.extract_strided_slice %561 {offsets = [0, 0], sizes = [8, 16], strides = [1, 1]} : vector<8x18xbf16> to vector<8x16xbf16>
    %cst_364 = arith.constant dense<0.000000e+00> : vector<8x16xf32>
    %567 = tpu.matmul %21, %566, %cst_364 {dimension_numbers = #tpu.dot_dimension_numbers<[1], [0], [0], [1], [0, 0, 1, 1], [], []>} : vector<8x8xbf16>, vector<8x16xbf16>, vector<8x16xf32> -> vector<8x16xf32>
    %568 = arith.addf %3, %567 : vector<8x16xf32>
    %569 = vector.extract_strided_slice %561 {offsets = [0, 1], sizes = [8, 16], strides = [1, 1]} : vector<8x18xbf16> to vector<8x16xbf16>
    %cst_365 = arith.constant dense<0.000000e+00> : vector<8x16xf32>
    %570 = tpu.matmul %23, %569, %cst_365 {dimension_numbers = #tpu.dot_dimension_numbers<[1], [0], [0], [1], [0, 0, 1, 1], [], []>} : vector<8x8xbf16>, vector<8x16xbf16>, vector<8x16xf32> -> vector<8x16xf32>
    %571 = arith.addf %568, %570 : vector<8x16xf32>
    %572 = vector.extract_strided_slice %565 {offsets = [0, 0], sizes = [8, 16], strides = [1, 1]} : vector<8x18xbf16> to vector<8x16xbf16>
    %cst_366 = arith.constant dense<0.000000e+00> : vector<8x16xf32>
    %573 = tpu.matmul %25, %572, %cst_366 {dimension_numbers = #tpu.dot_dimension_numbers<[1], [0], [0], [1], [0, 0, 1, 1], [], []>} : vector<8x8xbf16>, vector<8x16xbf16>, vector<8x16xf32> -> vector<8x16xf32>
    %574 = arith.addf %571, %573 : vector<8x16xf32>
    %575 = vector.extract_strided_slice %565 {offsets = [0, 1], sizes = [8, 16], strides = [1, 1]} : vector<8x18xbf16> to vector<8x16xbf16>
    %cst_367 = arith.constant dense<0.000000e+00> : vector<8x16xf32>
    %576 = tpu.matmul %27, %575, %cst_367 {dimension_numbers = #tpu.dot_dimension_numbers<[1], [0], [0], [1], [0, 0, 1, 1], [], []>} : vector<8x8xbf16>, vector<8x16xbf16>, vector<8x16xf32> -> vector<8x16xf32>
    %577 = arith.addf %574, %576 : vector<8x16xf32>
    %c0_368 = arith.constant 0 : index
    %c26 = arith.constant 26 : index
    %c0_369 = arith.constant 0 : index
    %c0_370 = arith.constant 0 : index
    %578 = vector.load %arg5[%c0_368, %c26, %c0_369, %c0_370] : memref<1x32x8x16xf32, #tpu.memory_space<vmem>>, vector<1x1x8x16xf32>
    %579 = vector.shape_cast %578 : vector<1x1x8x16xf32> to vector<8x16xf32>
    %580 = vector.shape_cast %577 : vector<8x16xf32> to vector<1x1x8x16xf32>
    tpu.vector_store %arg5[%c0_368, %c26, %c0_369, %c0_370], %580 {strides = array<i32>} : memref<1x32x8x16xf32, #tpu.memory_space<vmem>>, vector<1x1x8x16xf32>,
    %581 = vector.extract_strided_slice %561 {offsets = [0, 1], sizes = [8, 16], strides = [1, 1]} : vector<8x18xbf16> to vector<8x16xbf16>
    %cst_371 = arith.constant dense<0.000000e+00> : vector<8x16xf32>
    %582 = tpu.matmul %29, %581, %cst_371 {dimension_numbers = #tpu.dot_dimension_numbers<[1], [0], [0], [1], [0, 0, 1, 1], [], []>} : vector<8x8xbf16>, vector<8x16xbf16>, vector<8x16xf32> -> vector<8x16xf32>
    %583 = arith.addf %3, %582 : vector<8x16xf32>
    %584 = vector.extract_strided_slice %561 {offsets = [0, 2], sizes = [8, 16], strides = [1, 1]} : vector<8x18xbf16> to vector<8x16xbf16>
    %cst_372 = arith.constant dense<0.000000e+00> : vector<8x16xf32>
    %585 = tpu.matmul %31, %584, %cst_372 {dimension_numbers = #tpu.dot_dimension_numbers<[1], [0], [0], [1], [0, 0, 1, 1], [], []>} : vector<8x8xbf16>, vector<8x16xbf16>, vector<8x16xf32> -> vector<8x16xf32>
    %586 = arith.addf %583, %585 : vector<8x16xf32>
    %587 = vector.extract_strided_slice %565 {offsets = [0, 1], sizes = [8, 16], strides = [1, 1]} : vector<8x18xbf16> to vector<8x16xbf16>
    %cst_373 = arith.constant dense<0.000000e+00> : vector<8x16xf32>
    %588 = tpu.matmul %33, %587, %cst_373 {dimension_numbers = #tpu.dot_dimension_numbers<[1], [0], [0], [1], [0, 0, 1, 1], [], []>} : vector<8x8xbf16>, vector<8x16xbf16>, vector<8x16xf32> -> vector<8x16xf32>
    %589 = arith.addf %586, %588 : vector<8x16xf32>
    %590 = vector.extract_strided_slice %565 {offsets = [0, 2], sizes = [8, 16], strides = [1, 1]} : vector<8x18xbf16> to vector<8x16xbf16>
    %cst_374 = arith.constant dense<0.000000e+00> : vector<8x16xf32>
    %591 = tpu.matmul %35, %590, %cst_374 {dimension_numbers = #tpu.dot_dimension_numbers<[1], [0], [0], [1], [0, 0, 1, 1], [], []>} : vector<8x8xbf16>, vector<8x16xbf16>, vector<8x16xf32> -> vector<8x16xf32>
    %592 = arith.addf %589, %591 : vector<8x16xf32>
    %c0_375 = arith.constant 0 : index
    %c27 = arith.constant 27 : index
    %c0_376 = arith.constant 0 : index
    %c0_377 = arith.constant 0 : index
    %593 = vector.load %arg5[%c0_375, %c27, %c0_376, %c0_377] : memref<1x32x8x16xf32, #tpu.memory_space<vmem>>, vector<1x1x8x16xf32>
    %594 = vector.shape_cast %593 : vector<1x1x8x16xf32> to vector<8x16xf32>
    %595 = vector.shape_cast %592 : vector<8x16xf32> to vector<1x1x8x16xf32>
    tpu.vector_store %arg5[%c0_375, %c27, %c0_376, %c0_377], %595 {strides = array<i32>} : memref<1x32x8x16xf32, #tpu.memory_space<vmem>>, vector<1x1x8x16xf32>,
    %c7_i32 = arith.constant 7 : i32
    %596 = arith.addi %0, %c7_i32 : i32
    %c0_i32_378 = arith.constant 0 : i32
    %597 = arith.addi %596, %c0_i32_378 : i32
    %c0_i32_379 = arith.constant 0 : i32
    %598 = arith.addi %597, %c0_i32_379 : i32
    %c0_380 = arith.constant 0 : index
    %599 = arith.index_cast %598 : i32 to index
    %c0_381 = arith.constant 0 : index
    %c0_382 = arith.constant 0 : index
    %600 = vector.load %arg2[%c0_380, %599, %c0_381, %c0_382] : memref<1x18x8x18xbf16, #tpu.memory_space<vmem>>, vector<1x1x8x18xbf16>
    %601 = vector.shape_cast %600 : vector<1x1x8x18xbf16> to vector<8x18xbf16>
    %c1_i32_383 = arith.constant 1 : i32
    %602 = arith.addi %597, %c1_i32_383 : i32
    %c0_384 = arith.constant 0 : index
    %603 = arith.index_cast %602 : i32 to index
    %c0_385 = arith.constant 0 : index
    %c0_386 = arith.constant 0 : index
    %604 = vector.load %arg2[%c0_384, %603, %c0_385, %c0_386] : memref<1x18x8x18xbf16, #tpu.memory_space<vmem>>, vector<1x1x8x18xbf16>
    %605 = vector.shape_cast %604 : vector<1x1x8x18xbf16> to vector<8x18xbf16>
    %606 = vector.extract_strided_slice %601 {offsets = [0, 0], sizes = [8, 16], strides = [1, 1]} : vector<8x18xbf16> to vector<8x16xbf16>
    %cst_387 = arith.constant dense<0.000000e+00> : vector<8x16xf32>
    %607 = tpu.matmul %5, %606, %cst_387 {dimension_numbers = #tpu.dot_dimension_numbers<[1], [0], [0], [1], [0, 0, 1, 1], [], []>} : vector<8x8xbf16>, vector<8x16xbf16>, vector<8x16xf32> -> vector<8x16xf32>
    %608 = arith.addf %3, %607 : vector<8x16xf32>
    %609 = vector.extract_strided_slice %601 {offsets = [0, 1], sizes = [8, 16], strides = [1, 1]} : vector<8x18xbf16> to vector<8x16xbf16>
    %cst_388 = arith.constant dense<0.000000e+00> : vector<8x16xf32>
    %610 = tpu.matmul %7, %609, %cst_388 {dimension_numbers = #tpu.dot_dimension_numbers<[1], [0], [0], [1], [0, 0, 1, 1], [], []>} : vector<8x8xbf16>, vector<8x16xbf16>, vector<8x16xf32> -> vector<8x16xf32>
    %611 = arith.addf %608, %610 : vector<8x16xf32>
    %612 = vector.extract_strided_slice %605 {offsets = [0, 0], sizes = [8, 16], strides = [1, 1]} : vector<8x18xbf16> to vector<8x16xbf16>
    %cst_389 = arith.constant dense<0.000000e+00> : vector<8x16xf32>
    %613 = tpu.matmul %9, %612, %cst_389 {dimension_numbers = #tpu.dot_dimension_numbers<[1], [0], [0], [1], [0, 0, 1, 1], [], []>} : vector<8x8xbf16>, vector<8x16xbf16>, vector<8x16xf32> -> vector<8x16xf32>
    %614 = arith.addf %611, %613 : vector<8x16xf32>
    %615 = vector.extract_strided_slice %605 {offsets = [0, 1], sizes = [8, 16], strides = [1, 1]} : vector<8x18xbf16> to vector<8x16xbf16>
    %cst_390 = arith.constant dense<0.000000e+00> : vector<8x16xf32>
    %616 = tpu.matmul %11, %615, %cst_390 {dimension_numbers = #tpu.dot_dimension_numbers<[1], [0], [0], [1], [0, 0, 1, 1], [], []>} : vector<8x8xbf16>, vector<8x16xbf16>, vector<8x16xf32> -> vector<8x16xf32>
    %617 = arith.addf %614, %616 : vector<8x16xf32>
    %c0_391 = arith.constant 0 : index
    %c28 = arith.constant 28 : index
    %c0_392 = arith.constant 0 : index
    %c0_393 = arith.constant 0 : index
    %618 = vector.load %arg5[%c0_391, %c28, %c0_392, %c0_393] : memref<1x32x8x16xf32, #tpu.memory_space<vmem>>, vector<1x1x8x16xf32>
    %619 = vector.shape_cast %618 : vector<1x1x8x16xf32> to vector<8x16xf32>
    %620 = vector.shape_cast %617 : vector<8x16xf32> to vector<1x1x8x16xf32>
    tpu.vector_store %arg5[%c0_391, %c28, %c0_392, %c0_393], %620 {strides = array<i32>} : memref<1x32x8x16xf32, #tpu.memory_space<vmem>>, vector<1x1x8x16xf32>,
    %621 = vector.extract_strided_slice %601 {offsets = [0, 1], sizes = [8, 16], strides = [1, 1]} : vector<8x18xbf16> to vector<8x16xbf16>
    %cst_394 = arith.constant dense<0.000000e+00> : vector<8x16xf32>
    %622 = tpu.matmul %13, %621, %cst_394 {dimension_numbers = #tpu.dot_dimension_numbers<[1], [0], [0], [1], [0, 0, 1, 1], [], []>} : vector<8x8xbf16>, vector<8x16xbf16>, vector<8x16xf32> -> vector<8x16xf32>
    %623 = arith.addf %3, %622 : vector<8x16xf32>
    %624 = vector.extract_strided_slice %601 {offsets = [0, 2], sizes = [8, 16], strides = [1, 1]} : vector<8x18xbf16> to vector<8x16xbf16>
    %cst_395 = arith.constant dense<0.000000e+00> : vector<8x16xf32>
    %625 = tpu.matmul %15, %624, %cst_395 {dimension_numbers = #tpu.dot_dimension_numbers<[1], [0], [0], [1], [0, 0, 1, 1], [], []>} : vector<8x8xbf16>, vector<8x16xbf16>, vector<8x16xf32> -> vector<8x16xf32>
    %626 = arith.addf %623, %625 : vector<8x16xf32>
    %627 = vector.extract_strided_slice %605 {offsets = [0, 1], sizes = [8, 16], strides = [1, 1]} : vector<8x18xbf16> to vector<8x16xbf16>
    %cst_396 = arith.constant dense<0.000000e+00> : vector<8x16xf32>
    %628 = tpu.matmul %17, %627, %cst_396 {dimension_numbers = #tpu.dot_dimension_numbers<[1], [0], [0], [1], [0, 0, 1, 1], [], []>} : vector<8x8xbf16>, vector<8x16xbf16>, vector<8x16xf32> -> vector<8x16xf32>
    %629 = arith.addf %626, %628 : vector<8x16xf32>
    %630 = vector.extract_strided_slice %605 {offsets = [0, 2], sizes = [8, 16], strides = [1, 1]} : vector<8x18xbf16> to vector<8x16xbf16>
    %cst_397 = arith.constant dense<0.000000e+00> : vector<8x16xf32>
    %631 = tpu.matmul %19, %630, %cst_397 {dimension_numbers = #tpu.dot_dimension_numbers<[1], [0], [0], [1], [0, 0, 1, 1], [], []>} : vector<8x8xbf16>, vector<8x16xbf16>, vector<8x16xf32> -> vector<8x16xf32>
    %632 = arith.addf %629, %631 : vector<8x16xf32>
    %c0_398 = arith.constant 0 : index
    %c29 = arith.constant 29 : index
    %c0_399 = arith.constant 0 : index
    %c0_400 = arith.constant 0 : index
    %633 = vector.load %arg5[%c0_398, %c29, %c0_399, %c0_400] : memref<1x32x8x16xf32, #tpu.memory_space<vmem>>, vector<1x1x8x16xf32>
    %634 = vector.shape_cast %633 : vector<1x1x8x16xf32> to vector<8x16xf32>
    %635 = vector.shape_cast %632 : vector<8x16xf32> to vector<1x1x8x16xf32>
    tpu.vector_store %arg5[%c0_398, %c29, %c0_399, %c0_400], %635 {strides = array<i32>} : memref<1x32x8x16xf32, #tpu.memory_space<vmem>>, vector<1x1x8x16xf32>,
    %c7_i32_401 = arith.constant 7 : i32
    %636 = arith.addi %0, %c7_i32_401 : i32
    %c1_i32_402 = arith.constant 1 : i32
    %637 = arith.addi %636, %c1_i32_402 : i32
    %c0_i32_403 = arith.constant 0 : i32
    %638 = arith.addi %637, %c0_i32_403 : i32
    %c0_404 = arith.constant 0 : index
    %639 = arith.index_cast %638 : i32 to index
    %c0_405 = arith.constant 0 : index
    %c0_406 = arith.constant 0 : index
    %640 = vector.load %arg2[%c0_404, %639, %c0_405, %c0_406] : memref<1x18x8x18xbf16, #tpu.memory_space<vmem>>, vector<1x1x8x18xbf16>
    %641 = vector.shape_cast %640 : vector<1x1x8x18xbf16> to vector<8x18xbf16>
    %c1_i32_407 = arith.constant 1 : i32
    %642 = arith.addi %637, %c1_i32_407 : i32
    %c0_408 = arith.constant 0 : index
    %643 = arith.index_cast %642 : i32 to index
    %c0_409 = arith.constant 0 : index
    %c0_410 = arith.constant 0 : index
    %644 = vector.load %arg2[%c0_408, %643, %c0_409, %c0_410] : memref<1x18x8x18xbf16, #tpu.memory_space<vmem>>, vector<1x1x8x18xbf16>
    %645 = vector.shape_cast %644 : vector<1x1x8x18xbf16> to vector<8x18xbf16>
    %646 = vector.extract_strided_slice %641 {offsets = [0, 0], sizes = [8, 16], strides = [1, 1]} : vector<8x18xbf16> to vector<8x16xbf16>
    %cst_411 = arith.constant dense<0.000000e+00> : vector<8x16xf32>
    %647 = tpu.matmul %21, %646, %cst_411 {dimension_numbers = #tpu.dot_dimension_numbers<[1], [0], [0], [1], [0, 0, 1, 1], [], []>} : vector<8x8xbf16>, vector<8x16xbf16>, vector<8x16xf32> -> vector<8x16xf32>
    %648 = arith.addf %3, %647 : vector<8x16xf32>
    %649 = vector.extract_strided_slice %641 {offsets = [0, 1], sizes = [8, 16], strides = [1, 1]} : vector<8x18xbf16> to vector<8x16xbf16>
    %cst_412 = arith.constant dense<0.000000e+00> : vector<8x16xf32>
    %650 = tpu.matmul %23, %649, %cst_412 {dimension_numbers = #tpu.dot_dimension_numbers<[1], [0], [0], [1], [0, 0, 1, 1], [], []>} : vector<8x8xbf16>, vector<8x16xbf16>, vector<8x16xf32> -> vector<8x16xf32>
    %651 = arith.addf %648, %650 : vector<8x16xf32>
    %652 = vector.extract_strided_slice %645 {offsets = [0, 0], sizes = [8, 16], strides = [1, 1]} : vector<8x18xbf16> to vector<8x16xbf16>
    %cst_413 = arith.constant dense<0.000000e+00> : vector<8x16xf32>
    %653 = tpu.matmul %25, %652, %cst_413 {dimension_numbers = #tpu.dot_dimension_numbers<[1], [0], [0], [1], [0, 0, 1, 1], [], []>} : vector<8x8xbf16>, vector<8x16xbf16>, vector<8x16xf32> -> vector<8x16xf32>
    %654 = arith.addf %651, %653 : vector<8x16xf32>
    %655 = vector.extract_strided_slice %645 {offsets = [0, 1], sizes = [8, 16], strides = [1, 1]} : vector<8x18xbf16> to vector<8x16xbf16>
    %cst_414 = arith.constant dense<0.000000e+00> : vector<8x16xf32>
    %656 = tpu.matmul %27, %655, %cst_414 {dimension_numbers = #tpu.dot_dimension_numbers<[1], [0], [0], [1], [0, 0, 1, 1], [], []>} : vector<8x8xbf16>, vector<8x16xbf16>, vector<8x16xf32> -> vector<8x16xf32>
    %657 = arith.addf %654, %656 : vector<8x16xf32>
    %c0_415 = arith.constant 0 : index
    %c30 = arith.constant 30 : index
    %c0_416 = arith.constant 0 : index
    %c0_417 = arith.constant 0 : index
    %658 = vector.load %arg5[%c0_415, %c30, %c0_416, %c0_417] : memref<1x32x8x16xf32, #tpu.memory_space<vmem>>, vector<1x1x8x16xf32>
    %659 = vector.shape_cast %658 : vector<1x1x8x16xf32> to vector<8x16xf32>
    %660 = vector.shape_cast %657 : vector<8x16xf32> to vector<1x1x8x16xf32>
    tpu.vector_store %arg5[%c0_415, %c30, %c0_416, %c0_417], %660 {strides = array<i32>} : memref<1x32x8x16xf32, #tpu.memory_space<vmem>>, vector<1x1x8x16xf32>,
    %661 = vector.extract_strided_slice %641 {offsets = [0, 1], sizes = [8, 16], strides = [1, 1]} : vector<8x18xbf16> to vector<8x16xbf16>
    %cst_418 = arith.constant dense<0.000000e+00> : vector<8x16xf32>
    %662 = tpu.matmul %29, %661, %cst_418 {dimension_numbers = #tpu.dot_dimension_numbers<[1], [0], [0], [1], [0, 0, 1, 1], [], []>} : vector<8x8xbf16>, vector<8x16xbf16>, vector<8x16xf32> -> vector<8x16xf32>
    %663 = arith.addf %3, %662 : vector<8x16xf32>
    %664 = vector.extract_strided_slice %641 {offsets = [0, 2], sizes = [8, 16], strides = [1, 1]} : vector<8x18xbf16> to vector<8x16xbf16>
    %cst_419 = arith.constant dense<0.000000e+00> : vector<8x16xf32>
    %665 = tpu.matmul %31, %664, %cst_419 {dimension_numbers = #tpu.dot_dimension_numbers<[1], [0], [0], [1], [0, 0, 1, 1], [], []>} : vector<8x8xbf16>, vector<8x16xbf16>, vector<8x16xf32> -> vector<8x16xf32>
    %666 = arith.addf %663, %665 : vector<8x16xf32>
    %667 = vector.extract_strided_slice %645 {offsets = [0, 1], sizes = [8, 16], strides = [1, 1]} : vector<8x18xbf16> to vector<8x16xbf16>
    %cst_420 = arith.constant dense<0.000000e+00> : vector<8x16xf32>
    %668 = tpu.matmul %33, %667, %cst_420 {dimension_numbers = #tpu.dot_dimension_numbers<[1], [0], [0], [1], [0, 0, 1, 1], [], []>} : vector<8x8xbf16>, vector<8x16xbf16>, vector<8x16xf32> -> vector<8x16xf32>
    %669 = arith.addf %666, %668 : vector<8x16xf32>
    %670 = vector.extract_strided_slice %645 {offsets = [0, 2], sizes = [8, 16], strides = [1, 1]} : vector<8x18xbf16> to vector<8x16xbf16>
    %cst_421 = arith.constant dense<0.000000e+00> : vector<8x16xf32>
    %671 = tpu.matmul %35, %670, %cst_421 {dimension_numbers = #tpu.dot_dimension_numbers<[1], [0], [0], [1], [0, 0, 1, 1], [], []>} : vector<8x8xbf16>, vector<8x16xbf16>, vector<8x16xf32> -> vector<8x16xf32>
    %672 = arith.addf %669, %671 : vector<8x16xf32>
    %c0_422 = arith.constant 0 : index
    %c31 = arith.constant 31 : index
    %c0_423 = arith.constant 0 : index
    %c0_424 = arith.constant 0 : index
    %673 = vector.load %arg5[%c0_422, %c31, %c0_423, %c0_424] : memref<1x32x8x16xf32, #tpu.memory_space<vmem>>, vector<1x1x8x16xf32>
    %674 = vector.shape_cast %673 : vector<1x1x8x16xf32> to vector<8x16xf32>
    %675 = vector.shape_cast %672 : vector<8x16xf32> to vector<1x1x8x16xf32>
    tpu.vector_store %arg5[%c0_422, %c31, %c0_423, %c0_424], %675 {strides = array<i32>} : memref<1x32x8x16xf32, #tpu.memory_space<vmem>>, vector<1x1x8x16xf32>,
    return
  }
  func.func @transform_0(%arg0: i32, %arg1: i32) -> (i32, i32, i32, i32) {
    %c0_i32 = arith.constant 0 : i32
    %c0_i32_0 = arith.constant 0 : i32
    %c0_i32_1 = arith.constant 0 : i32
    %c0_i32_2 = arith.constant 0 : i32
    return %arg0, %c0_i32, %c0_i32_0, %c0_i32_1 : i32, i32, i32, i32
  }
  func.func @transform_1(%arg0: i32, %arg1: i32) -> (i32, i32, i32) {
    %c0_i32 = arith.constant 0 : i32
    %c0_i32_0 = arith.constant 0 : i32
    %c0_i32_1 = arith.constant 0 : i32
    %c0_i32_2 = arith.constant 0 : i32
    return %c0_i32, %c0_i32_0, %c0_i32_1 : i32, i32, i32
  }
  func.func @transform_2(%arg0: i32, %arg1: i32) -> (i32, i32) {
    %c0_i32 = arith.constant 0 : i32
    %c0_i32_0 = arith.constant 0 : i32
    %c0_i32_1 = arith.constant 0 : i32
    return %c0_i32, %c0_i32_0 : i32, i32
  }
  func.func @transform_3(%arg0: i32, %arg1: i32) -> (i32, i32, i32, i32) {
    %c0_i32 = arith.constant 0 : i32
    %c0_i32_0 = arith.constant 0 : i32
    %c0_i32_1 = arith.constant 0 : i32
    return %arg0, %arg1, %c0_i32, %c0_i32_0 : i32, i32, i32, i32
  }
}

</mosaic_0001>

<bundles_post_ra>
// kernel: tpu_custom_call.1
= control target key start
LH: loop header
LB: loop body
LE: loop exit
PB: predicated region body
PF: predicated region fallthrough
CT: control target
= control target key end

     0   :  { %8 = vsyncpa [#allocation3], 0  ;;  %s9724_s0 = inlined_call_operand.hbm [shape: bf16[2,18,8,18], index: 0, kind: input, shape index: {}]   ;;  %s9725_s1 = inlined_call_operand.vmem [shape: bf16[16,8,8], index: 1, kind: input, shape index: {}]   ;;  %s9726_s2 = inlined_call_operand.vmem [shape: f32[8,1], index: 2, kind: input, shape index: {}]   ;;  %s9727_s3 = inlined_call_operand.vmem [shape: f32[2,64,8,16], index: 3, kind: output, shape index: {}]  }
   0x1   :  { %10 = vsyncpa [#allocation3 + $0x1], 0  ;;  %s8308_s12 = smov 0   ;;  %s8310_s13 = smov 0  }
   0x2   :  { %s8312_s14 = smov 0   ;;  %s8314_s15 = smov 0  }
   0x3   :  { %s8316_s16 = smov 0   ;;  %s8318_s17 = smov 0  }
   0x4   :  { %s8320_s18 = smov 0   ;;  %s8322_s19 = smov 0  }
   0x5 LB: > { %s6321_s20 = sadd.s32 4294967295, %s8278_s19   ;;  %s25_s21 = sadd.s32 1, %s8270_s17  ;;  %s8278_s19 = sphi %s8322_s19, %s16_s19   ;;  %s8274_s18 = sphi %s8320_s18, %s9736_s18   ;;  %s8270_s17 = sphi %s8318_s17, %s9735_s17   ;;  %s8266_s16 = sphi %s8316_s16, %s9734_s16   ;;  %s8262_s15 = sphi %s8314_s15, %s9733_s15   ;;  %s8258_s14 = sphi %s8312_s14, %s9732_s14   ;;  %s8254_s13 = sphi %s8310_s13, %s9731_s13   ;;  %s8250_s12 = sphi %s8308_s12, %s9730_s12  }
   0x6   : > { %p26_p0 = scmp.ge.s32.totalorder %s25_s21, 2  ;;  %s28_s22 = sadd.s32 1, %s8274_s18 }
   0x7   : > { %s35_s23 = sadd.s32 1, %s8258_s14  ;;  %p42_p1 = scmp.ne.s32.totalorder %s8258_s14, %s8254_s13 }
   0x8   : > { %s9738_s21 = smov (%p26_p0, %s25_s21), 0  ;;  %s9740_s22 = smov (!%p26_p0, %s28_s22), %s8274_s18 }
   0x9   : > { %p43_p2 = scmp.eq.s32.totalorder %s8278_s19, 0  ;;  %p48_p3 = scmp.ne.s32.totalorder %s8254_s13, %s8250_s12 }
   0xa   : > { %p30_p4 = scmp.ge.s32.totalorder %s9740_s22, 2  ;;  %p49_p5 = scmp.eq.s32.totalorder %s6321_s20, 0 }
   0xb   : > { %p44_p6 = por %p43_p2, %p42_p1  ;;  %p8048_p8 = scmp.lt.s32.totalorder %s8278_s19, 4 }
   0xc   : > { %s9742_s22 = smov (%p30_p4, %s9740_s22), 0  ;;  %p8359_p7 = por %p49_p5, %p48_p3 }
   0xd   : > { %s32_s25 = ssub.s32 %s8274_s18, %s9742_s22  ;;  %s148_s26 = sand.u32 1, %s8258_s14  }
   0xe   : > { %p33_p9 = scmp.eq.s32.totalorder %s32_s25, 0  ;;  %s8039_s27 = smul.u32 72, %s148_s26 }
   0xf   : > { %p8367_p10 = pnand %p8048_p8, %p44_p6  ;;  %s8040_s30 = smul.u32 1152, %s8274_s18 }
  0x10   : > { %s8372_s29 = scalar_select %p33_p9, %s8258_s14, %s35_s23  }
  0x11   : > { %s152_s4 = scalar_lea.vmem [#allocation2], %s8039_s27  ;;  %s8378_s8 = scalar_lea.hbm %s9724_s0, %s8040_s30 }
  0x12   : > { %s159_s5 = sshll.u32 %s152_s4, 4  ;;  %s8382_s9 = scalar_lea.sflag [#allocation3], %s148_s26  ;;  %s8380_s5 = int_to_ptr.vmem [resolvable:$true] %s159_s5 }
  0x13   : > { %s8182_s10 = scalar_lea.hbm %s8378_s8, 1152  ;;  %p8184_p12 = pneg %p8367_p10 }
  0x14   : > { %p8183_p11 = scmp.ne.s32.totalorder %s8378_s8, %s8182_s10  ;;  %s8187_s20 = scalar_lea.hbm %s9724_s0, 2304 }
  0x15   : > { %p8188_p1 = scmp.lt.u32.totalorder %s8378_s8, %s9724_s0  ;;  %p8189_p2 = scmp.lt.u32.totalorder %s8187_s20, %s8182_s10 }
  0x16   : > { %p8185_p13 = pnand %p8184_p12, %p8183_p11  ;;  %p8191_p4 = scmp.lt.u32.totalorder %s8182_s10, %s8378_s8 }
  0x17   : > { %p8190_p3 = por %p8189_p2, %p8188_p1 }
  0x18   : > { %p8186_p0 = pneg %p8185_p13 }
  0x19   : > { %p8192_p5 = por %p8191_p4, %p8190_p3 }
  0x1b   : > { %p8193_p6 = pnand %p8192_p5, %p8186_p0 }
  0x1d   : > { %8196 = shalt.err (!%p8193_p6)
}
  0x1e   : > { %s8197_s26 = scalar_lea.vmem %s8380_s5, 1152  ;;  %s8280_s27 = smov [#allocation2]  }
  0x1f   : > { %p8198_p8 = scmp.ne.s32.totalorder %s8380_s5, %s8197_s26  ;;  %s8202_s30 = sshll.u32 %s8280_s27, 4  ;;  %s8203_s30 = int_to_ptr.vmem [resolvable:$false] %s8202_s30 }
  0x20   : > { %s8204_s4 = scalar_lea.vmem %s8203_s30, 2304  ;;  %p8205_p13 = scmp.lt.s32.totalorder %s8380_s5, %s8203_s30 }
  0x21   : > { %p8200_p9 = pnand %p8198_p8, %p8184_p12  ;;  %p8206_p1 = scmp.lt.s32.totalorder %s8204_s4, %s8197_s26 }
  0x23   : > { %p8201_p11 = pneg %p8200_p9  ;;  %p8207_p2 = por %p8206_p1, %p8205_p13 }
  0x25   : > { %p8208_p3 = pnand %p8207_p2, %p8201_p11 }
  0x27   : > { %8211 = shalt.err (!%p8208_p3)
}
  0x28   : > { %s8281_s6 = smov 64   ;;  %s8282_s7 = smov 4  }
  0x29   : > { %8047 = dma.hbm_to_vmem [thread:$0]  (!%p8367_p10), %s8378_s8, 1152, %s8380_s5, %s8382_s9, %s8281_s6, %s8281_s6, %s8282_s7  }
  0x2a   : > { %p6326_p12 = scmp.ge.s32.totalorder %s8278_s19, 1  ;;  %p167_p0 = scmp.lt.s32.totalorder %s8278_s19, 5 }
  0x2c   : > { %p168_p4 = pnand %p6326_p12, %p167_p0 }
  0x2d   : > { %s173_s10 = sand.u32 (!%p168_p4), 1, %s8254_s13  }
  0x2e   : > { %171 = sbr.rel (%p168_p4) target bundleno = 1089 (0x441), region = 32  ;;  %s174_s12 = scalar_lea.sflag (!%p168_p4), [#allocation3], %s173_s10 }
  0x2f   : > { %s8041_s11 = smul.u32 (!%p168_p4), 72, %s173_s10 }
  0x31   : > { %s177_s20 = scalar_lea.vmem (!%p168_p4), [#allocation2], %s8041_s11 }
  0x35   : > { %8245 = dma.done.wait (%p8359_p7), %s174_s12, 1152  }
  0x36   : > { %8247 = vsyncadd (%p8359_p7), %s174_s12, 4294966144  ;;  %s8418_s23 = sshll.u32 %s8262_s15, 5  ;;  %v8283_v0 = vmov 0.0   ;;  %vm8284_vm0 = vmmov 0   ;;  %vm264_vm1 = vcmask 1043456   ;;  %s8285_s15 = smov 127  }
  0x37   : > { %6855 = vmatprep.subr.bf16.mxu0 %v8283_v0  ;;  %6857 = vmatprep.mubr.msk.bf16.mxu0 %vm8284_vm0, %v8283_v0  ;;  %s8427_s28 = scalar_lea.vmem %s177_s20, %s8418_s23 [#allocation2]  ;;  %v8444_v7 = vld [vmem:[%s9725_s1] sm:$0xf]  ;;  %vm260_vm2 = vcmask 64512   ;;  %s8286_s8 = smov 126   ;;  %v8287_v54 = vmov 0   ;;  %vm460_vm3 = vcmask 130048  }
  0x38   : > { %6879 = vmatprep.subr.bf16.mxu1 %v8283_v0  ;;  %6881 = vmatprep.mubr.msk.bf16.mxu1 %vm8284_vm0, %v8283_v0  ;;  %v255_v1 = vld [vmem:[%s8427_s28] sm:$0xf]  ;;  %v8431_v2 = vld [vmem:[%s8427_s28 + $0x4] sm:$0xf]  ;;  %v8452_v9 = vld [vmem:[%s8427_s28 + $0x8] sm:$0xf] }
  0x39   : > { %v6351_v3 = vcombine.low %v255_v1, %v255_v1  ;;  %v6354_v4 = vcombine.low %v8431_v2, %v8431_v2  ;;  %v266_v5 = vsel %vm264_vm1, %v255_v1, 0  ;;  %v8439_v6 = vld [vmem:[%s8427_s28 + $0x4] sm:$0xf]  ;;  %v6369_v10 = vcombine.low %v8452_v9, %v8452_v9  ;;  %v8470_v13 = vld [vmem:[%s8427_s28 + $0x8] sm:$0xf]  ;;  %8120 = vset.pattern.permute.xlu0 %v8287_v54  ;;  %p205_p7 = scmp.lt.s32.totalorder %s8266_s16, 1 }
  0x3a   : > { %6856 = vmatpush3.bf16.msra.mxu0 %v266_v5  ;;  %v6366_v8 = vcombine.low %v8439_v6, %v8439_v6  ;;  %v8463_v11 = vld [vmem:[%s8427_s28 + $0x4] sm:$0xf]  ;;  %v6383_v14 = vcombine.low %v8470_v13, %v8470_v13  ;;  %v8477_v15 = vld [vmem:[%s8427_s28 + $0x8] sm:$0xf]  ;;  %v8484_v17 = vld [vmem:[%s8427_s28 + $0xc] sm:$0xf] }
  0x3b   : > { %312 = vrot.lane.b32.xlu0 %v6351_v3, %s8285_s15  ;;  %411 = vrot.lane.b32.xlu1 %v6354_v4, %s8285_s15  ;;  %v6380_v12 = vcombine.low %v8463_v11, %v8463_v11  ;;  %v6396_v16 = vcombine.low %v8477_v15, %v8477_v15  ;;  %v6399_v18 = vcombine.low %v8484_v17, %v8484_v17  ;;  %v8491_v19 = vld [vmem:[%s8427_s28 + $0x8] sm:$0xf]  ;;  %v8498_v21 = vld [vmem:[%s8427_s28 + $0xc] sm:$0xf]  ;;  %p207_p10 = scmp.lt.s32.totalorder %s8418_s23, 63  ;;  %s9744_s16 = smov (!%p205_p7, %s8266_s16), 1 }
  0x3c   : > { %6861 = vmatprep.subr.bf16.mxu0 %v8283_v0  ;;  %v6410_v20 = vcombine.low %v8491_v19, %v8491_v19  ;;  %v6413_v22 = vcombine.low %v8498_v21, %v8498_v21  ;;  %v8505_v23 = vld [vmem:[%s8427_s28 + $0xc] sm:$0xf]  ;;  %v8512_v25 = vld [vmem:[%s8427_s28 + $0x10] sm:$0xf]  ;;  %v8540_v33 = vld [vmem:[%s8427_s28 + $0x14] sm:$0xf] }
  0x3d   : > { %6858 = vmatmul.mubr.msk.bf16.vlgmr.msra.gmra.mrb[0].mxu0 %vm260_vm2, %v8444_v7  ;;  %v6426_v24 = vcombine.low %v8505_v23, %v8505_v23  ;;  %v6429_v26 = vcombine.low %v8512_v25, %v8512_v25  ;;  %v8519_v27 = vld [vmem:[%s8427_s28 + $0xc] sm:$0xf]  ;;  %v8526_v29 = vld [vmem:[%s8427_s28 + $0x10] sm:$0xf]  ;;  %v6459_v34 = vcombine.low %v8540_v33, %v8540_v33  ;;  %v8554_v37 = vld [vmem:[%s8427_s28 + $0x14] sm:$0xf] }
  0x3e   : > { %6863 = vmatprep.mubr.msk.bf16.mxu0 %vm8284_vm0, %v8283_v0  ;;  %v6440_v28 = vcombine.low %v8519_v27, %v8519_v27  ;;  %v6443_v30 = vcombine.low %v8526_v29, %v8526_v29  ;;  %v8533_v31 = vld [vmem:[%s8427_s28 + $0x10] sm:$0xf]  ;;  %v6473_v38 = vcombine.low %v8554_v37, %v8554_v37  ;;  %v8561_v39 = vld [vmem:[%s8427_s28 + $0x14] sm:$0xf]  ;;  %v6484_v41 = vld [vmem:[%s8427_s28 + $0x18] sm:$0xf] }
  0x3f   : > { %506 = vrot.lane.b32.xlu0 %v6351_v3, %s8286_s8  ;;  %599 = vrot.lane.b32.xlu1 %v6354_v4, %s8286_s8  ;;  %v6456_v32 = vcombine.low %v8533_v31, %v8533_v31  ;;  %v8547_v35 = vld [vmem:[%s8427_s28 + $0x10] sm:$0xf]  ;;  %v6486_v40 = vcombine.low %v8561_v39, %v8561_v39  ;;  %v6489_v42 = vcombine.low %v6484_v41, %v6484_v41  ;;  %v6497_v43 = vld [vmem:[%s8427_s28 + $0x14] sm:$0xf]  ;;  %s9746_s23 = smov (!%p207_p10, %s8418_s23), 63  ;;  %s6328_s9 = sshll.u32 %s9744_s16, 6 }
  0x40   : > { %v6470_v36 = vcombine.low %v8547_v35, %v8547_v35  ;;  %v6500_v44 = vcombine.low %v6497_v43, %v6497_v43  ;;  %v6498_v45 = vld [vmem:[%s8427_s28 + $0x18] sm:$0xf]  ;;  %v6514_v49 = vld [vmem:[%s8427_s28 + $0x1c] sm:$0xf]  ;;  %v6544_v58 = vld [vmem:[%s8427_s28 + $0x20] sm:$0xf]  ;;  %s210_s25 = sadd.s32 %s6328_s9, %s9746_s23 }
  0x41   : > { %v6503_v46 = vcombine.low %v6498_v45, %v6498_v45  ;;  %v6511_v47 = vld [vmem:[%s8427_s28 + $0x18] sm:$0xf]  ;;  %v6519_v50 = vcombine.low %v6514_v49, %v6514_v49  ;;  %v6528_v53 = vld [vmem:[%s8427_s28 + $0x1c] sm:$0xf]  ;;  %v6549_v59 = vcombine.low %v6544_v58, %v6544_v58  ;;  %v6558_v62 = vld [vmem:[%s8427_s28 + $0x20] sm:$0xf] }
  0x42   : > { %v6516_v48 = vcombine.low %v6511_v47, %v6511_v47  ;;  %v6527_v51 = vld [vmem:[%s8427_s28 + $0x18] sm:$0xf]  ;;  %v6533_v55 = vcombine.low %v6528_v53, %v6528_v53  ;;  %v6541_v56 = vld [vmem:[%s8427_s28 + $0x1c] sm:$0xf]  ;;  %v6563_v1 = vcombine.low %v6558_v62, %v6558_v62  ;;  %v8604_v4 = vld [vmem:[%s9725_s1 + $0x4] sm:$0xf] }
  0x43   : > { %705 = vrot.lane.b32.xlu0 %v6366_v8, %s8285_s15  ;;  %899 = vrot.lane.b32.xlu1 %v6366_v8, %s8286_s8  ;;  %v6530_v52 = vcombine.low %v6527_v51, %v6527_v51  ;;  %v6546_v57 = vcombine.low %v6541_v56, %v6541_v56  ;;  %v6557_v60 = vld [vmem:[%s8427_s28 + $0x1c] sm:$0xf]  ;;  %v8609_v5 = vld [vmem:[%s9725_s1 + $0x10] sm:$0xf]  ;;  %v758_v47 = vsel %vm264_vm1, %v8452_v9, 0  ;;  %s6329_s26 = sshll.u32 %s210_s25, 3 }
  0x44   : > { %v6560_v61 = vcombine.low %v6557_v60, %v6557_v60  ;;  %v6571_v8 = vld [vmem:[%s8427_s28 + $0x20] sm:$0xf]  ;;  %v8710_v45 = vld [vmem:[%s9725_s1 + $0x30] sm:$0xf]  ;;  %v8728_v9 = vld [vmem:[%s9725_s1 + $0x28] sm:$0xf]  ;;  %s9012_s27 = scalar_lea.vmem %s9727_s3, %s6329_s26 }
  0x45   : > { %v8733_v49 = vld [vmem:[%s9725_s1 + $0x34] sm:$0xf]  ;;  %v8754_v53 = vld [vmem:[%s9725_s1 + $0x38] sm:$0xf]  ;;  %v8775_v58 = vld [vmem:[%s9725_s1 + $0x3c] sm:$0xf] }
  0x47   : > { %804 = vrot.lane.b32.xlu0 %v6369_v10, %s8285_s15  ;;  %992 = vrot.lane.b32.xlu1 %v6369_v10, %s8286_s8  ;;  %v365_v10 = vsel %vm264_vm1, %v8431_v2, 0 }
  0x4b   : > { %1092 = vrot.lane.b32.xlu0 %v6380_v12, %s8285_s15  ;;  %1274 = vrot.lane.b32.xlu1 %v6380_v12, %s8286_s8 }
  0x4f   : > { %1185 = vrot.lane.b32.xlu0 %v6383_v14, %s8285_s15  ;;  %1361 = vrot.lane.b32.xlu1 %v6383_v14, %s8286_s8 }
  0x53   : > { %1461 = vrot.lane.b32.xlu0 %v6396_v16, %s8285_s15  ;;  %1643 = vrot.lane.b32.xlu1 %v6396_v16, %s8286_s8  ;;  %v6576_v16 = vcombine.low %v6571_v8, %v6571_v8 }
  0x57   : > { %1554 = vrot.lane.b32.xlu0 %v6399_v18, %s8285_s15  ;;  %1730 = vrot.lane.b32.xlu1 %v6399_v18, %s8286_s8  ;;  %v6574_v18 = vld [vmem:[%s8427_s28 + $0x24] sm:$0xf] }
  0x58   : > { %v6579_v2 = vcombine.low %v6574_v18, %v6574_v18 }
  0x5b   : > { %1827 = vrot.lane.b32.xlu0 %v6410_v20, %s8285_s15  ;;  %2009 = vrot.lane.b32.xlu1 %v6410_v20, %s8286_s8 }
  0x5f   : > { %1920 = vrot.lane.b32.xlu0 %v6413_v22, %s8285_s15  ;;  %2096 = vrot.lane.b32.xlu1 %v6413_v22, %s8286_s8  ;;  %v8637_v22 = vld [vmem:[%s9725_s1 + $0x8] sm:$0xf] }
  0x63   : > { %2196 = vrot.lane.b32.xlu0 %v6426_v24, %s8285_s15  ;;  %2378 = vrot.lane.b32.xlu1 %v6426_v24, %s8286_s8  ;;  %v8642_v24 = vld [vmem:[%s9725_s1 + $0x14] sm:$0xf] }
  0x67   : > { %2289 = vrot.lane.b32.xlu0 %v6429_v26, %s8285_s15  ;;  %2465 = vrot.lane.b32.xlu1 %v6429_v26, %s8286_s8 }
  0x6b   : > { %2562 = vrot.lane.b32.xlu0 %v6440_v28, %s8285_s15  ;;  %2744 = vrot.lane.b32.xlu1 %v6440_v28, %s8286_s8  ;;  %v216_v28 = vld [vmem:[%s9726_s2] sm:$0xff] }
  0x6f   : > { %2655 = vrot.lane.b32.xlu0 %v6443_v30, %s8285_s15  ;;  %2831 = vrot.lane.b32.xlu1 %v6443_v30, %s8286_s8 }
  0x73   : > { %2931 = vrot.lane.b32.xlu0 %v6456_v32, %s8285_s15  ;;  %3113 = vrot.lane.b32.xlu1 %v6456_v32, %s8286_s8  ;;  %v8661_v32 = vld [vmem:[%s9725_s1 + $0xc] sm:$0xf] }
  0x77   : > { %3024 = vrot.lane.b32.xlu0 %v6459_v34, %s8285_s15  ;;  %3200 = vrot.lane.b32.xlu1 %v6459_v34, %s8286_s8  ;;  %v8666_v34 = vld [vmem:[%s9725_s1 + $0x18] sm:$0xf] }
  0x7b   : > { %3297 = vrot.lane.b32.xlu0 %v6470_v36, %s8285_s15  ;;  %3479 = vrot.lane.b32.xlu1 %v6470_v36, %s8286_s8 }
  0x7f   : > { %3390 = vrot.lane.b32.xlu0 %v6473_v38, %s8285_s15  ;;  %3566 = vrot.lane.b32.xlu1 %v6473_v38, %s8286_s8  ;;  %v659_v38 = vsel %vm264_vm1, %v8439_v6, 0  ;;  %v8684_v6 = vld [vmem:[%s9725_s1 + $0x20] sm:$0xf] }
  0x83   : > { %3666 = vrot.lane.b32.xlu0 %v6486_v40, %s8285_s15  ;;  %3848 = vrot.lane.b32.xlu1 %v6486_v40, %s8286_s8 }
  0x87   : > { %3759 = vrot.lane.b32.xlu0 %v6489_v42, %s8285_s15  ;;  %3935 = vrot.lane.b32.xlu1 %v6489_v42, %s8286_s8  ;;  %v8692_v42 = vld [vmem:[%s9725_s1 + $0x1c] sm:$0xf] }
  0x8b   : > { %4032 = vrot.lane.b32.xlu0 %v6500_v44, %s8285_s15  ;;  %4214 = vrot.lane.b32.xlu1 %v6500_v44, %s8286_s8  ;;  %v8705_v44 = vld [vmem:[%s9725_s1 + $0x24] sm:$0xf] }
  0x8f   : > { %4125 = vrot.lane.b32.xlu0 %v6503_v46, %s8285_s15  ;;  %4301 = vrot.lane.b32.xlu1 %v6503_v46, %s8286_s8 }
  0x93   : > { %4401 = vrot.lane.b32.xlu0 %v6516_v48, %s8285_s15  ;;  %4583 = vrot.lane.b32.xlu1 %v6516_v48, %s8286_s8 }
  0x97   : > { %4494 = vrot.lane.b32.xlu0 %v6519_v50, %s8285_s15  ;;  %4670 = vrot.lane.b32.xlu1 %v6519_v50, %s8286_s8 }
  0x9b   : > { %4767 = vrot.lane.b32.xlu0 %v6530_v52, %s8285_s15  ;;  %4949 = vrot.lane.b32.xlu1 %v6530_v52, %s8286_s8  ;;  %v8749_v52 = vld [vmem:[%s9725_s1 + $0x2c] sm:$0xf] }
  0x9f   : > { %4860 = vrot.lane.b32.xlu0 %v6533_v55, %s8285_s15  ;;  %5036 = vrot.lane.b32.xlu1 %v6533_v55, %s8286_s8  ;;  %v1046_v55 = vsel %vm264_vm1, %v8463_v11, 0 }
  0xa3   : > { %5136 = vrot.lane.b32.xlu0 %v6546_v57, %s8285_s15  ;;  %5318 = vrot.lane.b32.xlu1 %v6546_v57, %s8286_s8 }
  0xa7   : > { %5229 = vrot.lane.b32.xlu0 %v6549_v59, %s8285_s15  ;;  %5405 = vrot.lane.b32.xlu1 %v6549_v59, %s8286_s8 }
  0xab   : > { %5502 = vrot.lane.b32.xlu0 %v6560_v61, %s8285_s15  ;;  %5684 = vrot.lane.b32.xlu1 %v6560_v61, %s8286_s8 }
  0xad   : > { %v313_v63 = vpop.permute.xlu0 %312  ;;  %v412_v20 = vpop.permute.xlu1 %411 }
  0xae   : > { %v318_v3 = vsel %vm264_vm1, %v313_v63, 0  ;;  %v417_v26 = vsel %vm264_vm1, %v412_v20, 0  ;;  %v1139_v63 = vsel %vm264_vm1, %v8470_v13, 0 }
  0xaf   : > { %6862 = vmatpush3.bf16.msra.mxu0 %v318_v3  ;;  %6880 = vmatpush3.bf16.msra.mxu1 %v318_v3 }
  0xb0   : > { %6885 = vmatprep.subr.bf16.mxu1 %v8283_v0  ;;  %6867 = vmatprep.subr.bf16.mxu0 %v8283_v0 }
  0xb1   : > { %v507_v12 = vpop.permute.xlu0 %506  ;;  %5595 = vrot.lane.b32.xlu0 %v6563_v1, %s8285_s15  ;;  %5771 = vrot.lane.b32.xlu1 %v6563_v1, %s8286_s8  ;;  %v600_v30 = vpop.permute.xlu1 %599 }
  0xb2   : > { %v512_v14 = vsel %vm264_vm1, %v507_v12, 0  ;;  %6864 = vmatmul.mubr.msk.bf16.vlgmr.msra.gmra.mrb[0].mxu0 %vm260_vm2, %v8604_v4  ;;  %6882 = vmatmul.mubr.msk.bf16.vlgmr.msra.gmra.mrb[0].mxu1 %vm260_vm2, %v8609_v5  ;;  %v605_v36 = vsel %vm264_vm1, %v600_v30, 0  ;;  %v1508_v30 = vsel %vm264_vm1, %v8484_v17, 0 }
  0xb3   : > { %6886 = vmatpush3.bf16.msra.mxu1 %v512_v14  ;;  %6868 = vmatpush3.bf16.msra.mxu0 %v365_v10 }
  0xb4   : > { %6869 = vmatprep.mubr.msk.bf16.mxu0 %vm8284_vm0, %v8283_v0  ;;  %6887 = vmatprep.mubr.msk.bf16.mxu1 %vm8284_vm0, %v8283_v0 }
  0xb5   : > { %6873 = vmatprep.subr.bf16.mxu0 %v8283_v0  ;;  %6891 = vmatprep.subr.bf16.mxu1 %v8283_v0  ;;  %v706_v40 = vpop.permute.xlu0 %705  ;;  %v900_v43 = vpop.permute.xlu1 %899 }
  0xb6   : > { %5871 = vrot.lane.b32.xlu0 %v6576_v16, %s8285_s15  ;;  %6053 = vrot.lane.b32.xlu1 %v6576_v16, %s8286_s8  ;;  %v711_v41 = vsel %vm264_vm1, %v706_v40, 0  ;;  %v905_v46 = vsel %vm264_vm1, %v900_v43, 0  ;;  %v1415_v16 = vsel %vm264_vm1, %v8477_v15, 0 }
  0xb9   : > { %v805_v48 = vpop.permute.xlu0 %804  ;;  %v993_v51 = vpop.permute.xlu1 %992 }
  0xba   : > { %5964 = vrot.lane.b32.xlu0 %v6579_v2, %s8285_s15  ;;  %6140 = vrot.lane.b32.xlu1 %v6579_v2, %s8286_s8  ;;  %v810_v50 = vsel %vm264_vm1, %v805_v48, 0  ;;  %v998_v54 = vsel %vm264_vm1, %v993_v51, 0 }
  0xbd   : > { %v1093_v56 = vpop.permute.xlu0 %1092  ;;  %v1275_v60 = vpop.permute.xlu1 %1274 }
  0xbe   : > { %6870 = vmatmul.mubr.msk.bf16.vlgmr.msra.gmra.mrb[0].mxu0 %vm260_vm2, %v8637_v22  ;;  %6888 = vmatmul.mubr.msk.bf16.vlgmr.msra.gmra.mrb[0].mxu1 %vm260_vm2, %v8642_v24  ;;  %v1095_v11 = vsel %vm264_vm1, %v1093_v56, 0  ;;  %v1277_v62 = vsel %vm264_vm1, %v1275_v60, 0 }
  0xbf   : > { %6874 = vmatpush3.bf16.msra.mxu0 %v417_v26  ;;  %6892 = vmatpush3.bf16.msra.mxu1 %v417_v26 }
  0xc0   : > { %6875 = vmatprep.mubr.msk.bf16.mxu0 %vm8284_vm0, %v8283_v0  ;;  %6893 = vmatprep.mubr.msk.bf16.mxu1 %vm8284_vm0, %v8283_v0 }
  0xc1   : > { %6897 = vmatprep.subr.bf16.mxu1 %v8283_v0  ;;  %6903 = vmatprep.subr.bf16.mxu0 %v8283_v0  ;;  %v1186_v57 = vpop.permute.xlu0 %1185  ;;  %v1362_v10 = vpop.permute.xlu1 %1361 }
  0xc2   : > { %219 = vperm.xlu0 %8120, %v216_v28   ;;  %v1188_v3 = vsel %vm264_vm1, %v1186_v57, 0  ;;  %v1364_v14 = vsel %vm264_vm1, %v1362_v10, 0 }
  0xc5   : > { %v1462_v59 = vpop.permute.xlu0 %1461  ;;  %v1644_v26 = vpop.permute.xlu1 %1643 }
  0xc6   : > { %v1464_v15 = vsel %vm264_vm1, %v1462_v59, 0  ;;  %v1646_v28 = vsel %vm264_vm1, %v1644_v26, 0 }
  0xc9   : > { %v1555_v61 = vpop.permute.xlu0 %1554  ;;  %v1731_v43 = vpop.permute.xlu1 %1730 }
  0xca   : > { %6876 = vmatmul.mubr.msk.bf16.vlgmr.msra.gmra.mrb[0].mxu0 %vm260_vm2, %v8661_v32  ;;  %6894 = vmatmul.mubr.msk.bf16.vlgmr.msra.gmra.mrb[0].mxu1 %vm260_vm2, %v8666_v34 }
  0xcb   : > { %6898 = vmatpush3.bf16.msra.mxu1 %v605_v36  ;;  %6904 = vmatpush3.bf16.msra.mxu0 %v659_v38  ;;  %v1557_v38 = vsel %vm264_vm1, %v1555_v61, 0 }
  0xcc   : > { %6905 = vmatprep.mubr.msk.bf16.mxu0 %vm8284_vm0, %v8283_v0  ;;  %6899 = vmatprep.mubr.msk.bf16.mxu1 %vm8284_vm0, %v8283_v0 }
  0xcd   : > { %6909 = vmatprep.subr.bf16.mxu0 %v8283_v0  ;;  %6927 = vmatprep.subr.bf16.mxu1 %v8283_v0  ;;  %v8792_v1 = vpop.permute.xlu0 %1827 }
  0xd1   : > { %v8800_v13 = vpop.permute.xlu0 %1920 }
  0xd2   : > { %6906 = vmatmul.mubr.msk.bf16.vlgmr.msra.gmra.mrb[4].mxu0 %vm260_vm2, %v8684_v6  ;;  %v1923_v59 = vsel %vm264_vm1, %v8800_v13, 0 }
  0xd3   : > { %6910 = vmatpush3.bf16.msra.mxu0 %v711_v41  ;;  %6911 = vmatprep.mubr.msk.bf16.mxu0 %vm8284_vm0, %v8283_v0 }
  0xd4   : > { %6915 = vmatprep.subr.bf16.mxu0 %v8283_v0 }
  0xd5   : > { %v8807_v8 = vpop.permute.xlu0 %2196 }
  0xd6   : > { %6900 = vmatmul.mubr.msk.bf16.vlgmr.msra.gmra.mrb[0].mxu1 %vm260_vm2, %v8692_v42  ;;  %v2199_v13 = vsel %vm264_vm1, %v8807_v8, 0 }
  0xd7   : > { %6928 = vmatpush3.bf16.msra.mxu1 %v711_v41  ;;  %6929 = vmatprep.mubr.msk.bf16.mxu1 %vm8284_vm0, %v8283_v0 }
  0xd8   : > { %6933 = vmatprep.subr.bf16.mxu1 %v8283_v0 }
  0xd9   : > { %v8815_v12 = vpop.permute.xlu0 %2289 }
  0xda   : > { %v2292_v26 = vsel %vm264_vm1, %v8815_v12, 0 }
  0xdd   : > { %v8824_v18 = vpop.permute.xlu0 %2562 }
  0xde   : > { %6912 = vmatmul.mubr.msk.bf16.vlgmr.msra.gmra.mrb[4].mxu0 %vm260_vm2, %v8705_v44  ;;  %6930 = vmatmul.mubr.msk.bf16.vlgmr.msra.gmra.mrb[4].mxu1 %vm260_vm2, %v8710_v45 }
  0xdf   : > { %6934 = vmatpush3.bf16.msra.mxu1 %v905_v46  ;;  %6916 = vmatpush3.bf16.msra.mxu0 %v758_v47  ;;  %v1733_v46 = vsel %vm264_vm1, %v1731_v43, 0  ;;  %v1781_v47 = vsel %vm264_vm1, %v8491_v19, 0 }
  0xe0   : > { %6917 = vmatprep.mubr.msk.bf16.mxu0 %vm8284_vm0, %v8283_v0  ;;  %6935 = vmatprep.mubr.msk.bf16.mxu1 %vm8284_vm0, %v8283_v0 }
  0xe1   : > { %6921 = vmatprep.subr.bf16.mxu0 %v8283_v0  ;;  %6939 = vmatprep.subr.bf16.mxu1 %v8283_v0  ;;  %v8833_v2 = vpop.permute.xlu0 %2655 }
  0xe5   : > { %v8844_v20 = vpop.permute.xlu0 %2931 }
  0xe9   : > { %v8850_v36 = vpop.permute.xlu0 %3024 }
  0xea   : > { %6918 = vmatmul.mubr.msk.bf16.vlgmr.msra.gmra.mrb[4].mxu0 %vm260_vm2, %v8728_v9  ;;  %6936 = vmatmul.mubr.msk.bf16.vlgmr.msra.gmra.mrb[4].mxu1 %vm260_vm2, %v8733_v49 }
  0xeb   : > { %6922 = vmatpush3.bf16.msra.mxu0 %v810_v50  ;;  %6940 = vmatpush3.bf16.msra.mxu1 %v810_v50  ;;  %v1830_v50 = vsel %vm264_vm1, %v8792_v1, 0  ;;  %v2150_v1 = vsel %vm264_vm1, %v8505_v23, 0 }
  0xec   : > { %6923 = vmatprep.mubr.msk.bf16.mxu0 %vm8284_vm0, %v8283_v0  ;;  %6941 = vmatprep.mubr.msk.bf16.mxu1 %vm8284_vm0, %v8283_v0 }
  0xed   : > { %6945 = vmatprep.subr.bf16.mxu1 %v8283_v0  ;;  %6951 = vmatprep.subr.bf16.mxu0 %v8283_v0  ;;  %v8862_v17 = vpop.permute.xlu0 %3297 }
  0xf1   : > { %v8865_v40 = vpop.permute.xlu0 %3390 }
  0xf5   : > { %v8877_v41 = vpop.permute.xlu0 %3666 }
  0xf6   : > { %6924 = vmatmul.mubr.msk.bf16.vlgmr.msra.gmra.mrb[4].mxu0 %vm260_vm2, %v8749_v52  ;;  %6942 = vmatmul.mubr.msk.bf16.vlgmr.msra.gmra.mrb[4].mxu1 %vm260_vm2, %v8754_v53 }
  0xf7   : > { %6946 = vmatpush3.bf16.msra.mxu1 %v998_v54  ;;  %6952 = vmatpush3.bf16.msra.mxu0 %v1046_v55  ;;  %v2010_v54 = vpop.permute.xlu1 %2009 }
  0xf8   : > { %6953 = vmatprep.mubr.msk.bf16.mxu0 %vm8284_vm0, %v8283_v0  ;;  %6947 = vmatprep.mubr.msk.bf16.mxu1 %vm8284_vm0, %v8283_v0  ;;  %v2012_v56 = vsel %vm264_vm1, %v2010_v54, 0  ;;  %v2516_v54 = vsel %vm264_vm1, %v8519_v27, 0 }
  0xf9   : > { %6957 = vmatprep.subr.bf16.mxu0 %v8283_v0  ;;  %6975 = vmatprep.subr.bf16.mxu1 %v8283_v0  ;;  %v8882_v48 = vpop.permute.xlu0 %3759 }
  0xfb   : > { %v2097_v61 = vpop.permute.xlu1 %2096 }
  0xfd   : > { %v8894_v19 = vpop.permute.xlu0 %4032 }
  0xfe   : > { %6954 = vmatmul.mubr.msk.bf16.vlgmr.msra.gmra.mrb[8].mxu0 %vm260_vm2, %v8444_v7 }
  0xff   : > { %6958 = vmatpush3.bf16.msra.mxu0 %v1095_v11  ;;  %6959 = vmatprep.mubr.msk.bf16.mxu0 %vm8284_vm0, %v8283_v0  ;;  %v2379_v8 = vpop.permute.xlu1 %2378 }
 0x100   : > { %6963 = vmatprep.subr.bf16.mxu0 %v8283_v0 }
 0x101   : > { %v8903_v51 = vpop.permute.xlu0 %4125 }
 0x102   : > { %6948 = vmatmul.mubr.msk.bf16.vlgmr.msra.gmra.mrb[4].mxu1 %vm260_vm2, %v8775_v58 }
 0x103   : > { %6976 = vmatpush3.bf16.msra.mxu1 %v1095_v11  ;;  %6977 = vmatprep.mubr.msk.bf16.mxu1 %vm8284_vm0, %v8283_v0  ;;  %v1874_v11 = vsel %vm264_vm1, %v8498_v21, 0 }
 0x104   : > { %6981 = vmatprep.subr.bf16.mxu1 %v8283_v0 }
 0x105   : > { %v8910_v55 = vpop.permute.xlu0 %4401 }
 0x109   : > { %v8925_v57 = vpop.permute.xlu0 %4494 }
 0x10a   : > { %6960 = vmatmul.mubr.msk.bf16.vlgmr.msra.gmra.mrb[8].mxu0 %vm260_vm2, %v8604_v4  ;;  %6978 = vmatmul.mubr.msk.bf16.vlgmr.msra.gmra.mrb[8].mxu1 %vm260_vm2, %v8609_v5 }
 0x10b   : > { %6982 = vmatpush3.bf16.msra.mxu1 %v1277_v62  ;;  %6964 = vmatpush3.bf16.msra.mxu0 %v1139_v63  ;;  %v2099_v63 = vsel %vm264_vm1, %v2097_v61, 0  ;;  %v2565_v61 = vsel %vm264_vm1, %v8824_v18, 0 }
 0x10c   : > { %6965 = vmatprep.mubr.msk.bf16.mxu0 %vm8284_vm0, %v8283_v0  ;;  %6983 = vmatprep.mubr.msk.bf16.mxu1 %vm8284_vm0, %v8283_v0 }
 0x10d   : > { %6969 = vmatprep.subr.bf16.mxu0 %v8283_v0  ;;  %6987 = vmatprep.subr.bf16.mxu1 %v8283_v0  ;;  %v8927_v21 = vpop.permute.xlu0 %4767 }
 0x111   : > { %v8941_v60 = vpop.permute.xlu0 %4860 }
 0x115   : > { %v8943_v62 = vpop.permute.xlu0 %5136 }
 0x116   : > { %6966 = vmatmul.mubr.msk.bf16.vlgmr.msra.gmra.mrb[8].mxu0 %vm260_vm2, %v8637_v22  ;;  %6984 = vmatmul.mubr.msk.bf16.vlgmr.msra.gmra.mrb[8].mxu1 %vm260_vm2, %v8642_v24 }
 0x117   : > { %6970 = vmatpush3.bf16.msra.mxu0 %v1188_v3  ;;  %6988 = vmatpush3.bf16.msra.mxu1 %v1188_v3 }
 0x118   : > { %6971 = vmatprep.mubr.msk.bf16.mxu0 %vm8284_vm0, %v8283_v0  ;;  %6989 = vmatprep.mubr.msk.bf16.mxu1 %vm8284_vm0, %v8283_v0 }
 0x119   : > { %6993 = vmatprep.subr.bf16.mxu1 %v8283_v0  ;;  %6999 = vmatprep.subr.bf16.mxu0 %v8283_v0  ;;  %v8958_v23 = vpop.permute.xlu0 %5229 }
 0x11d   : > { %v8964_v3 = vpop.permute.xlu0 %5502 }
 0x122   : > { %6972 = vmatmul.mubr.msk.bf16.vlgmr.msra.gmra.mrb[8].mxu0 %vm260_vm2, %v8661_v32  ;;  %6990 = vmatmul.mubr.msk.bf16.vlgmr.msra.gmra.mrb[8].mxu1 %vm260_vm2, %v8666_v34 }
 0x123   : > { %6994 = vmatpush3.bf16.msra.mxu1 %v1364_v14  ;;  %7000 = vmatpush3.bf16.msra.mxu0 %v1415_v16  ;;  %v8974_v10 = vpop.permute.xlu0 %5595  ;;  %v2381_v14 = vsel %vm264_vm1, %v2379_v8, 0  ;;  %v2243_v16 = vsel %vm264_vm1, %v8512_v25, 0 }
 0x124   : > { %7001 = vmatprep.mubr.msk.bf16.mxu0 %vm8284_vm0, %v8283_v0  ;;  %6995 = vmatprep.mubr.msk.bf16.mxu1 %vm8284_vm0, %v8283_v0 }
 0x125   : > { %7005 = vmatprep.subr.bf16.mxu0 %v8283_v0  ;;  %7023 = vmatprep.subr.bf16.mxu1 %v8283_v0 }
 0x12a   : > { %7002 = vmatmul.mubr.msk.bf16.vlgmr.msra.gmra.mrb[12].mxu0 %vm260_vm2, %v8684_v6 }
 0x12b   : > { %7006 = vmatpush3.bf16.msra.mxu0 %v1464_v15  ;;  %7007 = vmatprep.mubr.msk.bf16.mxu0 %vm8284_vm0, %v8283_v0 }
 0x12c   : > { %7011 = vmatprep.subr.bf16.mxu0 %v8283_v0 }
 0x12e   : > { %6996 = vmatmul.mubr.msk.bf16.vlgmr.msra.gmra.mrb[8].mxu1 %vm260_vm2, %v8692_v42 }
 0x12f   : > { %7024 = vmatpush3.bf16.msra.mxu1 %v1464_v15  ;;  %7025 = vmatprep.mubr.msk.bf16.mxu1 %vm8284_vm0, %v8283_v0  ;;  %v8984_v15 = vpop.permute.xlu0 %5871 }
 0x130   : > { %7029 = vmatprep.subr.bf16.mxu1 %v8283_v0 }
 0x133   : > { %v8995_v25 = vpop.permute.xlu0 %5964 }
 0x136   : > { %7008 = vmatmul.mubr.msk.bf16.vlgmr.msra.gmra.mrb[12].mxu0 %vm260_vm2, %v8705_v44  ;;  %7026 = vmatmul.mubr.msk.bf16.vlgmr.msra.gmra.mrb[12].mxu1 %vm260_vm2, %v8710_v45 }
 0x137   : > { %7030 = vmatpush3.bf16.msra.mxu1 %v1646_v28  ;;  %7012 = vmatpush3.bf16.msra.mxu0 %v1508_v30 }
 0x138   : > { %7013 = vmatprep.mubr.msk.bf16.mxu0 %vm8284_vm0, %v8283_v0  ;;  %7031 = vmatprep.mubr.msk.bf16.mxu1 %vm8284_vm0, %v8283_v0 }
 0x139   : > { %7017 = vmatprep.subr.bf16.mxu0 %v8283_v0  ;;  %7035 = vmatprep.subr.bf16.mxu1 %v8283_v0 }
 0x141   : > { %v9003_v28 = vpop.permute.xlu0 %219 }
 0x142   : > { %7014 = vmatmul.mubr.msk.bf16.vlgmr.msra.gmra.mrb[12].mxu0 %vm260_vm2, %v8728_v9  ;;  %7032 = vmatmul.mubr.msk.bf16.vlgmr.msra.gmra.mrb[12].mxu1 %vm260_vm2, %v8733_v49 }
 0x143   : > { %7018 = vmatpush3.bf16.msra.mxu0 %v1557_v38  ;;  %7036 = vmatpush3.bf16.msra.mxu1 %v1557_v38 }
 0x144   : > { %7019 = vmatprep.mubr.msk.bf16.mxu0 %vm8284_vm0, %v8283_v0  ;;  %7037 = vmatprep.mubr.msk.bf16.mxu1 %vm8284_vm0, %v8283_v0 }
 0x145   : > { %7041 = vmatprep.subr.bf16.mxu1 %v8283_v0  ;;  %7047 = vmatprep.subr.bf16.mxu0 %v8283_v0 }
 0x14e   : > { %7020 = vmatmul.mubr.msk.bf16.vlgmr.msra.gmra.mrb[12].mxu0 %vm260_vm2, %v8749_v52  ;;  %7038 = vmatmul.mubr.msk.bf16.vlgmr.msra.gmra.mrb[12].mxu1 %vm260_vm2, %v8754_v53 }
 0x14f   : > { %7042 = vmatpush3.bf16.msra.mxu1 %v1733_v46  ;;  %7048 = vmatpush3.bf16.msra.mxu0 %v1781_v47  ;;  %v2466_v47 = vpop.permute.xlu1 %2465 }
 0x150   : > { %7049 = vmatprep.mubr.msk.bf16.mxu0 %vm8284_vm0, %v8283_v0  ;;  %7043 = vmatprep.mubr.msk.bf16.mxu1 %vm8284_vm0, %v8283_v0 }
 0x151   : > { %7053 = vmatprep.subr.bf16.mxu0 %v8283_v0  ;;  %7071 = vmatprep.subr.bf16.mxu1 %v8283_v0 }
 0x153   : > { %v2745_v18 = vpop.permute.xlu1 %2744 }
 0x156   : > { %7050 = vmatmul.mubr.msk.bf16.vlgmr.msra.gmra.mrb[16].mxu0 %vm260_vm2, %v8444_v7 }
 0x157   : > { %7054 = vmatpush3.bf16.msra.mxu0 %v1830_v50  ;;  %7055 = vmatprep.mubr.msk.bf16.mxu0 %vm8284_vm0, %v8283_v0 }
 0x158   : > { %7059 = vmatprep.subr.bf16.mxu0 %v8283_v0 }
 0x15a   : > { %7044 = vmatmul.mubr.msk.bf16.vlgmr.msra.gmra.mrb[12].mxu1 %vm260_vm2, %v8775_v58 }
 0x15b   : > { %7072 = vmatpush3.bf16.msra.mxu1 %v1830_v50  ;;  %7073 = vmatprep.mubr.msk.bf16.mxu1 %vm8284_vm0, %v8283_v0  ;;  %v2468_v50 = vsel %vm264_vm1, %v2466_v47, 0  ;;  %v2934_v47 = vsel %vm264_vm1, %v8844_v20, 0 }
 0x15c   : > { %7077 = vmatprep.subr.bf16.mxu1 %v8283_v0 }
 0x162   : > { %7056 = vmatmul.mubr.msk.bf16.vlgmr.msra.gmra.mrb[16].mxu0 %vm260_vm2, %v8604_v4  ;;  %7074 = vmatmul.mubr.msk.bf16.vlgmr.msra.gmra.mrb[16].mxu1 %vm260_vm2, %v8609_v5 }
 0x163   : > { %7078 = vmatpush3.bf16.msra.mxu1 %v2012_v56  ;;  %7060 = vmatpush3.bf16.msra.mxu0 %v1874_v11 }
 0x164   : > { %7061 = vmatprep.mubr.msk.bf16.mxu0 %vm8284_vm0, %v8283_v0  ;;  %7079 = vmatprep.mubr.msk.bf16.mxu1 %vm8284_vm0, %v8283_v0 }
 0x165   : > { %7065 = vmatprep.subr.bf16.mxu0 %v8283_v0  ;;  %7083 = vmatprep.subr.bf16.mxu1 %v8283_v0 }
 0x16e   : > { %7062 = vmatmul.mubr.msk.bf16.vlgmr.msra.gmra.mrb[16].mxu0 %vm260_vm2, %v8637_v22  ;;  %7080 = vmatmul.mubr.msk.bf16.vlgmr.msra.gmra.mrb[16].mxu1 %vm260_vm2, %v8642_v24 }
 0x16f   : > { %7066 = vmatpush3.bf16.msra.mxu0 %v1923_v59  ;;  %7084 = vmatpush3.bf16.msra.mxu1 %v1923_v59 }
 0x170   : > { %7067 = vmatprep.mubr.msk.bf16.mxu0 %vm8284_vm0, %v8283_v0  ;;  %7085 = vmatprep.mubr.msk.bf16.mxu1 %vm8284_vm0, %v8283_v0 }
 0x171   : > { %7089 = vmatprep.subr.bf16.mxu1 %v8283_v0  ;;  %7095 = vmatprep.subr.bf16.mxu0 %v8283_v0 }
 0x17a   : > { %7068 = vmatmul.mubr.msk.bf16.vlgmr.msra.gmra.mrb[16].mxu0 %vm260_vm2, %v8661_v32  ;;  %7086 = vmatmul.mubr.msk.bf16.vlgmr.msra.gmra.mrb[16].mxu1 %vm260_vm2, %v8666_v34 }
 0x17b   : > { %7090 = vmatpush3.bf16.msra.mxu1 %v2099_v63  ;;  %7096 = vmatpush3.bf16.msra.mxu0 %v2150_v1  ;;  %v2747_v1 = vsel %vm264_vm1, %v2745_v18, 0 }
 0x17c   : > { %7097 = vmatprep.mubr.msk.bf16.mxu0 %vm8284_vm0, %v8283_v0  ;;  %7091 = vmatprep.mubr.msk.bf16.mxu1 %vm8284_vm0, %v8283_v0 }
 0x17d   : > { %7101 = vmatprep.subr.bf16.mxu0 %v8283_v0  ;;  %7119 = vmatprep.subr.bf16.mxu1 %v8283_v0 }
 0x182   : > { %7098 = vmatmul.mubr.msk.bf16.vlgmr.msra.gmra.mrb[20].mxu0 %vm260_vm2, %v8684_v6 }
 0x183   : > { %7102 = vmatpush3.bf16.msra.mxu0 %v2199_v13  ;;  %7103 = vmatprep.mubr.msk.bf16.mxu0 %vm8284_vm0, %v8283_v0 }
 0x184   : > { %7107 = vmatprep.subr.bf16.mxu0 %v8283_v0 }
 0x186   : > { %7092 = vmatmul.mubr.msk.bf16.vlgmr.msra.gmra.mrb[16].mxu1 %vm260_vm2, %v8692_v42 }
 0x187   : > { %7120 = vmatpush3.bf16.msra.mxu1 %v2199_v13  ;;  %7121 = vmatprep.mubr.msk.bf16.mxu1 %vm8284_vm0, %v8283_v0 }
 0x188   : > { %7125 = vmatprep.subr.bf16.mxu1 %v8283_v0 }
 0x18e   : > { %7104 = vmatmul.mubr.msk.bf16.vlgmr.msra.gmra.mrb[20].mxu0 %vm260_vm2, %v8705_v44  ;;  %7122 = vmatmul.mubr.msk.bf16.vlgmr.msra.gmra.mrb[20].mxu1 %vm260_vm2, %v8710_v45 }
 0x18f   : > { %7126 = vmatpush3.bf16.msra.mxu1 %v2381_v14  ;;  %7108 = vmatpush3.bf16.msra.mxu0 %v2243_v16 }
 0x190   : > { %7109 = vmatprep.mubr.msk.bf16.mxu0 %vm8284_vm0, %v8283_v0  ;;  %7127 = vmatprep.mubr.msk.bf16.mxu1 %vm8284_vm0, %v8283_v0 }
 0x191   : > { %7113 = vmatprep.subr.bf16.mxu0 %v8283_v0  ;;  %7131 = vmatprep.subr.bf16.mxu1 %v8283_v0 }
 0x19a   : > { %7110 = vmatmul.mubr.msk.bf16.vlgmr.msra.gmra.mrb[20].mxu0 %vm260_vm2, %v8728_v9  ;;  %7128 = vmatmul.mubr.msk.bf16.vlgmr.msra.gmra.mrb[20].mxu1 %vm260_vm2, %v8733_v49 }
 0x19b   : > { %7114 = vmatpush3.bf16.msra.mxu0 %v2292_v26  ;;  %7132 = vmatpush3.bf16.msra.mxu1 %v2292_v26  ;;  %v2832_v26 = vpop.permute.xlu1 %2831 }
 0x19c   : > { %7115 = vmatprep.mubr.msk.bf16.mxu0 %vm8284_vm0, %v8283_v0  ;;  %7133 = vmatprep.mubr.msk.bf16.mxu1 %vm8284_vm0, %v8283_v0 }
 0x19d   : > { %v453_v30 = vpop.f32.mrb[0].mxu0  ;;  %7137 = vmatprep.subr.bf16.mxu1 %v8283_v0  ;;  %7143 = vmatprep.subr.bf16.mxu0 %v8283_v0 }
 0x19e   : > { %v7623_v12 = vadd.f32 %v453_v30, %v9003_v28  ;;  %v6877_v38 = vpop.f32.mrb[1].mxu0  ;;  %v2834_v30 = vsel %vm264_vm1, %v2832_v26, 0  ;;  %v3344_v26 = vsel %vm264_vm1, %v8554_v37, 0  ;;  %v3393_v37 = vsel %vm264_vm1, %v8865_v40, 0 }
 0x19f   : > { %v456_v43 = vpop.f32.mrb[2].mxu0  ;;  %v3114_v20 = vpop.permute.xlu1 %3113 }
 0x1a0   : > { %461 = vst.msk [vmem:[%s9012_s27] sm:$0xff] %vm460_vm3, %v7623_v12  ;;  %v6878_v46 = vpop.f32.mrb[3].mxu0  ;;  %v2885_v12 = vsel %vm264_vm1, %v8533_v31, 0 }
 0x1a6   : > { %7116 = vmatmul.mubr.msk.bf16.vlgmr.msra.gmra.mrb[20].mxu0 %vm260_vm2, %v8749_v52  ;;  %7134 = vmatmul.mubr.msk.bf16.vlgmr.msra.gmra.mrb[20].mxu1 %vm260_vm2, %v8754_v53 }
 0x1a7   : > { %7138 = vmatpush3.bf16.msra.mxu1 %v2468_v50  ;;  %7144 = vmatpush3.bf16.msra.mxu0 %v2516_v54  ;;  %v3116_v54 = vsel %vm264_vm1, %v3114_v20, 0 }
 0x1a8   : > { %7145 = vmatprep.mubr.msk.bf16.mxu0 %vm8284_vm0, %v8283_v0  ;;  %7139 = vmatprep.mubr.msk.bf16.mxu1 %vm8284_vm0, %v8283_v0 }
 0x1a9   : > { %v641_v56 = vpop.f32.mrb[0].mxu1  ;;  %7149 = vmatprep.subr.bf16.mxu0 %v8283_v0  ;;  %7167 = vmatprep.subr.bf16.mxu1 %v8283_v0 }
 0x1aa   : > { %v7624_v27 = vadd.f32 %v641_v56, %v9003_v28  ;;  %v6901_v11 = vpop.f32.mrb[1].mxu1  ;;  %v2978_v56 = vsel %vm264_vm1, %v8540_v33, 0  ;;  %v3027_v33 = vsel %vm264_vm1, %v8850_v36, 0 }
 0x1ab   : > { %v644_v59 = vpop.f32.mrb[2].mxu1 }
 0x1ac   : > { %6360 = vst.msk [vmem:[%s9012_s27 + $0x8] sm:$0xff] %vm460_vm3, %v7624_v27  ;;  %v6902_v63 = vpop.f32.mrb[3].mxu1 }
 0x1ad   : > { %v3201_v63 = vpop.permute.xlu1 %3200 }
 0x1ae   : > { %7146 = vmatmul.mubr.msk.bf16.vlgmr.msra.gmra.mrb[24].mxu0 %vm260_vm2, %v8444_v7  ;;  %v2609_v7 = vsel %vm264_vm1, %v8526_v29, 0  ;;  %v2658_v29 = vsel %vm264_vm1, %v8833_v2, 0  ;;  %v3203_v18 = vsel %vm264_vm1, %v3201_v63, 0  ;;  %v8156_v63 = vld [vmem:[%s8427_s28 + $0x18] sm:$0xf] }
 0x1af   : > { %7150 = vmatpush3.bf16.msra.mxu0 %v2565_v61  ;;  %7151 = vmatprep.mubr.msk.bf16.mxu0 %vm8284_vm0, %v8283_v0 }
 0x1b0   : > { %7155 = vmatprep.subr.bf16.mxu0 %v8283_v0 }
 0x1b2   : > { %7140 = vmatmul.mubr.msk.bf16.vlgmr.msra.gmra.mrb[20].mxu1 %vm260_vm2, %v8775_v58 }
 0x1b3   : > { %7168 = vmatpush3.bf16.msra.mxu1 %v2565_v61  ;;  %7169 = vmatprep.mubr.msk.bf16.mxu1 %vm8284_vm0, %v8283_v0 }
 0x1b4   : > { %7173 = vmatprep.subr.bf16.mxu1 %v8283_v0 }
 0x1ba   : > { %7152 = vmatmul.mubr.msk.bf16.vlgmr.msra.gmra.mrb[24].mxu0 %vm260_vm2, %v8604_v4  ;;  %7170 = vmatmul.mubr.msk.bf16.vlgmr.msra.gmra.mrb[24].mxu1 %vm260_vm2, %v8609_v5 }
 0x1bb   : > { %7174 = vmatpush3.bf16.msra.mxu1 %v2747_v1  ;;  %7156 = vmatpush3.bf16.msra.mxu0 %v2609_v7  ;;  %v3251_v1 = vsel %vm264_vm1, %v8547_v35, 0 }
 0x1bc   : > { %7157 = vmatprep.mubr.msk.bf16.mxu0 %vm8284_vm0, %v8283_v0  ;;  %7175 = vmatprep.mubr.msk.bf16.mxu1 %vm8284_vm0, %v8283_v0 }
 0x1bd   : > { %7161 = vmatprep.subr.bf16.mxu0 %v8283_v0  ;;  %7179 = vmatprep.subr.bf16.mxu1 %v8283_v0 }
 0x1c6   : > { %7158 = vmatmul.mubr.msk.bf16.vlgmr.msra.gmra.mrb[24].mxu0 %vm260_vm2, %v8637_v22  ;;  %7176 = vmatmul.mubr.msk.bf16.vlgmr.msra.gmra.mrb[24].mxu1 %vm260_vm2, %v8642_v24 }
 0x1c7   : > { %7162 = vmatpush3.bf16.msra.mxu0 %v2658_v29  ;;  %7180 = vmatpush3.bf16.msra.mxu1 %v2658_v29 }
 0x1c8   : > { %7163 = vmatprep.mubr.msk.bf16.mxu0 %vm8284_vm0, %v8283_v0  ;;  %7181 = vmatprep.mubr.msk.bf16.mxu1 %vm8284_vm0, %v8283_v0 }
 0x1c9   : > { %v846_v13 = vpop.f32.mrb[4].mxu0  ;;  %7185 = vmatprep.subr.bf16.mxu1 %v8283_v0  ;;  %7191 = vmatprep.subr.bf16.mxu0 %v8283_v0 }
 0x1ca   : > { %v7625_v2 = vadd.f32 %v846_v13, %v9003_v28  ;;  %v6925_v8 = vpop.f32.mrb[5].mxu0 }
 0x1cb   : > { %v849_v14 = vpop.f32.mrb[6].mxu0 }
 0x1cc   : > { %6371 = vst.msk [vmem:[%s9012_s27 + $0x10] sm:$0xff] %vm460_vm3, %v7625_v2  ;;  %v6926_v16 = vpop.f32.mrb[7].mxu0  ;;  %v3300_v2 = vsel %vm264_vm1, %v8862_v17, 0  ;;  %v9152_v14 = vld [vmem:[%s9725_s1] sm:$0xf]  ;;  %v3480_v17 = vpop.permute.xlu1 %3479 }
 0x1cd   : > { %v3482_v16 = vsel %vm264_vm1, %v3480_v17, 0 }
 0x1d2   : > { %7164 = vmatmul.mubr.msk.bf16.vlgmr.msra.gmra.mrb[24].mxu0 %vm260_vm2, %v8661_v32  ;;  %7182 = vmatmul.mubr.msk.bf16.vlgmr.msra.gmra.mrb[24].mxu1 %vm260_vm2, %v8666_v34 }
 0x1d3   : > { %7186 = vmatpush3.bf16.msra.mxu1 %v2834_v30  ;;  %7192 = vmatpush3.bf16.msra.mxu0 %v2885_v12  ;;  %v3567_v30 = vpop.permute.xlu1 %3566 }
 0x1d4   : > { %7193 = vmatprep.mubr.msk.bf16.mxu0 %vm8284_vm0, %v8283_v0  ;;  %7187 = vmatprep.mubr.msk.bf16.mxu1 %vm8284_vm0, %v8283_v0  ;;  %v3569_v12 = vsel %vm264_vm1, %v3567_v30, 0 }
 0x1d5   : > { %v1034_v38 = vpop.f32.mrb[4].mxu1  ;;  %7197 = vmatprep.subr.bf16.mxu0 %v8283_v0  ;;  %7215 = vmatprep.subr.bf16.mxu1 %v8283_v0 }
 0x1d6   : > { %v7626_v31 = vadd.f32 %v1034_v38, %v9003_v28  ;;  %v6949_v43 = vpop.f32.mrb[5].mxu1  ;;  %v3620_v38 = vsel %vm264_vm1, %v8561_v39, 0 }
 0x1d7   : > { %v1037_v46 = vpop.f32.mrb[6].mxu1 }
 0x1d8   : > { %6376 = vst.msk [vmem:[%s9012_s27 + $0x18] sm:$0xff] %vm460_vm3, %v7626_v31  ;;  %v6950_v50 = vpop.f32.mrb[7].mxu1 }
 0x1d9   : > { %v8154_v50 = vld [vmem:[%s8427_s28 + $0x18] sm:$0xf] }
 0x1da   : > { %7194 = vmatmul.mubr.msk.bf16.vlgmr.msra.gmra.mrb[28].mxu0 %vm260_vm2, %v8684_v6 }
 0x1db   : > { %7198 = vmatpush3.bf16.msra.mxu0 %v2934_v47  ;;  %7199 = vmatprep.mubr.msk.bf16.mxu0 %vm8284_vm0, %v8283_v0 }
 0x1dc   : > { %7203 = vmatprep.subr.bf16.mxu0 %v8283_v0 }
 0x1de   : > { %7188 = vmatmul.mubr.msk.bf16.vlgmr.msra.gmra.mrb[24].mxu1 %vm260_vm2, %v8692_v42 }
 0x1df   : > { %7216 = vmatpush3.bf16.msra.mxu1 %v2934_v47  ;;  %7217 = vmatprep.mubr.msk.bf16.mxu1 %vm8284_vm0, %v8283_v0 }
 0x1e0   : > { %7221 = vmatprep.subr.bf16.mxu1 %v8283_v0 }
 0x1e6   : > { %7200 = vmatmul.mubr.msk.bf16.vlgmr.msra.gmra.mrb[28].mxu0 %vm260_vm2, %v8705_v44  ;;  %7218 = vmatmul.mubr.msk.bf16.vlgmr.msra.gmra.mrb[28].mxu1 %vm260_vm2, %v8710_v45 }
 0x1e7   : > { %7222 = vmatpush3.bf16.msra.mxu1 %v3116_v54  ;;  %7204 = vmatpush3.bf16.msra.mxu0 %v2978_v56  ;;  %v8155_v56 = vld [vmem:[%s8427_s28 + $0x14] sm:$0xf] }
 0x1e8   : > { %7205 = vmatprep.mubr.msk.bf16.mxu0 %vm8284_vm0, %v8283_v0  ;;  %7223 = vmatprep.mubr.msk.bf16.mxu1 %vm8284_vm0, %v8283_v0 }
 0x1e9   : > { %7209 = vmatprep.subr.bf16.mxu0 %v8283_v0  ;;  %7227 = vmatprep.subr.bf16.mxu1 %v8283_v0 }
 0x1f2   : > { %7206 = vmatmul.mubr.msk.bf16.vlgmr.msra.gmra.mrb[28].mxu0 %vm260_vm2, %v8728_v9  ;;  %7224 = vmatmul.mubr.msk.bf16.vlgmr.msra.gmra.mrb[28].mxu1 %vm260_vm2, %v8733_v49 }
 0x1f3   : > { %7210 = vmatpush3.bf16.msra.mxu0 %v3027_v33  ;;  %7228 = vmatpush3.bf16.msra.mxu1 %v3027_v33  ;;  %v3986_v33 = vsel %vm264_vm1, %v8155_v56, 0 }
 0x1f4   : > { %7211 = vmatprep.mubr.msk.bf16.mxu0 %vm8284_vm0, %v8283_v0  ;;  %7229 = vmatprep.mubr.msk.bf16.mxu1 %vm8284_vm0, %v8283_v0 }
 0x1f5   : > { %v1224_v27 = vpop.f32.mrb[8].mxu0  ;;  %7233 = vmatprep.subr.bf16.mxu1 %v8283_v0  ;;  %7239 = vmatprep.subr.bf16.mxu0 %v8283_v0 }
 0x1f6   : > { %v7627_v36 = vadd.f32 %v1224_v27, %v9003_v28  ;;  %v6973_v11 = vpop.f32.mrb[9].mxu0 }
 0x1f7   : > { %v1227_v59 = vpop.f32.mrb[10].mxu0 }
 0x1f8   : > { %6385 = vst.msk [vmem:[%s9012_s27 + $0x20] sm:$0xff] %vm460_vm3, %v7627_v36  ;;  %v6974_v61 = vpop.f32.mrb[11].mxu0 }
 0x1fe   : > { %7212 = vmatmul.mubr.msk.bf16.vlgmr.msra.gmra.mrb[28].mxu0 %vm260_vm2, %v8749_v52  ;;  %7230 = vmatmul.mubr.msk.bf16.vlgmr.msra.gmra.mrb[28].mxu1 %vm260_vm2, %v8754_v53 }
 0x1ff   : > { %7234 = vmatpush3.bf16.msra.mxu1 %v3203_v18  ;;  %7240 = vmatpush3.bf16.msra.mxu0 %v3251_v1  ;;  %v4079_v18 = vsel %vm264_vm1, %v8156_v63, 0  ;;  %v9282_v1 = vld [vmem:[%s9725_s1 + $0x4] sm:$0xf] }
 0x200   : > { %7241 = vmatprep.mubr.msk.bf16.mxu0 %vm8284_vm0, %v8283_v0  ;;  %7235 = vmatprep.mubr.msk.bf16.mxu1 %vm8284_vm0, %v8283_v0 }
 0x201   : > { %v1400_v7 = vpop.f32.mrb[8].mxu1  ;;  %7245 = vmatprep.subr.bf16.mxu0 %v8283_v0  ;;  %7263 = vmatprep.subr.bf16.mxu1 %v8283_v0 }
 0x202   : > { %v7628_v35 = vadd.f32 %v1400_v7, %v9003_v28  ;;  %v6997_v29 = vpop.f32.mrb[9].mxu1  ;;  %v4128_v7 = vsel %vm264_vm1, %v8903_v51, 0 }
 0x203   : > { %v1403_v13 = vpop.f32.mrb[10].mxu1  ;;  %v9311_v29 = vld [vmem:[%s9725_s1 + $0x14] sm:$0xf] }
 0x204   : > { %6390 = vst.msk [vmem:[%s9012_s27 + $0x28] sm:$0xff] %vm460_vm3, %v7628_v35  ;;  %v6998_v8 = vpop.f32.mrb[11].mxu1  ;;  %v9304_v35 = vld [vmem:[%s9725_s1 + $0x8] sm:$0xf] }
 0x206   : > { %7242 = vmatmul.mubr.msk.bf16.vlgmr.msra.gmra.mrb[32].mxu0 %vm260_vm2, %v9152_v14 }
 0x207   : > { %7246 = vmatpush3.bf16.msra.mxu0 %v3300_v2  ;;  %7247 = vmatprep.mubr.msk.bf16.mxu0 %vm8284_vm0, %v8283_v0 }
 0x208   : > { %7251 = vmatprep.subr.bf16.mxu0 %v8283_v0 }
 0x20a   : > { %7236 = vmatmul.mubr.msk.bf16.vlgmr.msra.gmra.mrb[28].mxu1 %vm260_vm2, %v8775_v58 }
 0x20b   : > { %7264 = vmatpush3.bf16.msra.mxu1 %v3300_v2  ;;  %7265 = vmatprep.mubr.msk.bf16.mxu1 %vm8284_vm0, %v8283_v0 }
 0x20c   : > { %7269 = vmatprep.subr.bf16.mxu1 %v8283_v0 }
 0x212   : > { %7248 = vmatmul.mubr.msk.bf16.vlgmr.msra.gmra.mrb[32].mxu0 %vm260_vm2, %v8604_v4  ;;  %7266 = vmatmul.mubr.msk.bf16.vlgmr.msra.gmra.mrb[32].mxu1 %vm260_vm2, %v8609_v5 }
 0x213   : > { %7270 = vmatpush3.bf16.msra.mxu1 %v3482_v16  ;;  %7252 = vmatpush3.bf16.msra.mxu0 %v3344_v26 }
 0x214   : > { %7253 = vmatprep.mubr.msk.bf16.mxu0 %vm8284_vm0, %v8283_v0  ;;  %7271 = vmatprep.mubr.msk.bf16.mxu1 %vm8284_vm0, %v8283_v0 }
 0x215   : > { %7257 = vmatprep.subr.bf16.mxu0 %v8283_v0  ;;  %7275 = vmatprep.subr.bf16.mxu1 %v8283_v0 }
 0x21e   : > { %7254 = vmatmul.mubr.msk.bf16.vlgmr.msra.gmra.mrb[32].mxu0 %vm260_vm2, %v8637_v22  ;;  %7272 = vmatmul.mubr.msk.bf16.vlgmr.msra.gmra.mrb[32].mxu1 %vm260_vm2, %v8642_v24 }
 0x21f   : > { %7258 = vmatpush3.bf16.msra.mxu0 %v3393_v37  ;;  %7276 = vmatpush3.bf16.msra.mxu1 %v3393_v37  ;;  %v8161_v37 = vld [vmem:[%s8427_s28 + $0x18] sm:$0xf] }
 0x220   : > { %7259 = vmatprep.mubr.msk.bf16.mxu0 %vm8284_vm0, %v8283_v0  ;;  %7277 = vmatprep.mubr.msk.bf16.mxu1 %vm8284_vm0, %v8283_v0 }
 0x221   : > { %v1593_v4 = vpop.f32.mrb[12].mxu0  ;;  %7281 = vmatprep.subr.bf16.mxu1 %v8283_v0  ;;  %7287 = vmatprep.subr.bf16.mxu0 %v8283_v0 }
 0x222   : > { %v7629_v5 = vadd.f32 %v1593_v4, %v9003_v28  ;;  %v7021_v40 = vpop.f32.mrb[13].mxu0  ;;  %v4355_v4 = vsel %vm264_vm1, %v8161_v37, 0  ;;  %v8176_v37 = vld [vmem:[%s8427_s28 + $0x1c] sm:$0xf] }
 0x223   : > { %v1596_v22 = vpop.f32.mrb[14].mxu0  ;;  %v9337_v40 = vld [vmem:[%s9725_s1 + $0x18] sm:$0xf] }
 0x224   : > { %6401 = vst.msk [vmem:[%s9012_s27 + $0x30] sm:$0xff] %vm460_vm3, %v7629_v5  ;;  %v7022_v24 = vpop.f32.mrb[15].mxu0  ;;  %v9330_v5 = vld [vmem:[%s9725_s1 + $0xc] sm:$0xf] }
 0x22a   : > { %7260 = vmatmul.mubr.msk.bf16.vlgmr.msra.gmra.mrb[32].mxu0 %vm260_vm2, %v8661_v32  ;;  %7278 = vmatmul.mubr.msk.bf16.vlgmr.msra.gmra.mrb[32].mxu1 %vm260_vm2, %v8666_v34  ;;  %v3669_v34 = vsel %vm264_vm1, %v8877_v41, 0  ;;  %v3849_v41 = vpop.permute.xlu1 %3848 }
 0x22b   : > { %7282 = vmatpush3.bf16.msra.mxu1 %v3569_v12  ;;  %7288 = vmatpush3.bf16.msra.mxu0 %v3620_v38  ;;  %v3851_v47 = vsel %vm264_vm1, %v3849_v41, 0  ;;  %v4404_v38 = vsel %vm264_vm1, %v8910_v55, 0  ;;  %v9365_v55 = vld [vmem:[%s9725_s1 + $0x1c] sm:$0xf]  ;;  %v9378_v41 = vld [vmem:[%s9725_s1 + $0x24] sm:$0xf] }
 0x22c   : > { %7289 = vmatprep.mubr.msk.bf16.mxu0 %vm8284_vm0, %v8283_v0  ;;  %7283 = vmatprep.mubr.msk.bf16.mxu1 %vm8284_vm0, %v8283_v0 }
 0x22d   : > { %v1769_v31 = vpop.f32.mrb[12].mxu1  ;;  %7293 = vmatprep.subr.bf16.mxu0 %v8283_v0  ;;  %7311 = vmatprep.subr.bf16.mxu1 %v8283_v0 }
 0x22e   : > { %v7630_v39 = vadd.f32 %v1769_v31, %v9003_v28  ;;  %v7045_v32 = vpop.f32.mrb[13].mxu1  ;;  %v3936_v20 = vpop.permute.xlu1 %3935 }
 0x22f   : > { %v1772_v43 = vpop.f32.mrb[14].mxu1  ;;  %v3938_v54 = vsel %vm264_vm1, %v3936_v20, 0 }
 0x230   : > { %6406 = vst.msk [vmem:[%s9012_s27 + $0x38] sm:$0xff] %vm460_vm3, %v7630_v39  ;;  %v7046_v46 = vpop.f32.mrb[15].mxu1  ;;  %v9355_v39 = vld [vmem:[%s9725_s1 + $0x20] sm:$0xf] }
 0x232   : > { %7290 = vmatmul.mubr.msk.bf16.vlgmr.msra.gmra.mrb[36].mxu0 %vm260_vm2, %v8684_v6  ;;  %v3713_v6 = vsel %vm264_vm1, %v8154_v50, 0  ;;  %v4497_v50 = vsel %vm264_vm1, %v8925_v57, 0 }
 0x233   : > { %7294 = vmatpush3.bf16.msra.mxu0 %v3669_v34  ;;  %7295 = vmatprep.mubr.msk.bf16.mxu0 %vm8284_vm0, %v8283_v0 }
 0x234   : > { %7299 = vmatprep.subr.bf16.mxu0 %v8283_v0 }
 0x236   : > { %7284 = vmatmul.mubr.msk.bf16.vlgmr.msra.gmra.mrb[32].mxu1 %vm260_vm2, %v8692_v42  ;;  %v3762_v42 = vsel %vm264_vm1, %v8882_v48, 0 }
 0x237   : > { %7312 = vmatpush3.bf16.msra.mxu1 %v3669_v34  ;;  %7313 = vmatprep.mubr.msk.bf16.mxu1 %vm8284_vm0, %v8283_v0  ;;  %v8166_v34 = vld [vmem:[%s8427_s28 + $0x1c] sm:$0xf] }
 0x238   : > { %7317 = vmatprep.subr.bf16.mxu1 %v8283_v0  ;;  %v4448_v46 = vsel %vm264_vm1, %v8166_v34, 0 }
 0x23e   : > { %7296 = vmatmul.mubr.msk.bf16.vlgmr.msra.gmra.mrb[36].mxu0 %vm260_vm2, %v8705_v44  ;;  %7314 = vmatmul.mubr.msk.bf16.vlgmr.msra.gmra.mrb[36].mxu1 %vm260_vm2, %v8710_v45 }
 0x23f   : > { %7318 = vmatpush3.bf16.msra.mxu1 %v3851_v47  ;;  %7300 = vmatpush3.bf16.msra.mxu0 %v3713_v6  ;;  %v9385_v47 = vld [vmem:[%s9725_s1 + $0x30] sm:$0xf]  ;;  %v9400_v6 = vld [vmem:[%s9725_s1 + $0x28] sm:$0xf] }
 0x240   : > { %7301 = vmatprep.mubr.msk.bf16.mxu0 %vm8284_vm0, %v8283_v0  ;;  %7319 = vmatprep.mubr.msk.bf16.mxu1 %vm8284_vm0, %v8283_v0 }
 0x241   : > { %7305 = vmatprep.subr.bf16.mxu0 %v8283_v0  ;;  %7323 = vmatprep.subr.bf16.mxu1 %v8283_v0 }
 0x24a   : > { %7302 = vmatmul.mubr.msk.bf16.vlgmr.msra.gmra.mrb[36].mxu0 %vm260_vm2, %v8728_v9  ;;  %7320 = vmatmul.mubr.msk.bf16.vlgmr.msra.gmra.mrb[36].mxu1 %vm260_vm2, %v8733_v49 }
 0x24b   : > { %7306 = vmatpush3.bf16.msra.mxu0 %v3762_v42  ;;  %7324 = vmatpush3.bf16.msra.mxu1 %v3762_v42  ;;  %v9407_v42 = vld [vmem:[%s9725_s1 + $0x34] sm:$0xf] }
 0x24c   : > { %7307 = vmatprep.mubr.msk.bf16.mxu0 %vm8284_vm0, %v8283_v0  ;;  %7325 = vmatprep.mubr.msk.bf16.mxu1 %vm8284_vm0, %v8283_v0 }
 0x24d   : > { %v1959_v44 = vpop.f32.mrb[16].mxu0  ;;  %7329 = vmatprep.subr.bf16.mxu1 %v8283_v0  ;;  %7335 = vmatprep.subr.bf16.mxu0 %v8283_v0 }
 0x24e   : > { %v7631_v45 = vadd.f32 %v1959_v44, %v9003_v28  ;;  %v7069_v9 = vpop.f32.mrb[17].mxu0 }
 0x24f   : > { %v1962_v48 = vpop.f32.mrb[18].mxu0 }
 0x250   : > { %6415 = vst.msk [vmem:[%s9012_s27 + $0x40] sm:$0xff] %vm460_vm3, %v7631_v45  ;;  %v7070_v49 = vpop.f32.mrb[19].mxu0 }
 0x256   : > { %7308 = vmatmul.mubr.msk.bf16.vlgmr.msra.gmra.mrb[36].mxu0 %vm260_vm2, %v8749_v52  ;;  %7326 = vmatmul.mubr.msk.bf16.vlgmr.msra.gmra.mrb[36].mxu1 %vm260_vm2, %v8754_v53  ;;  %v4035_v53 = vsel %vm264_vm1, %v8894_v19, 0  ;;  %v4215_v19 = vpop.permute.xlu1 %4214 }
 0x257   : > { %7330 = vmatpush3.bf16.msra.mxu1 %v3938_v54  ;;  %7336 = vmatpush3.bf16.msra.mxu0 %v3986_v33  ;;  %v4217_v61 = vsel %vm264_vm1, %v4215_v19, 0  ;;  %v8171_v54 = vld [vmem:[%s8427_s28 + $0x18] sm:$0xf]  ;;  %v9426_v33 = vld [vmem:[%s9725_s1 + $0x2c] sm:$0xf] }
 0x258   : > { %7337 = vmatprep.mubr.msk.bf16.mxu0 %vm8284_vm0, %v8283_v0  ;;  %7331 = vmatprep.mubr.msk.bf16.mxu1 %vm8284_vm0, %v8283_v0  ;;  %v4721_v56 = vsel %vm264_vm1, %v8171_v54, 0 }
 0x259   : > { %v2135_v27 = vpop.f32.mrb[16].mxu1  ;;  %7341 = vmatprep.subr.bf16.mxu0 %v8283_v0  ;;  %7359 = vmatprep.subr.bf16.mxu1 %v8283_v0 }
 0x25a   : > { %v7632_v36 = vadd.f32 %v2135_v27, %v9003_v28  ;;  %v7093_v52 = vpop.f32.mrb[17].mxu1  ;;  %v4302_v16 = vpop.permute.xlu1 %4301  ;;  %v9433_v27 = vld [vmem:[%s9725_s1 + $0x38] sm:$0xf] }
 0x25b   : > { %v2138_v11 = vpop.f32.mrb[18].mxu1  ;;  %v4304_v26 = vsel %vm264_vm1, %v4302_v16, 0 }
 0x25c   : > { %6420 = vst.msk [vmem:[%s9012_s27 + $0x48] sm:$0xff] %vm460_vm3, %v7632_v36  ;;  %v7094_v59 = vpop.f32.mrb[19].mxu1 }
 0x25d   : > { %v4770_v59 = vsel %vm264_vm1, %v8927_v21, 0 }
 0x25e   : > { %7338 = vmatmul.mubr.msk.bf16.vlgmr.msra.gmra.mrb[40].mxu0 %vm260_vm2, %v9152_v14  ;;  %v4584_v32 = vpop.permute.xlu1 %4583 }
 0x25f   : > { %7342 = vmatpush3.bf16.msra.mxu0 %v4035_v53  ;;  %7343 = vmatprep.mubr.msk.bf16.mxu0 %vm8284_vm0, %v8283_v0  ;;  %v4586_v43 = vsel %vm264_vm1, %v4584_v32, 0 }
 0x260   : > { %7347 = vmatprep.subr.bf16.mxu0 %v8283_v0 }
 0x262   : > { %7332 = vmatmul.mubr.msk.bf16.vlgmr.msra.gmra.mrb[36].mxu1 %vm260_vm2, %v8775_v58  ;;  %v9289_v58 = vld [vmem:[%s9725_s1 + $0x10] sm:$0xf]  ;;  %v4671_v49 = vpop.permute.xlu1 %4670 }
 0x263   : > { %7360 = vmatpush3.bf16.msra.mxu1 %v4035_v53  ;;  %7361 = vmatprep.mubr.msk.bf16.mxu1 %vm8284_vm0, %v8283_v0  ;;  %v4673_v20 = vsel %vm264_vm1, %v4671_v49, 0  ;;  %v8178_v49 = vld [vmem:[%s8427_s28 + $0x1c] sm:$0xf] }
 0x264   : > { %7365 = vmatprep.subr.bf16.mxu1 %v8283_v0 }
 0x266   : > { %v4950_v21 = vpop.permute.xlu1 %4949 }
 0x267   : > { %v4952_v63 = vsel %vm264_vm1, %v4950_v21, 0  ;;  %v5598_v21 = vsel %vm264_vm1, %v8974_v10, 0 }
 0x26a   : > { %7344 = vmatmul.mubr.msk.bf16.vlgmr.msra.gmra.mrb[40].mxu0 %vm260_vm2, %v9282_v1  ;;  %7362 = vmatmul.mubr.msk.bf16.vlgmr.msra.gmra.mrb[40].mxu1 %vm260_vm2, %v9289_v58  ;;  %v5037_v16 = vpop.permute.xlu1 %5036 }
 0x26b   : > { %7366 = vmatpush3.bf16.msra.mxu1 %v4217_v61  ;;  %7348 = vmatpush3.bf16.msra.mxu0 %v4079_v18  ;;  %v9456_v61 = vld [vmem:[%s9725_s1 + $0x3c] sm:$0xf] }
 0x26c   : > { %7349 = vmatprep.mubr.msk.bf16.mxu0 %vm8284_vm0, %v8283_v0  ;;  %7367 = vmatprep.mubr.msk.bf16.mxu1 %vm8284_vm0, %v8283_v0  ;;  %v8175_v18 = vld [vmem:[%s8427_s28 + $0x1c] sm:$0xf] }
 0x26d   : > { %7353 = vmatprep.subr.bf16.mxu0 %v8283_v0  ;;  %7371 = vmatprep.subr.bf16.mxu1 %v8283_v0 }
 0x276   : > { %7350 = vmatmul.mubr.msk.bf16.vlgmr.msra.gmra.mrb[40].mxu0 %vm260_vm2, %v9304_v35  ;;  %7368 = vmatmul.mubr.msk.bf16.vlgmr.msra.gmra.mrb[40].mxu1 %vm260_vm2, %v9311_v29 }
 0x277   : > { %7354 = vmatpush3.bf16.msra.mxu0 %v4128_v7  ;;  %7372 = vmatpush3.bf16.msra.mxu1 %v4128_v7  ;;  %v4814_v7 = vsel %vm264_vm1, %v8175_v18, 0 }
 0x278   : > { %7355 = vmatprep.mubr.msk.bf16.mxu0 %vm8284_vm0, %v8283_v0  ;;  %7373 = vmatprep.mubr.msk.bf16.mxu1 %vm8284_vm0, %v8283_v0 }
 0x279   : > { %v2328_v51 = vpop.f32.mrb[20].mxu0  ;;  %7377 = vmatprep.subr.bf16.mxu1 %v8283_v0  ;;  %7383 = vmatprep.subr.bf16.mxu0 %v8283_v0 }
 0x27a   : > { %v7633_v13 = vadd.f32 %v2328_v51, %v9003_v28  ;;  %v7117_v2 = vpop.f32.mrb[21].mxu0  ;;  %v4863_v51 = vsel %vm264_vm1, %v8941_v60, 0 }
 0x27b   : > { %v2331_v8 = vpop.f32.mrb[22].mxu0 }
 0x27c   : > { %6431 = vst.msk [vmem:[%s9012_s27 + $0x50] sm:$0xff] %vm460_vm3, %v7633_v13  ;;  %v7118_v17 = vpop.f32.mrb[23].mxu0 }
 0x282   : > { %7356 = vmatmul.mubr.msk.bf16.vlgmr.msra.gmra.mrb[40].mxu0 %vm260_vm2, %v9330_v5  ;;  %7374 = vmatmul.mubr.msk.bf16.vlgmr.msra.gmra.mrb[40].mxu1 %vm260_vm2, %v9337_v40 }
 0x283   : > { %7378 = vmatpush3.bf16.msra.mxu1 %v4304_v26  ;;  %7384 = vmatpush3.bf16.msra.mxu0 %v4355_v4  ;;  %v5039_v26 = vsel %vm264_vm1, %v5037_v16, 0  ;;  %v5090_v4 = vsel %vm264_vm1, %v8176_v37, 0  ;;  %v8181_v16 = vld [vmem:[%s8427_s28 + $0x24] sm:$0xf] }
 0x284   : > { %7385 = vmatprep.mubr.msk.bf16.mxu0 %vm8284_vm0, %v8283_v0  ;;  %7379 = vmatprep.mubr.msk.bf16.mxu1 %vm8284_vm0, %v8283_v0 }
 0x285   : > { %v2504_v22 = vpop.f32.mrb[20].mxu1  ;;  %7389 = vmatprep.subr.bf16.mxu0 %v8283_v0  ;;  %7407 = vmatprep.subr.bf16.mxu1 %v8283_v0 }
 0x286   : > { %v7634_v24 = vadd.f32 %v2504_v22, %v9003_v28  ;;  %v7141_v30 = vpop.f32.mrb[21].mxu1 }
 0x287   : > { %v2507_v12 = vpop.f32.mrb[22].mxu1 }
 0x288   : > { %6436 = vst.msk [vmem:[%s9012_s27 + $0x58] sm:$0xff] %vm460_vm3, %v7634_v24  ;;  %v7142_v31 = vpop.f32.mrb[23].mxu1 }
 0x28a   : > { %7386 = vmatmul.mubr.msk.bf16.vlgmr.msra.gmra.mrb[44].mxu0 %vm260_vm2, %v9355_v39 }
 0x28b   : > { %7390 = vmatpush3.bf16.msra.mxu0 %v4404_v38  ;;  %7391 = vmatprep.mubr.msk.bf16.mxu0 %vm8284_vm0, %v8283_v0 }
 0x28c   : > { %7395 = vmatprep.subr.bf16.mxu0 %v8283_v0 }
 0x28e   : > { %7380 = vmatmul.mubr.msk.bf16.vlgmr.msra.gmra.mrb[40].mxu1 %vm260_vm2, %v9365_v55 }
 0x28f   : > { %7408 = vmatpush3.bf16.msra.mxu1 %v4404_v38  ;;  %7409 = vmatprep.mubr.msk.bf16.mxu1 %vm8284_vm0, %v8283_v0  ;;  %v5139_v38 = vsel %vm264_vm1, %v8943_v62, 0  ;;  %v5319_v62 = vpop.permute.xlu1 %5318 }
 0x290   : > { %7413 = vmatprep.subr.bf16.mxu1 %v8283_v0  ;;  %v5321_v32 = vsel %vm264_vm1, %v5319_v62, 0 }
 0x296   : > { %7392 = vmatmul.mubr.msk.bf16.vlgmr.msra.gmra.mrb[44].mxu0 %vm260_vm2, %v9378_v41  ;;  %7410 = vmatmul.mubr.msk.bf16.vlgmr.msra.gmra.mrb[44].mxu1 %vm260_vm2, %v9385_v47 }
 0x297   : > { %7414 = vmatpush3.bf16.msra.mxu1 %v4586_v43  ;;  %7396 = vmatpush3.bf16.msra.mxu0 %v4448_v46  ;;  %v8177_v43 = vld [vmem:[%s8427_s28 + $0x20] sm:$0xf]  ;;  %v5232_v46 = vsel %vm264_vm1, %v8958_v23, 0 }
 0x298   : > { %7397 = vmatprep.mubr.msk.bf16.mxu0 %vm8284_vm0, %v8283_v0  ;;  %7415 = vmatprep.mubr.msk.bf16.mxu1 %vm8284_vm0, %v8283_v0  ;;  %v5183_v34 = vsel %vm264_vm1, %v8177_v43, 0 }
 0x299   : > { %7401 = vmatprep.subr.bf16.mxu0 %v8283_v0  ;;  %7419 = vmatprep.subr.bf16.mxu1 %v8283_v0 }
 0x2a2   : > { %7398 = vmatmul.mubr.msk.bf16.vlgmr.msra.gmra.mrb[44].mxu0 %vm260_vm2, %v9400_v6  ;;  %7416 = vmatmul.mubr.msk.bf16.vlgmr.msra.gmra.mrb[44].mxu1 %vm260_vm2, %v9407_v42 }
 0x2a3   : > { %7402 = vmatpush3.bf16.msra.mxu0 %v4497_v50  ;;  %7420 = vmatpush3.bf16.msra.mxu1 %v4497_v50 }
 0x2a4   : > { %7403 = vmatprep.mubr.msk.bf16.mxu0 %vm8284_vm0, %v8283_v0  ;;  %7421 = vmatprep.mubr.msk.bf16.mxu1 %vm8284_vm0, %v8283_v0 }
 0x2a5   : > { %v2694_v57 = vpop.f32.mrb[24].mxu0  ;;  %7425 = vmatprep.subr.bf16.mxu1 %v8283_v0  ;;  %7431 = vmatprep.subr.bf16.mxu0 %v8283_v0 }
 0x2a6   : > { %v7635_v44 = vadd.f32 %v2694_v57, %v9003_v28  ;;  %v7165_v45 = vpop.f32.mrb[25].mxu0 }
 0x2a7   : > { %v2697_v9 = vpop.f32.mrb[26].mxu0 }
 0x2a8   : > { %6445 = vst.msk [vmem:[%s9012_s27 + $0x60] sm:$0xff] %vm460_vm3, %v7635_v44  ;;  %v7166_v48 = vpop.f32.mrb[27].mxu0  ;;  %v5406_v9 = vpop.permute.xlu1 %5405 }
 0x2a9   : > { %v5408_v48 = vsel %vm264_vm1, %v5406_v9, 0 }
 0x2ae   : > { %7404 = vmatmul.mubr.msk.bf16.vlgmr.msra.gmra.mrb[44].mxu0 %vm260_vm2, %v9426_v33  ;;  %7422 = vmatmul.mubr.msk.bf16.vlgmr.msra.gmra.mrb[44].mxu1 %vm260_vm2, %v9433_v27 }
 0x2af   : > { %7426 = vmatpush3.bf16.msra.mxu1 %v4673_v20  ;;  %7432 = vmatpush3.bf16.msra.mxu0 %v4721_v56  ;;  %v5456_v20 = vsel %vm264_vm1, %v8178_v49, 0 }
 0x2b0   : > { %7433 = vmatprep.mubr.msk.bf16.mxu0 %vm8284_vm0, %v8283_v0  ;;  %7427 = vmatprep.mubr.msk.bf16.mxu1 %vm8284_vm0, %v8283_v0 }
 0x2b1   : > { %v2870_v36 = vpop.f32.mrb[24].mxu1  ;;  %7437 = vmatprep.subr.bf16.mxu0 %v8283_v0  ;;  %7455 = vmatprep.subr.bf16.mxu1 %v8283_v0 }
 0x2b2   : > { %v7636_v52 = vadd.f32 %v2870_v36, %v9003_v28  ;;  %v7189_v11 = vpop.f32.mrb[25].mxu1 }
 0x2b3   : > { %v2873_v53 = vpop.f32.mrb[26].mxu1  ;;  %v5505_v11 = vsel %vm264_vm1, %v8964_v3, 0  ;;  %v5685_v3 = vpop.permute.xlu1 %5684 }
 0x2b4   : > { %6450 = vst.msk [vmem:[%s9012_s27 + $0x68] sm:$0xff] %vm460_vm3, %v7636_v52  ;;  %v7190_v19 = vpop.f32.mrb[27].mxu1 }
 0x2b5   : > { %v8179_v19 = vld [vmem:[%s8427_s28 + $0x20] sm:$0xf] }
 0x2b6   : > { %7434 = vmatmul.mubr.msk.bf16.vlgmr.msra.gmra.mrb[48].mxu0 %vm260_vm2, %v9152_v14 }
 0x2b7   : > { %7438 = vmatpush3.bf16.msra.mxu0 %v4770_v59  ;;  %7439 = vmatprep.mubr.msk.bf16.mxu0 %vm8284_vm0, %v8283_v0 }
 0x2b8   : > { %7443 = vmatprep.subr.bf16.mxu0 %v8283_v0 }
 0x2ba   : > { %7428 = vmatmul.mubr.msk.bf16.vlgmr.msra.gmra.mrb[44].mxu1 %vm260_vm2, %v9456_v61 }
 0x2bb   : > { %7456 = vmatpush3.bf16.msra.mxu1 %v4770_v59  ;;  %7457 = vmatprep.mubr.msk.bf16.mxu1 %vm8284_vm0, %v8283_v0  ;;  %v5687_v59 = vsel %vm264_vm1, %v5685_v3, 0 }
 0x2bc   : > { %7461 = vmatprep.subr.bf16.mxu1 %v8283_v0 }
 0x2c2   : > { %7440 = vmatmul.mubr.msk.bf16.vlgmr.msra.gmra.mrb[48].mxu0 %vm260_vm2, %v9282_v1  ;;  %7458 = vmatmul.mubr.msk.bf16.vlgmr.msra.gmra.mrb[48].mxu1 %vm260_vm2, %v9289_v58 }
 0x2c3   : > { %7462 = vmatpush3.bf16.msra.mxu1 %v4952_v63  ;;  %7444 = vmatpush3.bf16.msra.mxu0 %v4814_v7  ;;  %v5772_v63 = vpop.permute.xlu1 %5771  ;;  %v8180_v7 = vld [vmem:[%s8427_s28 + $0x20] sm:$0xf] }
 0x2c4   : > { %7445 = vmatprep.mubr.msk.bf16.mxu0 %vm8284_vm0, %v8283_v0  ;;  %7463 = vmatprep.mubr.msk.bf16.mxu1 %vm8284_vm0, %v8283_v0  ;;  %v5774_v18 = vsel %vm264_vm1, %v5772_v63, 0 }
 0x2c5   : > { %7449 = vmatprep.subr.bf16.mxu0 %v8283_v0  ;;  %7467 = vmatprep.subr.bf16.mxu1 %v8283_v0 }
 0x2ce   : > { %7446 = vmatmul.mubr.msk.bf16.vlgmr.msra.gmra.mrb[48].mxu0 %vm260_vm2, %v9304_v35  ;;  %7464 = vmatmul.mubr.msk.bf16.vlgmr.msra.gmra.mrb[48].mxu1 %vm260_vm2, %v9311_v29 }
 0x2cf   : > { %7450 = vmatpush3.bf16.msra.mxu0 %v4863_v51  ;;  %7468 = vmatpush3.bf16.msra.mxu1 %v4863_v51  ;;  %v5825_v51 = vsel %vm264_vm1, %v8180_v7, 0 }
 0x2d0   : > { %7451 = vmatprep.mubr.msk.bf16.mxu0 %vm8284_vm0, %v8283_v0  ;;  %7469 = vmatprep.mubr.msk.bf16.mxu1 %vm8284_vm0, %v8283_v0 }
 0x2d1   : > { %v3063_v13 = vpop.f32.mrb[28].mxu0  ;;  %7473 = vmatprep.subr.bf16.mxu1 %v8283_v0  ;;  %7479 = vmatprep.subr.bf16.mxu0 %v8283_v0 }
 0x2d2   : > { %v7637_v60 = vadd.f32 %v3063_v13, %v9003_v28  ;;  %v7213_v2 = vpop.f32.mrb[29].mxu0 }
 0x2d3   : > { %v3066_v8 = vpop.f32.mrb[30].mxu0 }
 0x2d4   : > { %6461 = vst.msk [vmem:[%s9012_s27 + $0x70] sm:$0xff] %vm460_vm3, %v7637_v60  ;;  %v7214_v17 = vpop.f32.mrb[31].mxu0 }
 0x2da   : > { %7452 = vmatmul.mubr.msk.bf16.vlgmr.msra.gmra.mrb[48].mxu0 %vm260_vm2, %v9330_v5  ;;  %7470 = vmatmul.mubr.msk.bf16.vlgmr.msra.gmra.mrb[48].mxu1 %vm260_vm2, %v9337_v40 }
 0x2db   : > { %7474 = vmatpush3.bf16.msra.mxu1 %v5039_v26  ;;  %7480 = vmatpush3.bf16.msra.mxu0 %v5090_v4 }
 0x2dc   : > { %7481 = vmatprep.mubr.msk.bf16.mxu0 %vm8284_vm0, %v8283_v0  ;;  %7475 = vmatprep.mubr.msk.bf16.mxu1 %vm8284_vm0, %v8283_v0 }
 0x2dd   : > { %v3239_v22 = vpop.f32.mrb[28].mxu1  ;;  %7485 = vmatprep.subr.bf16.mxu0 %v8283_v0  ;;  %7503 = vmatprep.subr.bf16.mxu1 %v8283_v0 }
 0x2de   : > { %v7638_v24 = vadd.f32 %v3239_v22, %v9003_v28  ;;  %v7237_v30 = vpop.f32.mrb[29].mxu1 }
 0x2df   : > { %v3242_v12 = vpop.f32.mrb[30].mxu1 }
 0x2e0   : > { %6466 = vst.msk [vmem:[%s9012_s27 + $0x78] sm:$0xff] %vm460_vm3, %v7638_v24  ;;  %v7238_v31 = vpop.f32.mrb[31].mxu1 }
 0x2e2   : > { %7482 = vmatmul.mubr.msk.bf16.vlgmr.msra.gmra.mrb[52].mxu0 %vm260_vm2, %v9355_v39 }
 0x2e3   : > { %7486 = vmatpush3.bf16.msra.mxu0 %v5139_v38  ;;  %7487 = vmatprep.mubr.msk.bf16.mxu0 %vm8284_vm0, %v8283_v0 }
 0x2e4   : > { %7491 = vmatprep.subr.bf16.mxu0 %v8283_v0 }
 0x2e6   : > { %7476 = vmatmul.mubr.msk.bf16.vlgmr.msra.gmra.mrb[48].mxu1 %vm260_vm2, %v9365_v55 }
 0x2e7   : > { %7504 = vmatpush3.bf16.msra.mxu1 %v5139_v38  ;;  %7505 = vmatprep.mubr.msk.bf16.mxu1 %vm8284_vm0, %v8283_v0 }
 0x2e8   : > { %7509 = vmatprep.subr.bf16.mxu1 %v8283_v0 }
 0x2ee   : > { %7488 = vmatmul.mubr.msk.bf16.vlgmr.msra.gmra.mrb[52].mxu0 %vm260_vm2, %v9378_v41  ;;  %7506 = vmatmul.mubr.msk.bf16.vlgmr.msra.gmra.mrb[52].mxu1 %vm260_vm2, %v9385_v47 }
 0x2ef   : > { %7510 = vmatpush3.bf16.msra.mxu1 %v5321_v32  ;;  %7492 = vmatpush3.bf16.msra.mxu0 %v5183_v34 }
 0x2f0   : > { %7493 = vmatprep.mubr.msk.bf16.mxu0 %vm8284_vm0, %v8283_v0  ;;  %7511 = vmatprep.mubr.msk.bf16.mxu1 %vm8284_vm0, %v8283_v0 }
 0x2f1   : > { %7497 = vmatprep.subr.bf16.mxu0 %v8283_v0  ;;  %7515 = vmatprep.subr.bf16.mxu1 %v8283_v0 }
 0x2fa   : > { %7494 = vmatmul.mubr.msk.bf16.vlgmr.msra.gmra.mrb[52].mxu0 %vm260_vm2, %v9400_v6  ;;  %7512 = vmatmul.mubr.msk.bf16.vlgmr.msra.gmra.mrb[52].mxu1 %vm260_vm2, %v9407_v42 }
 0x2fb   : > { %7498 = vmatpush3.bf16.msra.mxu0 %v5232_v46  ;;  %7516 = vmatpush3.bf16.msra.mxu1 %v5232_v46 }
 0x2fc   : > { %7499 = vmatprep.mubr.msk.bf16.mxu0 %vm8284_vm0, %v8283_v0  ;;  %7517 = vmatprep.mubr.msk.bf16.mxu1 %vm8284_vm0, %v8283_v0 }
 0x2fd   : > { %v3429_v50 = vpop.f32.mrb[32].mxu0  ;;  %7521 = vmatprep.subr.bf16.mxu1 %v8283_v0  ;;  %7527 = vmatprep.subr.bf16.mxu0 %v8283_v0 }
 0x2fe   : > { %v7639_v23 = vadd.f32 %v3429_v50, %v9003_v28  ;;  %v7261_v57 = vpop.f32.mrb[33].mxu0 }
 0x2ff   : > { %v3432_v44 = vpop.f32.mrb[34].mxu0 }
 0x300   : > { %6475 = vst.msk [vmem:[%s9012_s27 + $0x80] sm:$0xff] %vm460_vm3, %v7639_v23  ;;  %v7262_v45 = vpop.f32.mrb[35].mxu0 }
 0x306   : > { %7500 = vmatmul.mubr.msk.bf16.vlgmr.msra.gmra.mrb[52].mxu0 %vm260_vm2, %v9426_v33  ;;  %7518 = vmatmul.mubr.msk.bf16.vlgmr.msra.gmra.mrb[52].mxu1 %vm260_vm2, %v9433_v27 }
 0x307   : > { %7522 = vmatpush3.bf16.msra.mxu1 %v5408_v48  ;;  %7528 = vmatpush3.bf16.msra.mxu0 %v5456_v20 }
 0x308   : > { %7529 = vmatprep.mubr.msk.bf16.mxu0 %vm8284_vm0, %v8283_v0  ;;  %7523 = vmatprep.mubr.msk.bf16.mxu1 %vm8284_vm0, %v8283_v0 }
 0x309   : > { %v3605_v54 = vpop.f32.mrb[32].mxu1  ;;  %7533 = vmatprep.subr.bf16.mxu0 %v8283_v0  ;;  %7551 = vmatprep.subr.bf16.mxu1 %v8283_v0 }
 0x30a   : > { %v7640_v56 = vadd.f32 %v3605_v54, %v9003_v28  ;;  %v7285_v36 = vpop.f32.mrb[33].mxu1 }
 0x30b   : > { %v3608_v52 = vpop.f32.mrb[34].mxu1 }
 0x30c   : > { %6480 = vst.msk [vmem:[%s9012_s27 + $0x88] sm:$0xff] %vm460_vm3, %v7640_v56  ;;  %v7286_v53 = vpop.f32.mrb[35].mxu1 }
 0x30e   : > { %7530 = vmatmul.mubr.msk.bf16.vlgmr.msra.gmra.mrb[56].mxu0 %vm260_vm2, %v9152_v14  ;;  %v5549_v14 = vsel %vm264_vm1, %v8179_v19, 0 }
 0x30f   : > { %7534 = vmatpush3.bf16.msra.mxu0 %v5505_v11  ;;  %7535 = vmatprep.mubr.msk.bf16.mxu0 %vm8284_vm0, %v8283_v0 }
 0x310   : > { %7539 = vmatprep.subr.bf16.mxu0 %v8283_v0 }
 0x312   : > { %7524 = vmatmul.mubr.msk.bf16.vlgmr.msra.gmra.mrb[52].mxu1 %vm260_vm2, %v9456_v61 }
 0x313   : > { %7552 = vmatpush3.bf16.msra.mxu1 %v5505_v11  ;;  %7553 = vmatprep.mubr.msk.bf16.mxu1 %vm8284_vm0, %v8283_v0 }
 0x314   : > { %7557 = vmatprep.subr.bf16.mxu1 %v8283_v0 }
 0x31a   : > { %7536 = vmatmul.mubr.msk.bf16.vlgmr.msra.gmra.mrb[56].mxu0 %vm260_vm2, %v9282_v1  ;;  %7554 = vmatmul.mubr.msk.bf16.vlgmr.msra.gmra.mrb[56].mxu1 %vm260_vm2, %v9289_v58 }
 0x31b   : > { %7558 = vmatpush3.bf16.msra.mxu1 %v5687_v59  ;;  %7540 = vmatpush3.bf16.msra.mxu0 %v5549_v14 }
 0x31c   : > { %7541 = vmatprep.mubr.msk.bf16.mxu0 %vm8284_vm0, %v8283_v0  ;;  %7559 = vmatprep.mubr.msk.bf16.mxu1 %vm8284_vm0, %v8283_v0 }
 0x31d   : > { %7545 = vmatprep.subr.bf16.mxu0 %v8283_v0  ;;  %7563 = vmatprep.subr.bf16.mxu1 %v8283_v0 }
 0x326   : > { %7542 = vmatmul.mubr.msk.bf16.vlgmr.msra.gmra.mrb[56].mxu0 %vm260_vm2, %v9304_v35  ;;  %7560 = vmatmul.mubr.msk.bf16.vlgmr.msra.gmra.mrb[56].mxu1 %vm260_vm2, %v9311_v29 }
 0x327   : > { %7546 = vmatpush3.bf16.msra.mxu0 %v5598_v21  ;;  %7564 = vmatpush3.bf16.msra.mxu1 %v5598_v21 }
 0x328   : > { %7547 = vmatprep.mubr.msk.bf16.mxu0 %vm8284_vm0, %v8283_v0  ;;  %7565 = vmatprep.mubr.msk.bf16.mxu1 %vm8284_vm0, %v8283_v0 }
 0x329   : > { %v3798_v1 = vpop.f32.mrb[36].mxu0  ;;  %7569 = vmatprep.subr.bf16.mxu1 %v8283_v0  ;;  %7575 = vmatprep.subr.bf16.mxu0 %v8283_v0 }
 0x32a   : > { %v7641_v10 = vadd.f32 %v3798_v1, %v9003_v28  ;;  %v7309_v58 = vpop.f32.mrb[37].mxu0 }
 0x32b   : > { %v3801_v35 = vpop.f32.mrb[38].mxu0 }
 0x32c   : > { %6491 = vst.msk [vmem:[%s9012_s27 + $0x90] sm:$0xff] %vm460_vm3, %v7641_v10  ;;  %v7310_v29 = vpop.f32.mrb[39].mxu0 }
 0x332   : > { %7548 = vmatmul.mubr.msk.bf16.vlgmr.msra.gmra.mrb[56].mxu0 %vm260_vm2, %v9330_v5  ;;  %7566 = vmatmul.mubr.msk.bf16.vlgmr.msra.gmra.mrb[56].mxu1 %vm260_vm2, %v9337_v40  ;;  %v5874_v40 = vsel %vm264_vm1, %v8984_v15, 0  ;;  %v6054_v15 = vpop.permute.xlu1 %6053 }
 0x333   : > { %7570 = vmatpush3.bf16.msra.mxu1 %v5774_v18  ;;  %7576 = vmatpush3.bf16.msra.mxu0 %v5825_v51  ;;  %v6056_v17 = vsel %vm264_vm1, %v6054_v15, 0 }
 0x334   : > { %7577 = vmatprep.mubr.msk.bf16.mxu0 %vm8284_vm0, %v8283_v0  ;;  %7571 = vmatprep.mubr.msk.bf16.mxu1 %vm8284_vm0, %v8283_v0 }
 0x335   : > { %v3974_v13 = vpop.f32.mrb[36].mxu1  ;;  %7581 = vmatprep.subr.bf16.mxu0 %v8283_v0  ;;  %7599 = vmatprep.subr.bf16.mxu1 %v8283_v0 }
 0x336   : > { %v7642_v60 = vadd.f32 %v3974_v13, %v9003_v28  ;;  %v7333_v5 = vpop.f32.mrb[37].mxu1 }
 0x337   : > { %v3977_v2 = vpop.f32.mrb[38].mxu1 }
 0x338   : > { %6496 = vst.msk [vmem:[%s9012_s27 + $0x98] sm:$0xff] %vm460_vm3, %v7642_v60  ;;  %v7334_v8 = vpop.f32.mrb[39].mxu1 }
 0x33a   : > { %7578 = vmatmul.mubr.msk.bf16.vlgmr.msra.gmra.mrb[60].mxu0 %vm260_vm2, %v9355_v39  ;;  %v5918_v39 = vsel %vm264_vm1, %v8181_v16, 0 }
 0x33b   : > { %7582 = vmatpush3.bf16.msra.mxu0 %v5874_v40  ;;  %7583 = vmatprep.mubr.msk.bf16.mxu0 %vm8284_vm0, %v8283_v0 }
 0x33c   : > { %7587 = vmatprep.subr.bf16.mxu0 %v8283_v0 }
 0x33e   : > { %7572 = vmatmul.mubr.msk.bf16.vlgmr.msra.gmra.mrb[56].mxu1 %vm260_vm2, %v9365_v55  ;;  %v5967_v55 = vsel %vm264_vm1, %v8995_v25, 0 }
 0x33f   : > { %7600 = vmatpush3.bf16.msra.mxu1 %v5874_v40  ;;  %7601 = vmatprep.mubr.msk.bf16.mxu1 %vm8284_vm0, %v8283_v0 }
 0x340   : > { %7605 = vmatprep.subr.bf16.mxu1 %v8283_v0 }
 0x346   : > { %7584 = vmatmul.mubr.msk.bf16.vlgmr.msra.gmra.mrb[60].mxu0 %vm260_vm2, %v9378_v41  ;;  %7602 = vmatmul.mubr.msk.bf16.vlgmr.msra.gmra.mrb[60].mxu1 %vm260_vm2, %v9385_v47 }
 0x347   : > { %7606 = vmatpush3.bf16.msra.mxu1 %v6056_v17  ;;  %7588 = vmatpush3.bf16.msra.mxu0 %v5918_v39 }
 0x348   : > { %7589 = vmatprep.mubr.msk.bf16.mxu0 %vm8284_vm0, %v8283_v0  ;;  %7607 = vmatprep.mubr.msk.bf16.mxu1 %vm8284_vm0, %v8283_v0 }
 0x349   : > { %7593 = vmatprep.subr.bf16.mxu0 %v8283_v0  ;;  %7611 = vmatprep.subr.bf16.mxu1 %v8283_v0 }
 0x352   : > { %7590 = vmatmul.mubr.msk.bf16.vlgmr.msra.gmra.mrb[60].mxu0 %vm260_vm2, %v9400_v6  ;;  %7608 = vmatmul.mubr.msk.bf16.vlgmr.msra.gmra.mrb[60].mxu1 %vm260_vm2, %v9407_v42  ;;  %v6141_v42 = vpop.permute.xlu1 %6140 }
 0x353   : > { %7594 = vmatpush3.bf16.msra.mxu0 %v5967_v55  ;;  %7612 = vmatpush3.bf16.msra.mxu1 %v5967_v55  ;;  %v6143_v37 = vsel %vm264_vm1, %v6141_v42, 0 }
 0x354   : > { %7595 = vmatprep.mubr.msk.bf16.mxu0 %vm8284_vm0, %v8283_v0  ;;  %7613 = vmatprep.mubr.msk.bf16.mxu1 %vm8284_vm0, %v8283_v0 }
 0x355   : > { %v4164_v41 = vpop.f32.mrb[40].mxu0  ;;  %7617 = vmatprep.subr.bf16.mxu1 %v8283_v0 }
 0x356   : > { %v7643_v25 = vadd.f32 %v4164_v41, %v9003_v28  ;;  %v7357_v47 = vpop.f32.mrb[41].mxu0 }
 0x357   : > { %v4167_v26 = vpop.f32.mrb[42].mxu0 }
 0x358   : > { %6505 = vst.msk [vmem:[%s9012_s27 + $0xa0] sm:$0xff] %vm460_vm3, %v7643_v25  ;;  %v7358_v6 = vpop.f32.mrb[43].mxu0 }
 0x35e   : > { %7596 = vmatmul.mubr.msk.bf16.vlgmr.msra.gmra.mrb[60].mxu0 %vm260_vm2, %v9426_v33  ;;  %7614 = vmatmul.mubr.msk.bf16.vlgmr.msra.gmra.mrb[60].mxu1 %vm260_vm2, %v9433_v27 }
 0x35f   : > { %7618 = vmatpush3.bf16.msra.mxu1 %v6143_v37  ;;  %7619 = vmatprep.mubr.msk.bf16.mxu1 %vm8284_vm0, %v8283_v0 }
 0x361   : > { %v4340_v4 = vpop.f32.mrb[40].mxu1 }
 0x362   : > { %v7644_v22 = vadd.f32 %v4340_v4, %v9003_v28  ;;  %v7381_v24 = vpop.f32.mrb[41].mxu1 }
 0x363   : > { %v4343_v30 = vpop.f32.mrb[42].mxu1 }
 0x364   : > { %6510 = vst.msk [vmem:[%s9012_s27 + $0xa8] sm:$0xff] %vm460_vm3, %v7644_v22  ;;  %v7382_v12 = vpop.f32.mrb[43].mxu1 }
 0x36a   : > { %7620 = vmatmul.mubr.msk.bf16.vlgmr.msra.gmra.mrb[60].mxu1 %vm260_vm2, %v9456_v61 }
 0x381   : > { %v4533_v33 = vpop.f32.mrb[44].mxu0 }
 0x382   : > { %v7645_v27 = vadd.f32 %v4533_v33, %v9003_v28  ;;  %v7405_v38 = vpop.f32.mrb[45].mxu0 }
 0x383   : > { %v4536_v31 = vpop.f32.mrb[46].mxu0 }
 0x384   : > { %6521 = vst.msk [vmem:[%s9012_s27 + $0xb0] sm:$0xff] %vm460_vm3, %v7645_v27  ;;  %v7406_v0 = vpop.f32.mrb[47].mxu0 }
 0x38d   : > { %v4709_v62 = vpop.f32.mrb[44].mxu1 }
 0x38e   : > { %v7646_v32 = vadd.f32 %v4709_v62, %v9003_v28  ;;  %v7429_v43 = vpop.f32.mrb[45].mxu1 }
 0x38f   : > { %v4712_v34 = vpop.f32.mrb[46].mxu1 }
 0x390   : > { %6526 = vst.msk [vmem:[%s9012_s27 + $0xb8] sm:$0xff] %vm460_vm3, %v7646_v32  ;;  %v7430_v46 = vpop.f32.mrb[47].mxu1 }
 0x3ad   : > { %v4899_v50 = vpop.f32.mrb[48].mxu0 }
 0x3ae   : > { %v7647_v61 = vadd.f32 %v4899_v50, %v9003_v28  ;;  %v7453_v23 = vpop.f32.mrb[49].mxu0 }
 0x3af   : > { %v4902_v57 = vpop.f32.mrb[50].mxu0 }
 0x3b0   : > { %6535 = vst.msk [vmem:[%s9012_s27 + $0xc0] sm:$0xff] %vm460_vm3, %v7647_v61  ;;  %v7454_v44 = vpop.f32.mrb[51].mxu0 }
 0x3b9   : > { %v5075_v45 = vpop.f32.mrb[48].mxu1 }
 0x3ba   : > { %v7648_v9 = vadd.f32 %v5075_v45, %v9003_v28  ;;  %v7477_v48 = vpop.f32.mrb[49].mxu1 }
 0x3bb   : > { %v5078_v49 = vpop.f32.mrb[50].mxu1 }
 0x3bc   : > { %6540 = vst.msk [vmem:[%s9012_s27 + $0xc8] sm:$0xff] %vm460_vm3, %v7648_v9  ;;  %v7478_v20 = vpop.f32.mrb[51].mxu1 }
 0x3d9   : > { %v5268_v54 = vpop.f32.mrb[52].mxu0 }
 0x3da   : > { %v7649_v56 = vadd.f32 %v5268_v54, %v9003_v28  ;;  %v7501_v36 = vpop.f32.mrb[53].mxu0 }
 0x3db   : > { %v5271_v52 = vpop.f32.mrb[54].mxu0 }
 0x3dc   : > { %6551 = vst.msk [vmem:[%s9012_s27 + $0xd0] sm:$0xff] %vm460_vm3, %v7649_v56  ;;  %v7502_v11 = vpop.f32.mrb[55].mxu0 }
 0x3e5   : > { %v5444_v53 = vpop.f32.mrb[52].mxu1 }
 0x3e6   : > { %v7650_v3 = vadd.f32 %v5444_v53, %v9003_v28  ;;  %v7525_v59 = vpop.f32.mrb[53].mxu1 }
 0x3e7   : > { %v5447_v19 = vpop.f32.mrb[54].mxu1 }
 0x3e8   : > { %6556 = vst.msk [vmem:[%s9012_s27 + $0xd8] sm:$0xff] %vm460_vm3, %v7650_v3  ;;  %v7526_v14 = vpop.f32.mrb[55].mxu1 }
 0x405   : > { %v5634_v21 = vpop.f32.mrb[56].mxu0 }
 0x406   : > { %v7651_v1 = vadd.f32 %v5634_v21, %v9003_v28  ;;  %v7549_v10 = vpop.f32.mrb[57].mxu0 }
 0x407   : > { %v5637_v58 = vpop.f32.mrb[58].mxu0 }
 0x408   : > { %6565 = vst.msk [vmem:[%s9012_s27 + $0xe0] sm:$0xff] %vm460_vm3, %v7651_v1  ;;  %v7550_v35 = vpop.f32.mrb[59].mxu0 }
 0x411   : > { %v5810_v29 = vpop.f32.mrb[56].mxu1 }
 0x412   : > { %v7652_v63 = vadd.f32 %v5810_v29, %v9003_v28  ;;  %v7573_v18 = vpop.f32.mrb[57].mxu1 }
 0x413   : > { %v5813_v7 = vpop.f32.mrb[58].mxu1 }
 0x414   : > { %6570 = vst.msk [vmem:[%s9012_s27 + $0xe8] sm:$0xff] %vm460_vm3, %v7652_v63  ;;  %v7574_v51 = vpop.f32.mrb[59].mxu1 }
 0x431   : > { %v6003_v13 = vpop.f32.mrb[60].mxu0 }
 0x432   : > { %v7653_v60 = vadd.f32 %v6003_v13, %v9003_v28  ;;  %v7597_v5 = vpop.f32.mrb[61].mxu0 }
 0x433   : > { %v6006_v2 = vpop.f32.mrb[62].mxu0 }
 0x434   : > { %6581 = vst.msk [vmem:[%s9012_s27 + $0xf0] sm:$0xff] %vm460_vm3, %v7653_v60  ;;  %v7598_v40 = vpop.f32.mrb[63].mxu0 }
 0x43d   : > { %v6179_v8 = vpop.f32.mrb[60].mxu1 }
 0x43e   : > { %v7654_v15 = vadd.f32 %v6179_v8, %v9003_v28  ;;  %v7621_v17 = vpop.f32.mrb[61].mxu1 }
 0x43f   : > { %v6182_v16 = vpop.f32.mrb[62].mxu1 }
 0x440   : > { %6586 = vst.msk [vmem:[%s9012_s27 + $0xf8] sm:$0xff] %vm460_vm3, %v7654_v15  ;;  %v7622_v39 = vpop.f32.mrb[63].mxu1 }
 0x441 PF: > { %s16_s19 = sadd.s32 1, %s8278_s19   ;;  %s9730_s12 = smov %s8254_s13 }
 0x442   : > { %p13_p5 = scmp.ge.s32.totalorder %s16_s19, 6   ;;  %s9731_s13 = smov %s8258_s14 }
 0x443   : > { %s9732_s14 = smov %s8372_s29  ;;  %s9733_s15 = smov %s8270_s17 }
 0x444   : > { %s9734_s16 = smov %s8274_s18  ;;  %s9735_s17 = smov %s9738_s21 }
 0x445   : > { %s9736_s18 = smov %s9742_s22  ;;  %15 = sbr.rel (!%p13_p5) target bundleno = 5 (0x5), region = 128 }
 0x44c   :  { %6218 = vsyncpa [#allocation3], 1 }
 0x44d   :  { %6220 = vsyncpa [#allocation3 + $0x1], 1 }

</bundles_post_ra>
